<compile_context>
chip_gen: v5e
topology: v5e:2x2
jax: 0.10.0
libtpu: 0.0.40
codegen_flags: <defaults>
</compile_context>

<pallas_src>
import jax
import jax.numpy as jnp
from jax.experimental import pallas as pl
from jax.experimental.pallas import tpu as pltpu

IN_DIM = 100
IN_DIM_PAD = 128          # lane-aligned contraction for layer 1
HID_DIM = 256
OUT_DIM = 64 * 64         # 4096
MAX_TILE_M = 256          # batch rows per grid step (fits v7x VMEM comfortably)


def _generator_kernel(x_ref, w1_ref, b1_ref, w2_ref, b2_ref, w3_ref, b3_ref, o_ref):
    # Hoist bias reads once (JAX does not CSE broadcast_in_dim).
    b1 = b1_ref[...]
    b2 = b2_ref[...]
    b3 = b3_ref[...]

    # Layer 1: bf16 MXU matmul, f32 accumulate, ReLU on VPU.
    h1 = jnp.dot(x_ref[...], w1_ref[...], preferred_element_type=jnp.float32)
    h1 = jnp.maximum(h1 + b1, 0.0)

    # Layer 2.
    h2 = jnp.dot(h1.astype(jnp.bfloat16), w2_ref[...],
                 preferred_element_type=jnp.float32)
    h2 = jnp.maximum(h2 + b2, 0.0)

    # Layer 3 + Sigmoid (EUP); full 4096-wide lane-dense f32 store.
    logits = jnp.dot(h2.astype(jnp.bfloat16), w3_ref[...],
                     preferred_element_type=jnp.float32)
    o_ref[...] = jax.nn.sigmoid(logits + b3)


def _round_up(x, m):
    return ((x + m - 1) // m) * m


def generator_forward(x, params):
    """x: (B, 100) float32, B must be a multiple of 3 (torch view constraint).
    Returns (B//3, 3, 64, 64) float32, matching Generator.forward."""
    w1, b1, w2, b2, w3, b3 = params
    B = x.shape[0]
    assert x.shape[1] == IN_DIM
    assert B % 3 == 0, "batch must be a multiple of 3 for the (-1,3,64,64) view"

    # --- tile selection (static under jit) ---
    tile_m = min(MAX_TILE_M, _round_up(B, 8))
    b_pad = _round_up(B, tile_m)
    grid_m = b_pad // tile_m

    # --- wrapper-side layout prep (cheap, folds under jit) ---
    # pad batch to a tile multiple, pad K 100->128 with zeros (no-op math), bf16 cast
    x_p = jnp.zeros((b_pad, IN_DIM_PAD), jnp.bfloat16)
    x_p = x_p.at[:B, :IN_DIM].set(x.astype(jnp.bfloat16))
    w1_p = jnp.zeros((IN_DIM_PAD, HID_DIM), jnp.bfloat16)
    w1_p = w1_p.at[:IN_DIM, :].set(w1.astype(jnp.bfloat16))
    w2_b = w2.astype(jnp.bfloat16)
    w3_b = w3.astype(jnp.bfloat16)

    cost = pl.CostEstimate(
        flops=2 * b_pad * (IN_DIM_PAD * HID_DIM + HID_DIM * HID_DIM + HID_DIM * OUT_DIM),
        transcendentals=b_pad * OUT_DIM,
        bytes_accessed=(x_p.size * 2 + w1_p.size * 2 + w2_b.size * 2 + w3_b.size * 2
                        + (b1.size + b2.size + b3.size) * 4
                        + b_pad * OUT_DIM * 4),
    )

    const2 = lambda i: (0, 0)   # grid-invariant blocks: stay VMEM-resident, no re-DMA

    flat = pl.pallas_call(
        _generator_kernel,
        out_shape=jax.ShapeDtypeStruct((b_pad, OUT_DIM), jnp.float32),
        grid=(grid_m,),
        in_specs=[
            pl.BlockSpec((tile_m, IN_DIM_PAD), lambda i: (i, 0)),   # x tile
            pl.BlockSpec((IN_DIM_PAD, HID_DIM), const2),            # W1 (resident)
            pl.BlockSpec((1, HID_DIM), const2),                     # b1
            pl.BlockSpec((HID_DIM, HID_DIM), const2),               # W2
            pl.BlockSpec((1, HID_DIM), const2),                     # b2
            pl.BlockSpec((HID_DIM, OUT_DIM), const2),               # W3 (whole N=4096)
            pl.BlockSpec((1, OUT_DIM), const2),                     # b3
        ],
        out_specs=pl.BlockSpec((tile_m, OUT_DIM), lambda i: (i, 0)),
        compiler_params=pltpu.CompilerParams(
            dimension_semantics=("parallel",),   # dual-TC on v7x; harmless elsewhere
        ),
        cost_estimate=cost,
    )(x_p, w1_p, b1, w2_b, b2, w3_b, b3)

    # torch: output.view(-1, 3, 64, 64) — pure row-major reinterpretation
    return flat[:B].reshape(-1, 3, 64, 64)


def init_params(key):
    """Deterministic init mimicking torch.nn.Linear defaults:
    U(-1/sqrt(fan_in), 1/sqrt(fan_in)) for weight and bias.
    Weights stored transposed vs torch ((in, out)) so the kernel does x @ W."""
    ks = jax.random.split(key, 6)

    def linear(kw, kb, fan_in, fan_out):
        bound = 1.0 / jnp.sqrt(fan_in)
        w = jax.random.uniform(kw, (fan_in, fan_out), jnp.float32, -bound, bound)
        b = jax.random.uniform(kb, (1, fan_out), jnp.float32, -bound, bound)
        return w, b

    w1, b1 = linear(ks[0], ks[1], IN_DIM, HID_DIM)
    w2, b2 = linear(ks[2], ks[3], HID_DIM, HID_DIM)
    w3, b3 = linear(ks[4], ks[5], HID_DIM, OUT_DIM)
    return (w1, b1, w2, b2, w3, b3)


if __name__ == "__main__":
    key = jax.random.PRNGKey(0)
    pkey, xkey = jax.random.split(key)

    params = init_params(pkey)

    # batch must be a multiple of 3 for the (-1, 3, 64, 64) view to be valid
    B = 6
    x = jax.random.normal(xkey, (B, IN_DIM), dtype=jnp.float32)

    fwd = jax.jit(generator_forward)
    out = fwd(x, params)
    out = jax.block_until_ready(out)

    assert out.shape == (B // 3, 3, 64, 64), out.shape
    assert out.dtype == jnp.float32

    # sanity: sigmoid output range
    assert bool(jnp.all(out >= 0.0)) and bool(jnp.all(out <= 1.0))

    # correctness check against a pure-JAX reference of the same (bf16 MXU) math
    w1, b1, w2, b2, w3, b3 = params
    w1b, w2b, w3b = (w.astype(jnp.bfloat16) for w in (w1, w2, w3))
    xb = x.astype(jnp.bfloat16)
    ref = jnp.maximum(jnp.dot(xb, w1b, preferred_element_type=jnp.float32) + b1, 0.0)
    ref = jnp.maximum(jnp.dot(ref.astype(jnp.bfloat16), w2b,
                              preferred_element_type=jnp.float32) + b2, 0.0)
    ref = jax.nn.sigmoid(jnp.dot(ref.astype(jnp.bfloat16), w3b,
                                 preferred_element_type=jnp.float32) + b3)
    ref = ref.reshape(-1, 3, 64, 64)
    assert bool(jnp.allclose(out, ref, atol=1e-2, rtol=1e-2)), \
        float(jnp.max(jnp.abs(out - ref)))

    print("KERNEL_OK")
</pallas_src>

<mosaic_0001>
module attributes {stable_mosaic.version = 11 : i64} {
  func.func @_generator_kernel(%arg0: i32, %arg1: memref<8x128xbf16, #tpu.memory_space<vmem>>, %arg2: memref<128x256xbf16, #tpu.memory_space<vmem>>, %arg3: memref<1x256xf32, #tpu.memory_space<vmem>>, %arg4: memref<256x256xbf16, #tpu.memory_space<vmem>>, %arg5: memref<1x256xf32, #tpu.memory_space<vmem>>, %arg6: memref<256x4096xbf16, #tpu.memory_space<vmem>>, %arg7: memref<1x4096xf32, #tpu.memory_space<vmem>>, %arg8: memref<8x4096xf32, #tpu.memory_space<vmem>>) attributes {dimension_semantics = [#tpu.dimension_semantics<parallel>], iteration_bounds = array<i64: 1>, scalar_prefetch = 0 : i64, scratch_operands = 0 : i64, tpu.core_type = #tpu.core_type<tc>, window_params = [{transform_indices = @transform_0, window_bounds = array<i64: 8, 128>}, {pipeline_mode = #tpu.pipeline_mode<synchronous>, transform_indices = @transform_1, window_bounds = array<i64: 128, 256>}, {pipeline_mode = #tpu.pipeline_mode<synchronous>, transform_indices = @transform_2, window_bounds = array<i64: 1, 256>}, {pipeline_mode = #tpu.pipeline_mode<synchronous>, transform_indices = @transform_3, window_bounds = array<i64: 256, 256>}, {pipeline_mode = #tpu.pipeline_mode<synchronous>, transform_indices = @transform_4, window_bounds = array<i64: 1, 256>}, {pipeline_mode = #tpu.pipeline_mode<synchronous>, transform_indices = @transform_5, window_bounds = array<i64: 256, 4096>}, {pipeline_mode = #tpu.pipeline_mode<synchronous>, transform_indices = @transform_6, window_bounds = array<i64: 1, 4096>}, {transform_indices = @transform_7, window_bounds = array<i64: 8, 4096>}]} {
    %c0 = arith.constant 0 : index
    %c0_0 = arith.constant 0 : index
    %0 = vector.load %arg3[%c0, %c0_0] : memref<1x256xf32, #tpu.memory_space<vmem>>, vector<1x256xf32>
    %c0_1 = arith.constant 0 : index
    %c0_2 = arith.constant 0 : index
    %1 = vector.load %arg5[%c0_1, %c0_2] : memref<1x256xf32, #tpu.memory_space<vmem>>, vector<1x256xf32>
    %c0_3 = arith.constant 0 : index
    %c0_4 = arith.constant 0 : index
    %2 = vector.load %arg7[%c0_3, %c0_4] : memref<1x4096xf32, #tpu.memory_space<vmem>>, vector<1x4096xf32>
    %c0_5 = arith.constant 0 : index
    %c0_6 = arith.constant 0 : index
    %3 = vector.load %arg1[%c0_5, %c0_6] : memref<8x128xbf16, #tpu.memory_space<vmem>>, vector<8x128xbf16>
    %c0_7 = arith.constant 0 : index
    %c0_8 = arith.constant 0 : index
    %4 = vector.load %arg2[%c0_7, %c0_8] : memref<128x256xbf16, #tpu.memory_space<vmem>>, vector<128x256xbf16>
    %cst = arith.constant dense<0.000000e+00> : vector<8x256xf32>
    %5 = tpu.matmul %3, %4, %cst {dimension_numbers = #tpu.dot_dimension_numbers<[1], [0], [0], [1], [0, 0, 1, 1], [], []>} : vector<8x128xbf16>, vector<128x256xbf16>, vector<8x256xf32> -> vector<8x256xf32>
    %6 = vector.broadcast %0 : vector<1x256xf32> to vector<8x256xf32>
    %7 = arith.addf %5, %6 : vector<8x256xf32>
    %cst_9 = arith.constant 0.000000e+00 : f32
    %8 = vector.broadcast %cst_9 : f32 to vector<8x256xf32>
    %9 = arith.maximumf %7, %8 : vector<8x256xf32>
    %10 = arith.truncf %9 : vector<8x256xf32> to vector<8x256xbf16>
    %c0_10 = arith.constant 0 : index
    %c0_11 = arith.constant 0 : index
    %11 = vector.load %arg4[%c0_10, %c0_11] : memref<256x256xbf16, #tpu.memory_space<vmem>>, vector<256x256xbf16>
    %cst_12 = arith.constant dense<0.000000e+00> : vector<8x256xf32>
    %12 = tpu.matmul %10, %11, %cst_12 {dimension_numbers = #tpu.dot_dimension_numbers<[1], [0], [0], [1], [0, 0, 1, 1], [], []>} : vector<8x256xbf16>, vector<256x256xbf16>, vector<8x256xf32> -> vector<8x256xf32>
    %13 = vector.broadcast %1 : vector<1x256xf32> to vector<8x256xf32>
    %14 = arith.addf %12, %13 : vector<8x256xf32>
    %cst_13 = arith.constant 0.000000e+00 : f32
    %15 = vector.broadcast %cst_13 : f32 to vector<8x256xf32>
    %16 = arith.maximumf %14, %15 : vector<8x256xf32>
    %17 = arith.truncf %16 : vector<8x256xf32> to vector<8x256xbf16>
    %c0_14 = arith.constant 0 : index
    %c0_15 = arith.constant 0 : index
    %18 = vector.load %arg6[%c0_14, %c0_15] : memref<256x4096xbf16, #tpu.memory_space<vmem>>, vector<256x4096xbf16>
    %cst_16 = arith.constant dense<0.000000e+00> : vector<8x4096xf32>
    %19 = tpu.matmul %17, %18, %cst_16 {dimension_numbers = #tpu.dot_dimension_numbers<[1], [0], [0], [1], [0, 0, 1, 1], [], []>} : vector<8x256xbf16>, vector<256x4096xbf16>, vector<8x4096xf32> -> vector<8x4096xf32>
    %20 = vector.broadcast %2 : vector<1x4096xf32> to vector<8x4096xf32>
    %21 = arith.addf %19, %20 : vector<8x4096xf32>
    %22 = arith.negf %21 : vector<8x4096xf32>
    %23 = math.exp %22 : vector<8x4096xf32>
    %cst_17 = arith.constant 1.000000e+00 : f32
    %24 = vector.broadcast %cst_17 : f32 to vector<8x4096xf32>
    %25 = arith.addf %24, %23 : vector<8x4096xf32>
    %26 = arith.divf %24, %25 : vector<8x4096xf32>
    %c0_18 = arith.constant 0 : index
    %c0_19 = arith.constant 0 : index
    %27 = vector.load %arg8[%c0_18, %c0_19] : memref<8x4096xf32, #tpu.memory_space<vmem>>, vector<8x4096xf32>
    tpu.vector_store %arg8[%c0_18, %c0_19], %26 {strides = array<i32>} : memref<8x4096xf32, #tpu.memory_space<vmem>>, vector<8x4096xf32>,
    return
  }
  func.func @transform_0(%arg0: i32) -> (i32, i32) {
    %c0_i32 = arith.constant 0 : i32
    %c0_i32_0 = arith.constant 0 : i32
    return %arg0, %c0_i32 : i32, i32
  }
  func.func @transform_1(%arg0: i32) -> (i32, i32) {
    %c0_i32 = arith.constant 0 : i32
    %c0_i32_0 = arith.constant 0 : i32
    %c0_i32_1 = arith.constant 0 : i32
    return %c0_i32, %c0_i32_0 : i32, i32
  }
  func.func @transform_2(%arg0: i32) -> (i32, i32) {
    %c0_i32 = arith.constant 0 : i32
    %c0_i32_0 = arith.constant 0 : i32
    %c0_i32_1 = arith.constant 0 : i32
    return %c0_i32, %c0_i32_0 : i32, i32
  }
  func.func @transform_3(%arg0: i32) -> (i32, i32) {
    %c0_i32 = arith.constant 0 : i32
    %c0_i32_0 = arith.constant 0 : i32
    %c0_i32_1 = arith.constant 0 : i32
    return %c0_i32, %c0_i32_0 : i32, i32
  }
  func.func @transform_4(%arg0: i32) -> (i32, i32) {
    %c0_i32 = arith.constant 0 : i32
    %c0_i32_0 = arith.constant 0 : i32
    %c0_i32_1 = arith.constant 0 : i32
    return %c0_i32, %c0_i32_0 : i32, i32
  }
  func.func @transform_5(%arg0: i32) -> (i32, i32) {
    %c0_i32 = arith.constant 0 : i32
    %c0_i32_0 = arith.constant 0 : i32
    %c0_i32_1 = arith.constant 0 : i32
    return %c0_i32, %c0_i32_0 : i32, i32
  }
  func.func @transform_6(%arg0: i32) -> (i32, i32) {
    %c0_i32 = arith.constant 0 : i32
    %c0_i32_0 = arith.constant 0 : i32
    %c0_i32_1 = arith.constant 0 : i32
    return %c0_i32, %c0_i32_0 : i32, i32
  }
  func.func @transform_7(%arg0: i32) -> (i32, i32) {
    %c0_i32 = arith.constant 0 : i32
    %c0_i32_0 = arith.constant 0 : i32
    return %arg0, %c0_i32 : i32, i32
  }
}

</mosaic_0001>

<bundles_post_ra>
// kernel: generator_forward.1
= control target key start
LH: loop header
LB: loop body
LE: loop exit
PB: predicated region body
PF: predicated region fallthrough
CT: control target
= control target key end

     0   :  { %s12139_s1 = inlined_call_operand.vmem [shape: bf16[128,256], index: 1, kind: input, shape index: {}]   ;;  %s12140_s3 = inlined_call_operand.vmem [shape: bf16[256,256], index: 3, kind: input, shape index: {}]   ;;  %s12141_s0 = inlined_call_operand.vmem [shape: bf16[8,128], index: 0, kind: input, shape index: {}]   ;;  %s12142_s5 = inlined_call_operand.vmem [shape: bf16[256,4096], index: 5, kind: input, shape index: {}]   ;;  %s12143_s2 = inlined_call_operand.vmem [shape: f32[1,256], index: 2, kind: input, shape index: {}]   ;;  %s12144_s4 = inlined_call_operand.vmem [shape: f32[1,256], index: 4, kind: input, shape index: {}]   ;;  %s12145_s6 = inlined_call_operand.vmem [shape: f32[1,4096], index: 6, kind: input, shape index: {}]   ;;  %s12146_s7 = inlined_call_operand.vmem [shape: f32[8,4096], index: 7, kind: output, shape index: {}]  }
   0x1   :  { %v5091_v0 = vld [vmem:[%s12139_s1 + $0x70] sm:$0xf]  ;;  %v7320_v1 = vld [vmem:[%s12139_s1 + $0x74] sm:$0xf0]  ;;  %v7319_v2 = vld [vmem:[%s12139_s1 + $0x74] sm:$0xf] }
   0x2   :  { %v5092_v3 = vor.u32 %v7320_v1, %v5091_v0  ;;  %v5093_v4 = vld [vmem:[%s12139_s1 + $0x78] sm:$0xf0]  ;;  %v5083_v5 = vld [vmem:[%s12139_s1 + $0x60] sm:$0xf]  ;;  %v7318_v6 = vld [vmem:[%s12139_s1 + $0x64] sm:$0xf0] }
   0x3   :  { %v5096_v7 = vor.u32 %v7319_v2, %v5093_v4  ;;  %v7317_v8 = vld [vmem:[%s12139_s1 + $0x64] sm:$0xf]  ;;  %v5085_v9 = vld [vmem:[%s12139_s1 + $0x68] sm:$0xf0]  ;;  %v5084_v10 = vor.u32 %v7318_v6, %v5083_v5  ;;  %v5075_v12 = vld [vmem:[%s12139_s1 + $0x50] sm:$0xf] }
   0x4   :  { %134 = vmatpush.bf16.msra.mxu0 %v5092_v3  ;;  %v5088_v11 = vor.u32 %v7317_v8, %v5085_v9  ;;  %v7316_v13 = vld [vmem:[%s12139_s1 + $0x54] sm:$0xf0]  ;;  %v7315_v14 = vld [vmem:[%s12139_s1 + $0x54] sm:$0xf]  ;;  %v5077_v15 = vld [vmem:[%s12139_s1 + $0x58] sm:$0xf0] }
   0x5   :  { %147 = vmatpush.bf16.msra.mxu1 %v5096_v7  ;;  %v5076_v16 = vor.u32 %v7316_v13, %v5075_v12  ;;  %v5080_v17 = vor.u32 %v7315_v14, %v5077_v15  ;;  %v5067_v18 = vld [vmem:[%s12139_s1 + $0x40] sm:$0xf]  ;;  %v7314_v19 = vld [vmem:[%s12139_s1 + $0x44] sm:$0xf0]  ;;  %v7313_v20 = vld [vmem:[%s12139_s1 + $0x44] sm:$0xf] }
   0x6   :  { %v5069_v21 = vld [vmem:[%s12139_s1 + $0x48] sm:$0xf0]  ;;  %v5068_v22 = vor.u32 %v7314_v19, %v5067_v18  ;;  %v5155_v23 = vld [vmem:[%s12140_s3 + $0x70] sm:$0xf]  ;;  %v7336_v24 = vld [vmem:[%s12140_s3 + $0x74] sm:$0xf0] }
   0x7   :  { %v5219_v25 = vld [vmem:[%s12140_s3 + $0xf0] sm:$0xf]  ;;  %v5072_v26 = vor.u32 %v7313_v20, %v5069_v21  ;;  %v7312_v28 = vld [vmem:[%s12139_s1 + $0x34] sm:$0xf0]  ;;  %v5156_v29 = vor.u32 %v7336_v24, %v5155_v23  ;;  %v7311_v31 = vld [vmem:[%s12139_s1 + $0x34] sm:$0xf] }
   0x8   :  { %135 = vmatpush.bf16.msra.mxu0 %v5084_v10  ;;  %v5059_v27 = vld [vmem:[%s12139_s1 + $0x30] sm:$0xf]  ;;  %v7352_v30 = vld [vmem:[%s12140_s3 + $0xf4] sm:$0xf0]  ;;  %v5061_v32 = vld [vmem:[%s12139_s1 + $0x38] sm:$0xf0] }
   0x9   :  { %148 = vmatpush.bf16.msra.mxu1 %v5088_v11  ;;  %v5220_v33 = vor.u32 %v7352_v30, %v5219_v25  ;;  %v5147_v34 = vld [vmem:[%s12140_s3 + $0x60] sm:$0xf]  ;;  %361 = vmatpush.bf16.msra.mxu2 %v5156_v29  ;;  %v7334_v35 = vld [vmem:[%s12140_s3 + $0x64] sm:$0xf0]  ;;  %v5060_v38 = vor.u32 %v7312_v28, %v5059_v27  ;;  %v5064_v43 = vor.u32 %v7311_v31, %v5061_v32  ;;  %v7309_v44 = vld [vmem:[%s12139_s1 + $0x24] sm:$0xf] }
   0xa   :  { %v5211_v36 = vld [vmem:[%s12140_s3 + $0xe0] sm:$0xf]  ;;  %v7350_v37 = vld [vmem:[%s12140_s3 + $0xe4] sm:$0xf0]  ;;  %v5148_v41 = vor.u32 %v7334_v35, %v5147_v34  ;;  %v5139_v45 = vld [vmem:[%s12140_s3 + $0x50] sm:$0xf] }
   0xb   :  { %v5051_v39 = vld [vmem:[%s12139_s1 + $0x20] sm:$0xf]  ;;  %v7310_v40 = vld [vmem:[%s12139_s1 + $0x24] sm:$0xf0]  ;;  %374 = vmatpush.bf16.msra.mxu3 %v5220_v33  ;;  %v5212_v42 = vor.u32 %v7350_v37, %v5211_v36  ;;  %v7332_v46 = vld [vmem:[%s12140_s3 + $0x54] sm:$0xf0] }
   0xc   :  { %136 = vmatpush.bf16.msra.mxu0 %v5076_v16  ;;  %v5053_v47 = vld [vmem:[%s12139_s1 + $0x28] sm:$0xf0]  ;;  %v5203_v48 = vld [vmem:[%s12140_s3 + $0xd0] sm:$0xf]  ;;  %v7348_v49 = vld [vmem:[%s12140_s3 + $0xd4] sm:$0xf0]  ;;  %v5140_v50 = vor.u32 %v7332_v46, %v5139_v45  ;;  %v5052_v51 = vor.u32 %v7310_v40, %v5051_v39 }
   0xd   :  { %149 = vmatpush.bf16.msra.mxu1 %v5080_v17  ;;  %362 = vmatpush.bf16.msra.mxu2 %v5148_v41  ;;  %v5043_v52 = vld [vmem:[%s12139_s1 + $0x10] sm:$0xf]  ;;  %v5204_v53 = vor.u32 %v7348_v49, %v5203_v48  ;;  %v5131_v54 = vld [vmem:[%s12140_s3 + $0x40] sm:$0xf]  ;;  %v7330_v55 = vld [vmem:[%s12140_s3 + $0x44] sm:$0xf0]  ;;  %v5056_v56 = vor.u32 %v7309_v44, %v5053_v47 }
   0xe   :  { %v7308_v57 = vld [vmem:[%s12139_s1 + $0x14] sm:$0xf0]  ;;  %v5195_v58 = vld [vmem:[%s12140_s3 + $0xc0] sm:$0xf]  ;;  %v7346_v59 = vld [vmem:[%s12140_s3 + $0xc4] sm:$0xf0]  ;;  %v5132_v63 = vor.u32 %v7330_v55, %v5131_v54 }
   0xf   :  { %375 = vmatpush.bf16.msra.mxu3 %v5212_v42  ;;  %v7307_v60 = vld [vmem:[%s12139_s1 + $0x14] sm:$0xf]  ;;  %v5045_v61 = vld [vmem:[%s12139_s1 + $0x18] sm:$0xf0]  ;;  %v5035_v62 = vld [vmem:[%s12139_s1] sm:$0xf]  ;;  %v5044_v0 = vor.u32 %v7308_v57, %v5043_v52  ;;  %v5196_v2 = vor.u32 %v7346_v59, %v5195_v58 }
  0x10   :  { %137 = vmatpush.bf16.msra.mxu0 %v5068_v22  ;;  %v7306_v1 = vld [vmem:[%s12139_s1 + $0x4] sm:$0xf0]  ;;  %v5123_v3 = vld [vmem:[%s12140_s3 + $0x30] sm:$0xf]  ;;  %v7328_v4 = vld [vmem:[%s12140_s3 + $0x34] sm:$0xf0]  ;;  %v5048_v5 = vor.u32 %v7307_v60, %v5045_v61 }
  0x11   :  { %150 = vmatpush.bf16.msra.mxu1 %v5072_v26  ;;  %363 = vmatpush.bf16.msra.mxu2 %v5140_v50  ;;  %v7305_v6 = vld [vmem:[%s12139_s1 + $0x4] sm:$0xf]  ;;  %v5187_v7 = vld [vmem:[%s12140_s3 + $0xb0] sm:$0xf]  ;;  %v7344_v8 = vld [vmem:[%s12140_s3 + $0xb4] sm:$0xf0]  ;;  %v5124_v14 = vor.u32 %v7328_v4, %v5123_v3  ;;  %v5036_v15 = vor.u32 %v7306_v1, %v5035_v62 }
  0x12   :  { %v5037_v9 = vld [vmem:[%s12139_s1 + $0x8] sm:$0xf0]  ;;  %v7335_v10 = vld [vmem:[%s12140_s3 + $0x74] sm:$0xf]  ;;  %v5157_v11 = vld [vmem:[%s12140_s3 + $0x78] sm:$0xf0]  ;;  %v5188_v16 = vor.u32 %v7344_v8, %v5187_v7 }
  0x13   :  { %376 = vmatpush.bf16.msra.mxu3 %v5204_v53  ;;  %v7351_v12 = vld [vmem:[%s12140_s3 + $0xf4] sm:$0xf]  ;;  %v5221_v13 = vld [vmem:[%s12140_s3 + $0xf8] sm:$0xf0]  ;;  %v5115_v17 = vld [vmem:[%s12140_s3 + $0x20] sm:$0xf]  ;;  %v5040_v19 = vor.u32 %v7305_v6, %v5037_v9  ;;  %v5160_v20 = vor.u32 %v7335_v10, %v5157_v11 }
  0x14   :  { %138 = vmatpush.bf16.msra.mxu0 %v5060_v38  ;;  %v7326_v18 = vld [vmem:[%s12140_s3 + $0x24] sm:$0xf0]  ;;  %v5179_v21 = vld [vmem:[%s12140_s3 + $0xa0] sm:$0xf]  ;;  %v5224_v23 = vor.u32 %v7351_v12, %v5221_v13  ;;  %v7333_v24 = vld [vmem:[%s12140_s3 + $0x64] sm:$0xf] }
  0x15   :  { %151 = vmatpush.bf16.msra.mxu1 %v5064_v43  ;;  %364 = vmatpush.bf16.msra.mxu2 %v5132_v63  ;;  %v7342_v22 = vld [vmem:[%s12140_s3 + $0xa4] sm:$0xf0]  ;;  %v5149_v25 = vld [vmem:[%s12140_s3 + $0x68] sm:$0xf0]  ;;  %v7349_v26 = vld [vmem:[%s12140_s3 + $0xe4] sm:$0xf]  ;;  %v5116_v28 = vor.u32 %v7326_v18, %v5115_v17 }
  0x16   :  { %v5213_v27 = vld [vmem:[%s12140_s3 + $0xe8] sm:$0xf0]  ;;  %v32_v29 = vld [vmem:[%s12141_s0] sm:$0xf]  ;;  %v5180_v30 = vor.u32 %v7342_v22, %v5179_v21  ;;  %v5152_v31 = vor.u32 %v7333_v24, %v5149_v25  ;;  %v7331_v33 = vld [vmem:[%s12140_s3 + $0x54] sm:$0xf] }
  0x17   :  { %377 = vmatpush.bf16.msra.mxu3 %v5196_v2  ;;  %v5216_v32 = vor.u32 %v7349_v26, %v5213_v27  ;;  %v5141_v34 = vld [vmem:[%s12140_s3 + $0x58] sm:$0xf0]  ;;  %v7347_v35 = vld [vmem:[%s12140_s3 + $0xd4] sm:$0xf]  ;;  %v7329_v39 = vld [vmem:[%s12140_s3 + $0x44] sm:$0xf] }
  0x18   :  { %139 = vmatpush.bf16.msra.mxu0 %v5052_v51  ;;  %v5205_v36 = vld [vmem:[%s12140_s3 + $0xd8] sm:$0xf0]  ;;  %v5144_v37 = vor.u32 %v7331_v33, %v5141_v34  ;;  %v5133_v40 = vld [vmem:[%s12140_s3 + $0x48] sm:$0xf0]  ;;  %v7345_v41 = vld [vmem:[%s12140_s3 + $0xc4] sm:$0xf] }
  0x19   :  { %152 = vmatpush.bf16.msra.mxu1 %v5056_v56  ;;  %365 = vmatpush.bf16.msra.mxu2 %v5124_v14  ;;  %v5208_v38 = vor.u32 %v7347_v35, %v5205_v36  ;;  %v5197_v42 = vld [vmem:[%s12140_s3 + $0xc8] sm:$0xf0]  ;;  %v5136_v43 = vor.u32 %v7329_v39, %v5133_v40  ;;  %v7327_v45 = vld [vmem:[%s12140_s3 + $0x34] sm:$0xf]  ;;  %v5125_v46 = vld [vmem:[%s12140_s3 + $0x38] sm:$0xf0] }
  0x1a   :  { %v5200_v44 = vor.u32 %v7345_v41, %v5197_v42  ;;  %v7343_v47 = vld [vmem:[%s12140_s3 + $0xb4] sm:$0xf]  ;;  %v5189_v48 = vld [vmem:[%s12140_s3 + $0xb8] sm:$0xf0]  ;;  %v5128_v49 = vor.u32 %v7327_v45, %v5125_v46  ;;  %v7325_v51 = vld [vmem:[%s12140_s3 + $0x24] sm:$0xf] }
  0x1b   :  { %378 = vmatpush.bf16.msra.mxu3 %v5188_v16  ;;  %v5192_v50 = vor.u32 %v7343_v47, %v5189_v48  ;;  %v5117_v52 = vld [vmem:[%s12140_s3 + $0x28] sm:$0xf0]  ;;  %v7341_v53 = vld [vmem:[%s12140_s3 + $0xa4] sm:$0xf]  ;;  %v5107_v57 = vld [vmem:[%s12140_s3 + $0x10] sm:$0xf] }
  0x1c   :  { %140 = vmatpush.bf16.msra.mxu0 %v5044_v0  ;;  %v5181_v54 = vld [vmem:[%s12140_s3 + $0xa8] sm:$0xf0]  ;;  %v5120_v55 = vor.u32 %v7325_v51, %v5117_v52  ;;  %v7324_v58 = vld [vmem:[%s12140_s3 + $0x14] sm:$0xf0]  ;;  %v5171_v59 = vld [vmem:[%s12140_s3 + $0x90] sm:$0xf] }
  0x1d   :  { %153 = vmatpush.bf16.msra.mxu1 %v5048_v5  ;;  %366 = vmatpush.bf16.msra.mxu2 %v5116_v28  ;;  %v5184_v56 = vor.u32 %v7341_v53, %v5181_v54  ;;  %v5108_v60 = vor.u32 %v7324_v58, %v5107_v57  ;;  %v7340_v61 = vld [vmem:[%s12140_s3 + $0x94] sm:$0xf0]  ;;  %v7323_v62 = vld [vmem:[%s12140_s3 + $0x14] sm:$0xf]  ;;  %v5109_v63 = vld [vmem:[%s12140_s3 + $0x18] sm:$0xf0] }
  0x1e   :  { %v5172_v0 = vor.u32 %v7340_v61, %v5171_v59  ;;  %v5112_v1 = vor.u32 %v7323_v62, %v5109_v63  ;;  %v7339_v2 = vld [vmem:[%s12140_s3 + $0x94] sm:$0xf]  ;;  %v5173_v3 = vld [vmem:[%s12140_s3 + $0x98] sm:$0xf0]  ;;  %v5099_v5 = vld [vmem:[%s12140_s3] sm:$0xf] }
  0x1f   :  { %379 = vmatpush.bf16.msra.mxu3 %v5180_v30  ;;  %v5176_v4 = vor.u32 %v7339_v2, %v5173_v3  ;;  %v7322_v6 = vld [vmem:[%s12140_s3 + $0x4] sm:$0xf0]  ;;  %v5163_v7 = vld [vmem:[%s12140_s3 + $0x80] sm:$0xf]  ;;  %v7321_v10 = vld [vmem:[%s12140_s3 + $0x4] sm:$0xf] }
  0x20   :  { %141 = vmatpush.bf16.msra.mxu0 %v5036_v15  ;;  %v5100_v8 = vor.u32 %v7322_v6, %v5099_v5  ;;  %v7338_v9 = vld [vmem:[%s12140_s3 + $0x84] sm:$0xf0]  ;;  %v5101_v11 = vld [vmem:[%s12140_s3 + $0x8] sm:$0xf0]  ;;  %v7337_v14 = vld [vmem:[%s12140_s3 + $0x84] sm:$0xf] }
  0x21   :  { %154 = vmatpush.bf16.msra.mxu1 %v5040_v19  ;;  %367 = vmatpush.bf16.msra.mxu2 %v5108_v60  ;;  %v5164_v12 = vor.u32 %v7338_v9, %v5163_v7  ;;  %v5104_v13 = vor.u32 %v7321_v10, %v5101_v11  ;;  %v5165_v15 = vld [vmem:[%s12140_s3 + $0x88] sm:$0xf0]  ;;  %v7147_v17 = vld [vmem:[%s12142_s5 + $0xf00] sm:$0xf]  ;;  %v7833_v19 = vld [vmem:[%s12142_s5 + $0xf04] sm:$0xf] }
  0x22   :  { %v5168_v16 = vor.u32 %v7337_v14, %v5165_v15  ;;  %v7849_v18 = vld [vmem:[%s12142_s5 + $0xf7c] sm:$0xf0]  ;;  %v7149_v21 = vld [vmem:[%s12142_s5 + $0xf80] sm:$0xf0] }
  0x23   :  { %142 = vmatmul.bf16.vlgmr.msra.gmra.mxu0 %v32_v29  ;;  %380 = vmatpush.bf16.msra.mxu3 %v5172_v0  ;;  %v7019_v22 = vld [vmem:[%s12142_s5 + $0xe00] sm:$0xf]  ;;  %v7152_v24 = vor.u32 %v7833_v19, %v7149_v21  ;;  %v7801_v25 = vld [vmem:[%s12142_s5 + $0xe04] sm:$0xf] }
  0x24   :  { %387 = vmatpush.bf16.msrb.mxu0 %v5160_v20  ;;  %155 = vmatmul.bf16.vlgmr.msra.gmra.mxu1 %v32_v29  ;;  %v7148_v20 = vor.u32 %v7849_v18, %v7147_v17  ;;  %v7021_v26 = vld [vmem:[%s12142_s5 + $0xe80] sm:$0xf0]  ;;  %v6123_v27 = vld [vmem:[%s12142_s5 + $0x700] sm:$0xf] }
  0x25   :  { %400 = vmatpush.bf16.msrb.mxu1 %v5224_v23  ;;  %368 = vmatpush.bf16.msra.mxu2 %v5100_v8  ;;  %v7817_v23 = vld [vmem:[%s12142_s5 + $0xe7c] sm:$0xf0]  ;;  %v7577_v30 = vld [vmem:[%s12142_s5 + $0x704] sm:$0xf] }
  0x26   :  { %v7020_v28 = vor.u32 %v7817_v23, %v7019_v22  ;;  %v7593_v29 = vld [vmem:[%s12142_s5 + $0x77c] sm:$0xf0]  ;;  %v7545_v42 = vld [vmem:[%s12142_s5 + $0x604] sm:$0xf] }
  0x27   :  { %381 = vmatpush.bf16.msra.mxu3 %v5164_v12  ;;  %v6124_v33 = vor.u32 %v7593_v29, %v6123_v27  ;;  %v6891_v35 = vld [vmem:[%s12142_s5 + $0xd00] sm:$0xf]  ;;  %v7513_v51 = vld [vmem:[%s12142_s5 + $0x504] sm:$0xf] }
  0x28   :  { %388 = vmatpush.bf16.msrb.mxu0 %v5152_v31  ;;  %v6125_v31 = vld [vmem:[%s12142_s5 + $0x780] sm:$0xf0]  ;;  %v7785_v36 = vld [vmem:[%s12142_s5 + $0xd7c] sm:$0xf0] }
  0x29   :  { %401 = vmatpush.bf16.msrb.mxu1 %v5216_v32  ;;  %v7024_v32 = vor.u32 %v7801_v25, %v7021_v26  ;;  %v6128_v34 = vor.u32 %v7577_v30, %v6125_v31  ;;  %v5995_v39 = vld [vmem:[%s12142_s5 + $0x600] sm:$0xf]  ;;  %3557 = vmatpush.bf16.msrb.mxu2 %v6124_v33  ;;  %v7737_v52 = vld [vmem:[%s12142_s5 + $0xc04] sm:$0xf] }
  0x2a   :  { %v7561_v40 = vld [vmem:[%s12142_s5 + $0x67c] sm:$0xf0]  ;;  %v6765_v53 = vld [vmem:[%s12142_s5 + $0xc80] sm:$0xf0] }
  0x2b   :  { %3570 = vmatpush.bf16.msrb.mxu3 %v7148_v20  ;;  %v5996_v41 = vor.u32 %v7561_v40, %v5995_v39  ;;  %v6763_v46 = vld [vmem:[%s12142_s5 + $0xc00] sm:$0xf]  ;;  %v5869_v54 = vld [vmem:[%s12142_s5 + $0x580] sm:$0xf0]  ;;  %v6768_v62 = vor.u32 %v7737_v52, %v6765_v53 }
  0x2c   :  { %389 = vmatpush.bf16.msrb.mxu0 %v5144_v37  ;;  %v7769_v37 = vld [vmem:[%s12142_s5 + $0xd04] sm:$0xf]  ;;  %v7753_v47 = vld [vmem:[%s12142_s5 + $0xc7c] sm:$0xf0] }
  0x2d   :  { %402 = vmatpush.bf16.msrb.mxu1 %v5208_v38  ;;  %v6893_v38 = vld [vmem:[%s12142_s5 + $0xd80] sm:$0xf0]  ;;  %3558 = vmatpush.bf16.msrb.mxu2 %v5996_v41  ;;  %v5739_v57 = vld [vmem:[%s12142_s5 + $0x400] sm:$0xf]  ;;  %v6764_v58 = vor.u32 %v7753_v47, %v6763_v46  ;;  %v7155_v41 = vld [vmem:[%s12142_s5 + $0xf08] sm:$0xf] }
  0x2e   :  { %v6896_v48 = vor.u32 %v7769_v37, %v6893_v38  ;;  %v7497_v59 = vld [vmem:[%s12142_s5 + $0x47c] sm:$0xf0]  ;;  %v7481_v60 = vld [vmem:[%s12142_s5 + $0x404] sm:$0xf] }
  0x2f   :  { %3571 = vmatpush.bf16.msrb.mxu3 %v7020_v28  ;;  %v5741_v61 = vld [vmem:[%s12142_s5 + $0x480] sm:$0xf0]  ;;  %v6635_v63 = vld [vmem:[%s12142_s5 + $0xb00] sm:$0xf]  ;;  %v5740_v3 = vor.u32 %v7497_v59, %v5739_v57  ;;  %v7818_v59 = vld [vmem:[%s12142_s5 + $0xe84] sm:$0xf0] }
  0x30   :  { %390 = vmatpush.bf16.msrb.mxu0 %v5136_v43  ;;  %v5997_v43 = vld [vmem:[%s12142_s5 + $0x680] sm:$0xf0]  ;;  %v7721_v0 = vld [vmem:[%s12142_s5 + $0xb7c] sm:$0xf0] }
  0x31   :  { %403 = vmatpush.bf16.msrb.mxu1 %v5200_v44  ;;  %v6892_v44 = vor.u32 %v7785_v36, %v6891_v35  ;;  %v6000_v45 = vor.u32 %v7545_v42, %v5997_v43  ;;  %v6637_v2 = vld [vmem:[%s12142_s5 + $0xb80] sm:$0xf0]  ;;  %v5611_v5 = vld [vmem:[%s12142_s5 + $0x300] sm:$0xf]  ;;  %v6636_v6 = vor.u32 %v7721_v0, %v6635_v63  ;;  %v7850_v43 = vld [vmem:[%s12142_s5 + $0xf84] sm:$0xf0] }
  0x32   :  { %v7465_v7 = vld [vmem:[%s12142_s5 + $0x37c] sm:$0xf0]  ;;  %v7449_v8 = vld [vmem:[%s12142_s5 + $0x304] sm:$0xf]  ;;  %v7029_v63 = vld [vmem:[%s12142_s5 + $0xe88] sm:$0xf0] }
  0x33   :  { %3572 = vmatpush.bf16.msrb.mxu3 %v6892_v44  ;;  %v5613_v9 = vld [vmem:[%s12142_s5 + $0x380] sm:$0xf0]  ;;  %v6507_v11 = vld [vmem:[%s12142_s5 + $0xa00] sm:$0xf]  ;;  %v7834_v44 = vld [vmem:[%s12142_s5 + $0xf0c] sm:$0xf] }
  0x34   :  { %391 = vmatpush.bf16.msrb.mxu0 %v5128_v49  ;;  %v5867_v49 = vld [vmem:[%s12142_s5 + $0x500] sm:$0xf]  ;;  %v7673_v14 = vld [vmem:[%s12142_s5 + $0xa04] sm:$0xf]  ;;  %v5616_v17 = vor.u32 %v7449_v8, %v5613_v9  ;;  %v7578_v8 = vld [vmem:[%s12142_s5 + $0x70c] sm:$0xf] }
  0x35   :  { %404 = vmatpush.bf16.msrb.mxu1 %v5192_v50  ;;  %v7529_v50 = vld [vmem:[%s12142_s5 + $0x57c] sm:$0xf0]  ;;  %v6509_v15 = vld [vmem:[%s12142_s5 + $0xa80] sm:$0xf0]  ;;  %v6133_v9 = vld [vmem:[%s12142_s5 + $0x788] sm:$0xf0] }
  0x36   :  { %v7689_v12 = vld [vmem:[%s12142_s5 + $0xa7c] sm:$0xf0]  ;;  %v7417_v21 = vld [vmem:[%s12142_s5 + $0x204] sm:$0xf] }
  0x37   :  { %3573 = vmatpush.bf16.msrb.mxu3 %v6764_v58  ;;  %v5483_v18 = vld [vmem:[%s12142_s5 + $0x200] sm:$0xf]  ;;  %v6508_v19 = vor.u32 %v7689_v12, %v6507_v11  ;;  %v5485_v22 = vld [vmem:[%s12142_s5 + $0x280] sm:$0xf0]  ;;  %v7027_v58 = vld [vmem:[%s12142_s5 + $0xe08] sm:$0xf] }
  0x38   :  { %392 = vmatpush.bf16.msrb.mxu0 %v5120_v55  ;;  %v5868_v55 = vor.u32 %v7529_v50, %v5867_v49  ;;  %v7433_v20 = vld [vmem:[%s12142_s5 + $0x27c] sm:$0xf0]  ;;  %v7641_v28 = vld [vmem:[%s12142_s5 + $0x904] sm:$0xf]  ;;  %v5488_v31 = vor.u32 %v7417_v21, %v5485_v22  ;;  %v6899_v12 = vld [vmem:[%s12142_s5 + $0xd08] sm:$0xf] }
  0x39   :  { %405 = vmatpush.bf16.msrb.mxu1 %v5184_v56  ;;  %v5872_v56 = vor.u32 %v7513_v51, %v5869_v54  ;;  %v6379_v25 = vld [vmem:[%s12142_s5 + $0x900] sm:$0xf]  ;;  %v6381_v29 = vld [vmem:[%s12142_s5 + $0x980] sm:$0xf0]  ;;  %v5484_v30 = vor.u32 %v7433_v20, %v5483_v18  ;;  %v6003_v20 = vld [vmem:[%s12142_s5 + $0x608] sm:$0xf] }
  0x3a   :  { %3559 = vmatpush.bf16.msrb.mxu2 %v5868_v55  ;;  %v7657_v26 = vld [vmem:[%s12142_s5 + $0x97c] sm:$0xf0]  ;;  %v6384_v38 = vor.u32 %v7641_v28, %v6381_v29  ;;  %v7609_v39 = vld [vmem:[%s12142_s5 + $0x804] sm:$0xf]  ;;  %v7562_v21 = vld [vmem:[%s12142_s5 + $0x684] sm:$0xf0] }
  0x3b   :  { %3574 = vmatpush.bf16.msrb.mxu3 %v6636_v6  ;;  %v6380_v33 = vor.u32 %v7657_v26, %v6379_v25  ;;  %v7625_v35 = vld [vmem:[%s12142_s5 + $0x87c] sm:$0xf0]  ;;  %v6253_v40 = vld [vmem:[%s12142_s5 + $0x880] sm:$0xf0]  ;;  %v7546_v22 = vld [vmem:[%s12142_s5 + $0x60c] sm:$0xf] }
  0x3c   :  { %393 = vmatpush.bf16.msrb.mxu0 %v5112_v1  ;;  %v7705_v1 = vld [vmem:[%s12142_s5 + $0xb04] sm:$0xf]  ;;  %v5355_v47 = vld [vmem:[%s12142_s5 + $0x100] sm:$0xf]  ;;  %v6256_v54 = vor.u32 %v7609_v39, %v6253_v40  ;;  %v6771_v26 = vld [vmem:[%s12142_s5 + $0xc08] sm:$0xf] }
  0x3d   :  { %406 = vmatpush.bf16.msrb.mxu1 %v5176_v4  ;;  %v5744_v4 = vor.u32 %v7481_v60, %v5741_v61  ;;  %v6640_v10 = vor.u32 %v7705_v1, %v6637_v2  ;;  %v7385_v50 = vld [vmem:[%s12142_s5 + $0x104] sm:$0xf]  ;;  %v7802_v60 = vld [vmem:[%s12142_s5 + $0xe0c] sm:$0xf]  ;;  %v5227_v0 = vld [vmem:[%s12142_s5] sm:$0xf] }
  0x3e   :  { %3560 = vmatpush.bf16.msrb.mxu2 %v5740_v3  ;;  %v5357_v51 = vld [vmem:[%s12142_s5 + $0x180] sm:$0xf0]  ;;  %v7369_v1 = vld [vmem:[%s12142_s5 + $0x7c] sm:$0xf0]  ;;  %v7032_v11 = vor.u32 %v7802_v60, %v7029_v63  ;;  %v7738_v28 = vld [vmem:[%s12142_s5 + $0xc0c] sm:$0xf] }
  0x3f   :  { %3575 = vmatpush.bf16.msrb.mxu3 %v6508_v19  ;;  %v7353_v3 = vld [vmem:[%s12142_s5 + $0x4] sm:$0xf]  ;;  %v6136_v19 = vor.u32 %v7578_v8, %v6133_v9  ;;  %v6773_v29 = vld [vmem:[%s12142_s5 + $0xc88] sm:$0xf0]  ;;  %v7722_v39 = vld [vmem:[%s12142_s5 + $0xb84] sm:$0xf0] }
  0x40   :  { %394 = vmatpush.bf16.msrb.mxu0 %v5104_v13  ;;  %v26_v13 = vld [vmem:[%s12143_s2] sm:$0x3]  ;;  %v7706_v40 = vld [vmem:[%s12142_s5 + $0xb0c] sm:$0xf] }
  0x41   :  { %407 = vmatpush.bf16.msrb.mxu1 %v5168_v16  ;;  %v5612_v16 = vor.u32 %v7465_v7, %v5611_v5  ;;  %v50_v23 = vperm.slane %v26_v13, 0  ;;  %v51_v27 = vperm.slane %v26_v13, 1  ;;  %v6131_v5 = vld [vmem:[%s12142_s5 + $0x708] sm:$0xf]  ;;  %v5228_v13 = vor.u32 %v7369_v1, %v5227_v0  ;;  %v7450_v60 = vld [vmem:[%s12142_s5 + $0x30c] sm:$0xf] }
  0x42   :  { %v7594_v7 = vld [vmem:[%s12142_s5 + $0x784] sm:$0xf0]  ;;  %v7418_v8 = vld [vmem:[%s12142_s5 + $0x20c] sm:$0xf] }
  0x43   :  { %3561 = vmatpush.bf16.msrb.mxu2 %v5612_v16  ;;  %3576 = vmatpush.bf16.msrb.mxu3 %v6380_v33  ;;  %v7770_v16 = vld [vmem:[%s12142_s5 + $0xd0c] sm:$0xf]  ;;  %v6132_v18 = vor.u32 %v7594_v7, %v6131_v5  ;;  %v7530_v33 = vld [vmem:[%s12142_s5 + $0x584] sm:$0xf0] }
  0x44   :  { %3583 = vmatpush.bf16.msra.mxu0 %v6128_v34  ;;  %v6251_v34 = vld [vmem:[%s12142_s5 + $0x800] sm:$0xf]  ;;  %v6387_v0 = vld [vmem:[%s12142_s5 + $0x908] sm:$0xf] }
  0x45   :  { %3596 = vmatpush.bf16.msra.mxu1 %v7152_v24  ;;  %v6512_v24 = vor.u32 %v7673_v14, %v6509_v15  ;;  %v6252_v53 = vor.u32 %v7625_v35, %v6251_v34  ;;  %v7786_v15 = vld [vmem:[%s12142_s5 + $0xd84] sm:$0xf0]  ;;  %v7514_v34 = vld [vmem:[%s12142_s5 + $0x50c] sm:$0xf] }
  0x46   :  { %v5877_v35 = vld [vmem:[%s12142_s5 + $0x588] sm:$0xf0]  ;;  %v7658_v1 = vld [vmem:[%s12142_s5 + $0x984] sm:$0xf0] }
  0x47   :  { %3562 = vmatpush.bf16.msrb.mxu2 %v5484_v30  ;;  %3577 = vmatpush.bf16.msrb.mxu3 %v6252_v53  ;;  %v6004_v30 = vor.u32 %v7562_v21, %v6003_v20  ;;  %v7690_v53 = vld [vmem:[%s12142_s5 + $0xa84] sm:$0xf0]  ;;  %v7386_v20 = vld [vmem:[%s12142_s5 + $0x10c] sm:$0xf] }
  0x48   :  { %3584 = vmatpush.bf16.msra.mxu0 %v6000_v45  ;;  %v7157_v45 = vld [vmem:[%s12142_s5 + $0xf88] sm:$0xf0]  ;;  %v7434_v7 = vld [vmem:[%s12142_s5 + $0x284] sm:$0xf0] }
  0x49   :  { %3597 = vmatpush.bf16.msra.mxu1 %v7024_v32  ;;  %v7160_v57 = vor.u32 %v7834_v44, %v7157_v45  ;;  %v5747_v44 = vld [vmem:[%s12142_s5 + $0x408] sm:$0xf] }
  0x4a   :  { %v7498_v45 = vld [vmem:[%s12142_s5 + $0x484] sm:$0xf0] }
  0x4c   :  { %3585 = vmatpush.bf16.msra.mxu0 %v5872_v56  ;;  %v7156_v56 = vor.u32 %v7850_v43, %v7155_v41  ;;  %v6645_v41 = vld [vmem:[%s12142_s5 + $0xb88] sm:$0xf0]  ;;  %v5880_v43 = vor.u32 %v7514_v34, %v5877_v35 }
  0x4d   :  { %3598 = vmatpush.bf16.msra.mxu1 %v6896_v48  ;;  %v7401_v48 = vld [vmem:[%s12142_s5 + $0x17c] sm:$0xf0] }
  0x4e   :  { %v5356_v61 = vor.u32 %v7401_v48, %v5355_v47  ;;  %v5749_v47 = vld [vmem:[%s12142_s5 + $0x488] sm:$0xf0] }
  0x50   :  { %3586 = vmatpush.bf16.msra.mxu0 %v5744_v4  ;;  %v5229_v4 = vld [vmem:[%s12142_s5 + $0x80] sm:$0xf0]  ;;  %3563 = vmatpush.bf16.msrb.mxu2 %v5356_v61 }
  0x51   :  { %3599 = vmatpush.bf16.msra.mxu1 %v6768_v62  ;;  %v5360_v62 = vor.u32 %v7385_v50, %v5357_v51  ;;  %v5232_v14 = vor.u32 %v7353_v3, %v5229_v4  ;;  %v5748_v50 = vor.u32 %v7498_v45, %v5747_v44  ;;  %v6388_v3 = vor.u32 %v7658_v1, %v6387_v0  ;;  %v6389_v4 = vld [vmem:[%s12142_s5 + $0x988] sm:$0xf0]  ;;  %v7035_v45 = vld [vmem:[%s12142_s5 + $0xe10] sm:$0xf]  ;;  %v7771_v0 = vld [vmem:[%s12142_s5 + $0xd14] sm:$0xf] }
  0x52   :  { %v6909_v1 = vld [vmem:[%s12142_s5 + $0xd90] sm:$0xf0] }
  0x54   :  { %3587 = vmatpush.bf16.msra.mxu0 %v5616_v17  ;;  %v6901_v17 = vld [vmem:[%s12142_s5 + $0xd88] sm:$0xf0]  ;;  %3564 = vmatpush.bf16.msrb.mxu2 %v5228_v13  ;;  %v7626_v13 = vld [vmem:[%s12142_s5 + $0x884] sm:$0xf0] }
  0x55   :  { %3600 = vmatpush.bf16.msra.mxu1 %v6640_v10  ;;  %v7028_v10 = vor.u32 %v7818_v59, %v7027_v58  ;;  %v6904_v25 = vor.u32 %v7770_v16, %v6901_v17  ;;  %v5619_v58 = vld [vmem:[%s12142_s5 + $0x308] sm:$0xf]  ;;  %v6261_v16 = vld [vmem:[%s12142_s5 + $0x888] sm:$0xf0] }
  0x56   :  { %v7466_v59 = vld [vmem:[%s12142_s5 + $0x384] sm:$0xf0] }
  0x57   :  { %v5620_v61 = vor.u32 %v7466_v59, %v5619_v58  ;;  %v6141_v58 = vld [vmem:[%s12142_s5 + $0x790] sm:$0xf0] }
  0x58   :  { %3588 = vmatpush.bf16.msra.mxu0 %v5488_v31 }
  0x59   :  { %3601 = vmatpush.bf16.msra.mxu1 %v6512_v24  ;;  %v6900_v24 = vor.u32 %v7786_v15, %v6899_v12  ;;  %v6259_v12 = vld [vmem:[%s12142_s5 + $0x808] sm:$0xf]  ;;  %v7610_v15 = vld [vmem:[%s12142_s5 + $0x80c] sm:$0xf] }
  0x5a   :  { %v6264_v17 = vor.u32 %v7610_v15, %v6261_v16  ;;  %v7739_v15 = vld [vmem:[%s12142_s5 + $0xc14] sm:$0xf] }
  0x5b   :  { %v6781_v16 = vld [vmem:[%s12142_s5 + $0xc90] sm:$0xf0] }
  0x5c   :  { %3589 = vmatpush.bf16.msra.mxu0 %v5360_v62  ;;  %v5621_v62 = vld [vmem:[%s12142_s5 + $0x388] sm:$0xf0] }
  0x5d   :  { %3602 = vmatpush.bf16.msra.mxu1 %v6384_v38  ;;  %v6643_v38 = vld [vmem:[%s12142_s5 + $0xb08] sm:$0xf]  ;;  %v5624_v63 = vor.u32 %v7450_v60, %v5621_v62  ;;  %v7787_v62 = vld [vmem:[%s12142_s5 + $0xd8c] sm:$0xf0] }
  0x5e   :  { %v6644_v48 = vor.u32 %v7722_v39, %v6643_v38  ;;  %v7851_v38 = vld [vmem:[%s12142_s5 + $0xf8c] sm:$0xf0]  ;;  %v7835_v39 = vld [vmem:[%s12142_s5 + $0xf14] sm:$0xf] }
  0x60   :  { %3590 = vmatpush.bf16.msra.mxu0 %v5232_v14  ;;  %v6260_v14 = vor.u32 %v7626_v13, %v6259_v12  ;;  %v6779_v12 = vld [vmem:[%s12142_s5 + $0xc10] sm:$0xf] }
  0x61   :  { %3603 = vmatpush.bf16.msra.mxu1 %v6256_v54  ;;  %v7674_v54 = vld [vmem:[%s12142_s5 + $0xa0c] sm:$0xf] }
  0xa0   :  { %v143_v32 = vpop.f32.mrf.mxu0 }
  0xa1   :  { %v144_v36 = vadd.f32 %v143_v32, %v50_v23  ;;  %v156_v37 = vpop.f32.mrf.mxu1  ;;  %v6005_v23 = vld [vmem:[%s12142_s5 + $0x688] sm:$0xf0]  ;;  %v5875_v32 = vld [vmem:[%s12142_s5 + $0x508] sm:$0xf] }
  0xa2   :  { %v157_v42 = vadd.f32 %v156_v37, %v51_v27  ;;  %v7754_v27 = vld [vmem:[%s12142_s5 + $0xc84] sm:$0xf0]  ;;  %v6008_v31 = vor.u32 %v7546_v22, %v6005_v23  ;;  %v6776_v37 = vor.u32 %v7738_v28, %v6773_v29  ;;  %v5365_v22 = vld [vmem:[%s12142_s5 + $0x188] sm:$0xf0] }
  0xa3   :  { %v160_v46 = vmax.f32 %v144_v36, 0.0  ;;  %v6772_v36 = vor.u32 %v7754_v27, %v6771_v26  ;;  %v5368_v23 = vor.u32 %v7386_v20, %v5365_v22  ;;  %v7354_v27 = vld [vmem:[%s12142_s5 + $0xc] sm:$0xf]  ;;  %v7531_v20 = vld [vmem:[%s12142_s5 + $0x58c] sm:$0xf0] }
  0xa4   :  { %v161_v49 = vmax.f32 %v157_v42, 0.0  ;;  %v5876_v42 = vor.u32 %v7530_v33, %v5875_v32  ;;  %v5237_v28 = vld [vmem:[%s12142_s5 + $0x88] sm:$0xf0]  ;;  %v5885_v22 = vld [vmem:[%s12142_s5 + $0x590] sm:$0xf0] }
  0xa5   :  { %v162_v52 = vpack.c.bf16 %v160_v46, %v160_v46  ;;  %v7482_v46 = vld [vmem:[%s12142_s5 + $0x40c] sm:$0xf]  ;;  %v5240_v29 = vor.u32 %v7354_v27, %v5237_v28  ;;  %v7707_v27 = vld [vmem:[%s12142_s5 + $0xb14] sm:$0xf] }
  0xa6   :  { %v163_v55 = vpack.c.bf16 %v161_v49, %v161_v49  ;;  %v6648_v49 = vor.u32 %v7706_v40, %v6645_v41  ;;  %v5752_v51 = vor.u32 %v7482_v46, %v5749_v47  ;;  %v7165_v40 = vld [vmem:[%s12142_s5 + $0xf90] sm:$0xf0] }
  0xa7   :  { %369 = vmatmul.bf16.vlgmr.msra.gmra.mxu2 %v162_v52  ;;  %395 = vmatmul.bf16.vlgmr.msrb.gmra.mxu0 %v162_v52  ;;  %v6515_v52 = vld [vmem:[%s12142_s5 + $0xa08] sm:$0xf]  ;;  %v7168_v44 = vor.u32 %v7835_v39, %v7165_v40  ;;  %v6653_v28 = vld [vmem:[%s12142_s5 + $0xb90] sm:$0xf0] }
  0xa8   :  { %382 = vmatmul.bf16.vlgmr.msra.gmra.mxu3 %v163_v55  ;;  %408 = vmatmul.bf16.vlgmr.msrb.gmra.mxu1 %v163_v55  ;;  %v145_v2 = vpop.f32.mrf.mxu0  ;;  %v6516_v55 = vor.u32 %v7690_v53, %v6515_v52  ;;  %v6139_v53 = vld [vmem:[%s12142_s5 + $0x710] sm:$0xf]  ;;  %v7675_v39 = vld [vmem:[%s12142_s5 + $0xa14] sm:$0xf] }
  0xa9   :  { %v158_v6 = vpop.f32.mrf.mxu1  ;;  %3622 = vmatpush.bf16.msra.mxu3 %v7156_v56  ;;  %3648 = vmatpush.bf16.msrb.mxu1 %v7160_v57  ;;  %v6517_v56 = vld [vmem:[%s12142_s5 + $0xa88] sm:$0xf0]  ;;  %v6525_v40 = vld [vmem:[%s12142_s5 + $0xa90] sm:$0xf0] }
  0xaa   :  { %3609 = vmatpush.bf16.msra.mxu2 %v6132_v18  ;;  %3635 = vmatpush.bf16.msrb.mxu0 %v6136_v19  ;;  %v6520_v57 = vor.u32 %v7674_v54, %v6517_v56  ;;  %v7642_v2 = vld [vmem:[%s12142_s5 + $0x90c] sm:$0xf]  ;;  %v5491_v6 = vld [vmem:[%s12142_s5 + $0x208] sm:$0xf]  ;;  %v7595_v56 = vld [vmem:[%s12142_s5 + $0x78c] sm:$0xf0] }
  0xab   :  { %v6392_v5 = vor.u32 %v7642_v2, %v6389_v4  ;;  %v5492_v9 = vor.u32 %v7434_v7, %v5491_v6  ;;  %v5363_v18 = vld [vmem:[%s12142_s5 + $0x108] sm:$0xf]  ;;  %v6140_v2 = vor.u32 %v7595_v56, %v6139_v53  ;;  %v6011_v4 = vld [vmem:[%s12142_s5 + $0x610] sm:$0xf]  ;;  %v7547_v7 = vld [vmem:[%s12142_s5 + $0x614] sm:$0xf] }
  0xac   :  { %v7402_v19 = vld [vmem:[%s12142_s5 + $0x184] sm:$0xf0]  ;;  %v7563_v6 = vld [vmem:[%s12142_s5 + $0x68c] sm:$0xf0]  ;;  %v6397_v53 = vld [vmem:[%s12142_s5 + $0x990] sm:$0xf0] }
  0xad   :  { %3623 = vmatpush.bf16.msra.mxu3 %v7028_v10  ;;  %3649 = vmatpush.bf16.msrb.mxu1 %v7032_v11  ;;  %v5493_v10 = vld [vmem:[%s12142_s5 + $0x288] sm:$0xf0]  ;;  %v5364_v21 = vor.u32 %v7402_v19, %v5363_v18  ;;  %v5883_v19 = vld [vmem:[%s12142_s5 + $0x510] sm:$0xf] }
  0xae   :  { %3610 = vmatpush.bf16.msra.mxu2 %v6004_v30  ;;  %3636 = vmatpush.bf16.msrb.mxu0 %v6008_v31  ;;  %v5496_v11 = vor.u32 %v7418_v8, %v5493_v10  ;;  %v27_v30 = vld [vmem:[%s12144_s4] sm:$0x3]  ;;  %v6013_v8 = vld [vmem:[%s12142_s5 + $0x690] sm:$0xf0]  ;;  %v5499_v56 = vld [vmem:[%s12142_s5 + $0x210] sm:$0xf] }
  0xaf   :  { %v198_v31 = vperm.slane %v27_v30, 1  ;;  %v197_v35 = vperm.slane %v27_v30, 0  ;;  %v6016_v18 = vor.u32 %v7547_v7, %v6013_v8  ;;  %v7836_v7 = vld [vmem:[%s12142_s5 + $0xf1c] sm:$0xf] }
  0xb0   :  { %v7173_v8 = vld [vmem:[%s12142_s5 + $0xf98] sm:$0xf0] }
  0xb1   :  { %3624 = vmatpush.bf16.msra.mxu3 %v6900_v24  ;;  %3650 = vmatpush.bf16.msrb.mxu1 %v6904_v25  ;;  %v5235_v24 = vld [vmem:[%s12142_s5 + $0x8] sm:$0xf] }
  0xb2   :  { %3611 = vmatpush.bf16.msra.mxu2 %v5876_v42  ;;  %3637 = vmatpush.bf16.msrb.mxu0 %v5880_v43  ;;  %v7370_v25 = vld [vmem:[%s12142_s5 + $0x84] sm:$0xf0] }
  0xb3   :  { %v5236_v26 = vor.u32 %v7370_v25, %v5235_v24  ;;  %v6784_v24 = vor.u32 %v7739_v15, %v6781_v16  ;;  %v6651_v25 = vld [vmem:[%s12142_s5 + $0xb10] sm:$0xf]  ;;  %v7176_v16 = vor.u32 %v7836_v7, %v7173_v8 }
  0xb5   :  { %3625 = vmatpush.bf16.msra.mxu3 %v6772_v36  ;;  %3651 = vmatpush.bf16.msrb.mxu1 %v6776_v37  ;;  %v7163_v36 = vld [vmem:[%s12142_s5 + $0xf10] sm:$0xf] }
  0xb6   :  { %3612 = vmatpush.bf16.msra.mxu2 %v5748_v50  ;;  %3638 = vmatpush.bf16.msrb.mxu0 %v5752_v51  ;;  %v7164_v43 = vor.u32 %v7851_v38, %v7163_v36  ;;  %v7803_v50 = vld [vmem:[%s12142_s5 + $0xe14] sm:$0xf]  ;;  %v6656_v36 = vor.u32 %v7707_v27, %v6653_v28  ;;  %v7691_v38 = vld [vmem:[%s12142_s5 + $0xa8c] sm:$0xf0]  ;;  %v6147_v27 = vld [vmem:[%s12142_s5 + $0x718] sm:$0xf] }
  0xb7   :  { %v7037_v51 = vld [vmem:[%s12142_s5 + $0xe90] sm:$0xf0]  ;;  %v7596_v28 = vld [vmem:[%s12142_s5 + $0x794] sm:$0xf0] }
  0xb8   :  { %v7040_v60 = vor.u32 %v7803_v50, %v7037_v51  ;;  %v6395_v50 = vld [vmem:[%s12142_s5 + $0x910] sm:$0xf] }
  0xb9   :  { %3626 = vmatpush.bf16.msra.mxu3 %v6644_v48  ;;  %3652 = vmatpush.bf16.msrb.mxu1 %v6648_v49  ;;  %v7819_v49 = vld [vmem:[%s12142_s5 + $0xe8c] sm:$0xf0] }
  0xba   :  { %3613 = vmatpush.bf16.msra.mxu2 %v5620_v61  ;;  %3639 = vmatpush.bf16.msrb.mxu0 %v5624_v63  ;;  %v7036_v59 = vor.u32 %v7819_v49, %v7035_v45  ;;  %v6907_v61 = vld [vmem:[%s12142_s5 + $0xd10] sm:$0xf]  ;;  %v7451_v45 = vld [vmem:[%s12142_s5 + $0x314] sm:$0xf]  ;;  %v6528_v49 = vor.u32 %v7675_v39, %v6525_v40  ;;  %v6148_v39 = vor.u32 %v7596_v28, %v6147_v27  ;;  %v5507_v27 = vld [vmem:[%s12142_s5 + $0x218] sm:$0xf] }
  0xbb   :  { %v6908_v10 = vor.u32 %v7787_v62, %v6907_v61  ;;  %v7659_v51 = vld [vmem:[%s12142_s5 + $0x98c] sm:$0xf0]  ;;  %v7436_v28 = vld [vmem:[%s12142_s5 + $0x294] sm:$0xf0] }
  0xbc   :  { %v6267_v62 = vld [vmem:[%s12142_s5 + $0x810] sm:$0xf] }
  0xbd   :  { %3627 = vmatpush.bf16.msra.mxu3 %v6516_v55  ;;  %3653 = vmatpush.bf16.msrb.mxu1 %v6520_v57  ;;  %v7579_v57 = vld [vmem:[%s12142_s5 + $0x714] sm:$0xf] }
  0xbe   :  { %3614 = vmatpush.bf16.msra.mxu2 %v5492_v9  ;;  %3640 = vmatpush.bf16.msrb.mxu0 %v5496_v11  ;;  %v6912_v11 = vor.u32 %v7771_v0, %v6909_v1  ;;  %v7611_v0 = vld [vmem:[%s12142_s5 + $0x814] sm:$0xf] }
  0xbf   :  { %v6269_v1 = vld [vmem:[%s12142_s5 + $0x890] sm:$0xf0] }
  0xc1   :  { %3628 = vmatpush.bf16.msra.mxu3 %v6388_v3  ;;  %3654 = vmatpush.bf16.msrb.mxu1 %v6392_v5  ;;  %v6144_v3 = vor.u32 %v7579_v57, %v6141_v58  ;;  %v7435_v57 = vld [vmem:[%s12142_s5 + $0x28c] sm:$0xf0]  ;;  %v7419_v58 = vld [vmem:[%s12142_s5 + $0x214] sm:$0xf] }
  0xc2   :  { %3615 = vmatpush.bf16.msra.mxu2 %v5364_v21  ;;  %3641 = vmatpush.bf16.msrb.mxu0 %v5368_v23  ;;  %v7515_v21 = vld [vmem:[%s12142_s5 + $0x514] sm:$0xf] }
  0xc3   :  { %v5888_v30 = vor.u32 %v7515_v21, %v5885_v22  ;;  %v7045_v22 = vld [vmem:[%s12142_s5 + $0xe98] sm:$0xf0] }
  0xc5   :  { %3629 = vmatpush.bf16.msra.mxu3 %v6260_v14  ;;  %3655 = vmatpush.bf16.msrb.mxu1 %v6264_v17  ;;  %v7755_v14 = vld [vmem:[%s12142_s5 + $0xc8c] sm:$0xf0]  ;;  %v6012_v17 = vor.u32 %v7563_v6, %v6011_v4  ;;  %v5500_v4 = vor.u32 %v7435_v57, %v5499_v56  ;;  %v7516_v56 = vld [vmem:[%s12142_s5 + $0x51c] sm:$0xf] }
  0xc6   :  { %3616 = vmatpush.bf16.msra.mxu2 %v5236_v26  ;;  %3642 = vmatpush.bf16.msrb.mxu0 %v5240_v29  ;;  %v6780_v23 = vor.u32 %v7755_v14, %v6779_v12  ;;  %v7723_v26 = vld [vmem:[%s12142_s5 + $0xb8c] sm:$0xf0]  ;;  %v5884_v29 = vor.u32 %v7531_v20, %v5883_v19  ;;  %v5373_v12 = vld [vmem:[%s12142_s5 + $0x190] sm:$0xf0]  ;;  %v6272_v14 = vor.u32 %v7611_v0, %v6269_v1  ;;  %v7804_v19 = vld [vmem:[%s12142_s5 + $0xe1c] sm:$0xf] }
  0xc7   :  { %v5893_v57 = vld [vmem:[%s12142_s5 + $0x598] sm:$0xf0] }
  0xc8   :  { %v5896_v1 = vor.u32 %v7516_v56, %v5893_v57  ;;  %v7053_v57 = vld [vmem:[%s12142_s5 + $0xea0] sm:$0xf0] }
 0x124   :  { %v396_v32 = vpop.f32.mrf.mxu0 }
 0x125   :  { %v397_v33 = vadd.f32 %v396_v32, %v198_v31  ;;  %v409_v34 = vpop.f32.mrf.mxu1  ;;  %v5755_v31 = vld [vmem:[%s12142_s5 + $0x410] sm:$0xf] }
 0x126   :  { %v7499_v32 = vld [vmem:[%s12142_s5 + $0x48c] sm:$0xf0] }
 0x127   :  { %v410_v37 = vadd.f32 %v409_v34, %v397_v33  ;;  %v7483_v33 = vld [vmem:[%s12142_s5 + $0x414] sm:$0xf] }
 0x128   :  { %v5757_v34 = vld [vmem:[%s12142_s5 + $0x490] sm:$0xf0] }
 0x129   :  { %v414_v41 = vmax.f32 %v410_v37, 0.0  ;;  %v6523_v37 = vld [vmem:[%s12142_s5 + $0xa10] sm:$0xf] }
 0x12a   :  { %v370_v42 = vpop.f32.mrf.mxu2 }
 0x12b   :  { %v8731_v46 = vpack.c.bf16 %v414_v41, %v414_v41  ;;  %v371_v47 = vadd.f32 %v370_v42, %v197_v35  ;;  %v383_v48 = vpop.f32.mrf.mxu3  ;;  %v6652_v35 = vor.u32 %v7723_v26, %v6651_v25  ;;  %v5756_v41 = vor.u32 %v7499_v32, %v5755_v31  ;;  %v7355_v25 = vld [vmem:[%s12142_s5 + $0x14] sm:$0xf] }
 0x12c   :  { %v398_v52 = vpop.f32.mrf.mxu0  ;;  %v5760_v42 = vor.u32 %v7483_v33, %v5757_v34  ;;  %v5245_v26 = vld [vmem:[%s12142_s5 + $0x90] sm:$0xf0]  ;;  %v7048_v32 = vor.u32 %v7804_v19, %v7045_v22  ;;  %v6915_v33 = vld [vmem:[%s12142_s5 + $0xd18] sm:$0xf] }
 0x12d   :  { %v384_v54 = vadd.f32 %v383_v48, %v371_v47  ;;  %v411_v55 = vpop.f32.mrf.mxu1  ;;  %3578 = vmatmul.bf16.vlgmr.msrb.gmra.mxu3 %v8731_v46  ;;  %3604 = vmatmul.bf16.vlgmr.msra.gmra.mxu1 %v8731_v46  ;;  %v5629_v47 = vld [vmem:[%s12142_s5 + $0x390] sm:$0xf0]  ;;  %v6524_v48 = vor.u32 %v7691_v38, %v6523_v37  ;;  %v7772_v37 = vld [vmem:[%s12142_s5 + $0xd1c] sm:$0xf]  ;;  %v7660_v22 = vld [vmem:[%s12142_s5 + $0x994] sm:$0xf0] }
 0x12e   :  { %3674 = vmatpush.bf16.msrb.mxu3 %v7164_v43  ;;  %3700 = vmatpush.bf16.msra.mxu1 %v7168_v44  ;;  %v5627_v43 = vld [vmem:[%s12142_s5 + $0x310] sm:$0xf]  ;;  %v7643_v52 = vld [vmem:[%s12142_s5 + $0x914] sm:$0xf]  ;;  %v5632_v55 = vor.u32 %v7451_v45, %v5629_v47  ;;  %v6917_v38 = vld [vmem:[%s12142_s5 + $0xd98] sm:$0xf0] }
 0x12f   :  { %v413_v63 = vmax.f32 %v384_v54, 0.0  ;;  %v7467_v44 = vld [vmem:[%s12142_s5 + $0x38c] sm:$0xf0]  ;;  %v6400_v61 = vor.u32 %v7643_v52, %v6397_v53  ;;  %v6920_v47 = vor.u32 %v7772_v37, %v6917_v38  ;;  %v7179_v37 = vld [vmem:[%s12142_s5 + $0xf20] sm:$0xf] }
 0x130   :  { %v5628_v54 = vor.u32 %v7467_v44, %v5627_v43  ;;  %v7548_v43 = vld [vmem:[%s12142_s5 + $0x61c] sm:$0xf]  ;;  %v7853_v38 = vld [vmem:[%s12142_s5 + $0xf9c] sm:$0xf0] }
 0x131   :  { %v8771_v5 = vpack.c.bf16 %v413_v63, %v413_v63  ;;  %v7627_v63 = vld [vmem:[%s12142_s5 + $0x88c] sm:$0xf0]  ;;  %v6021_v44 = vld [vmem:[%s12142_s5 + $0x698] sm:$0xf0] }
 0x132   :  { %3675 = vmatpush.bf16.msrb.mxu3 %v7036_v59  ;;  %3701 = vmatpush.bf16.msra.mxu1 %v7040_v60  ;;  %v372_v9 = vpop.f32.mrf.mxu2  ;;  %v5501_v59 = vld [vmem:[%s12142_s5 + $0x290] sm:$0xf0]  ;;  %v6396_v60 = vor.u32 %v7659_v51, %v6395_v50  ;;  %v7740_v50 = vld [vmem:[%s12142_s5 + $0xc1c] sm:$0xf]  ;;  %v6024_v53 = vor.u32 %v7548_v43, %v6021_v44  ;;  %v5379_v43 = vld [vmem:[%s12142_s5 + $0x118] sm:$0xf] }
 0x133   :  { %v385_v13 = vpop.f32.mrf.mxu3  ;;  %3565 = vmatmul.bf16.vlgmr.msrb.gmra.mxu2 %v8771_v5  ;;  %3591 = vmatmul.bf16.vlgmr.msra.gmra.mxu0 %v8771_v5  ;;  %v5504_v6 = vor.u32 %v7419_v58, %v5501_v59  ;;  %v5371_v9 = vld [vmem:[%s12142_s5 + $0x110] sm:$0xf]  ;;  %v6789_v51 = vld [vmem:[%s12142_s5 + $0xc98] sm:$0xf0]  ;;  %v7404_v44 = vld [vmem:[%s12142_s5 + $0x194] sm:$0xf0] }
 0x134   :  { %3661 = vmatpush.bf16.msrb.mxu2 %v6140_v2  ;;  %3687 = vmatpush.bf16.msra.mxu0 %v6144_v3  ;;  %v7171_v2 = vld [vmem:[%s12142_s5 + $0xf18] sm:$0xf]  ;;  %v6268_v13 = vor.u32 %v7627_v63, %v6267_v62  ;;  %v6792_v59 = vor.u32 %v7740_v50, %v6789_v51  ;;  %v7708_v62 = vld [vmem:[%s12142_s5 + $0xb1c] sm:$0xf]  ;;  %v7180_v50 = vor.u32 %v7853_v38, %v7179_v37  ;;  %v5771_v37 = vld [vmem:[%s12142_s5 + $0x420] sm:$0xf] }
 0x135   :  { %v7852_v3 = vld [vmem:[%s12142_s5 + $0xf94] sm:$0xf0]  ;;  %v6661_v63 = vld [vmem:[%s12142_s5 + $0xb98] sm:$0xf0]  ;;  %v7501_v38 = vld [vmem:[%s12142_s5 + $0x49c] sm:$0xf0] }
 0x136   :  { %3676 = vmatpush.bf16.msrb.mxu3 %v6908_v10  ;;  %3702 = vmatpush.bf16.msra.mxu1 %v6912_v11  ;;  %v7403_v10 = vld [vmem:[%s12142_s5 + $0x18c] sm:$0xf0]  ;;  %v7387_v11 = vld [vmem:[%s12142_s5 + $0x114] sm:$0xf]  ;;  %v7172_v15 = vor.u32 %v7852_v3, %v7171_v2  ;;  %v5763_v2 = vld [vmem:[%s12142_s5 + $0x418] sm:$0xf]  ;;  %v6664_v8 = vor.u32 %v7708_v62, %v6661_v63 }
 0x137   :  { %v5372_v20 = vor.u32 %v7403_v10, %v5371_v9  ;;  %v5376_v21 = vor.u32 %v7387_v11, %v5373_v12  ;;  %v7500_v3 = vld [vmem:[%s12142_s5 + $0x494] sm:$0xf0]  ;;  %v7676_v11 = vld [vmem:[%s12142_s5 + $0xa1c] sm:$0xf]  ;;  %v6155_v62 = vld [vmem:[%s12142_s5 + $0x720] sm:$0xf] }
 0x138   :  { %3662 = vmatpush.bf16.msrb.mxu2 %v6012_v17  ;;  %3688 = vmatpush.bf16.msra.mxu0 %v6016_v18  ;;  %v7043_v17 = vld [vmem:[%s12142_s5 + $0xe18] sm:$0xf]  ;;  %v6533_v12 = vld [vmem:[%s12142_s5 + $0xa98] sm:$0xf0]  ;;  %v7597_v63 = vld [vmem:[%s12142_s5 + $0x79c] sm:$0xf0] }
 0x139   :  { %v7820_v18 = vld [vmem:[%s12142_s5 + $0xe94] sm:$0xf0] }
 0x13a   :  { %3677 = vmatpush.bf16.msrb.mxu3 %v6780_v23  ;;  %3703 = vmatpush.bf16.msra.mxu1 %v6784_v24  ;;  %v5243_v23 = vld [vmem:[%s12142_s5 + $0x10] sm:$0xf]  ;;  %v7044_v31 = vor.u32 %v7820_v18, %v7043_v17  ;;  %v6531_v9 = vld [vmem:[%s12142_s5 + $0xa18] sm:$0xf]  ;;  %v7452_v17 = vld [vmem:[%s12142_s5 + $0x31c] sm:$0xf] }
 0x13b   :  { %v7371_v24 = vld [vmem:[%s12142_s5 + $0x8c] sm:$0xf0]  ;;  %v7692_v10 = vld [vmem:[%s12142_s5 + $0xa94] sm:$0xf0]  ;;  %v5637_v18 = vld [vmem:[%s12142_s5 + $0x398] sm:$0xf0] }
 0x13c   :  { %3663 = vmatpush.bf16.msrb.mxu2 %v5884_v29  ;;  %3689 = vmatpush.bf16.msra.mxu0 %v5888_v30  ;;  %v7580_v29 = vld [vmem:[%s12142_s5 + $0x71c] sm:$0xf]  ;;  %v5244_v34 = vor.u32 %v7371_v24, %v5243_v23  ;;  %v6532_v19 = vor.u32 %v7692_v10, %v6531_v9  ;;  %v6156_v9 = vor.u32 %v7597_v63, %v6155_v62  ;;  %v5515_v62 = vld [vmem:[%s12142_s5 + $0x220] sm:$0xf] }
 0x13d   :  { %3630 = vmatmul.bf16.vlgmr.msra.gmra.mxu3 %v8731_v46  ;;  %3656 = vmatmul.bf16.vlgmr.msrb.gmra.mxu1 %v8731_v46  ;;  %v6149_v30 = vld [vmem:[%s12142_s5 + $0x798] sm:$0xf0]  ;;  %v7437_v63 = vld [vmem:[%s12142_s5 + $0x29c] sm:$0xf0] }
 0x13e   :  { %3678 = vmatpush.bf16.msrb.mxu3 %v6652_v35  ;;  %3704 = vmatpush.bf16.msra.mxu1 %v6656_v36  ;;  %v5248_v35 = vor.u32 %v7355_v25, %v5245_v26  ;;  %v7788_v36 = vld [vmem:[%s12142_s5 + $0xd94] sm:$0xf0]  ;;  %v6152_v40 = vor.u32 %v7580_v29, %v6149_v30  ;;  %v7644_v23 = vld [vmem:[%s12142_s5 + $0x91c] sm:$0xf]  ;;  %v5640_v26 = vor.u32 %v7452_v17, %v5637_v18 }
 0x13f   :  { %v6916_v45 = vor.u32 %v7788_v36, %v6915_v33  ;;  %v6405_v24 = vld [vmem:[%s12142_s5 + $0x998] sm:$0xf0]  ;;  %v6275_v33 = vld [vmem:[%s12142_s5 + $0x818] sm:$0xf] }
 0x140   :  { %3664 = vmatpush.bf16.msrb.mxu2 %v5756_v41  ;;  %3690 = vmatpush.bf16.msra.mxu0 %v5760_v42  ;;  %v6019_v41 = vld [vmem:[%s12142_s5 + $0x618] sm:$0xf]  ;;  %v7420_v29 = vld [vmem:[%s12142_s5 + $0x21c] sm:$0xf] }
 0x141   :  { %v7564_v42 = vld [vmem:[%s12142_s5 + $0x694] sm:$0xf0]  ;;  %v5509_v30 = vld [vmem:[%s12142_s5 + $0x298] sm:$0xf0] }
 0x142   :  { %3679 = vmatpush.bf16.msrb.mxu3 %v6524_v48  ;;  %3705 = vmatpush.bf16.msra.mxu1 %v6528_v49  ;;  %v6787_v48 = vld [vmem:[%s12142_s5 + $0xc18] sm:$0xf]  ;;  %v6020_v52 = vor.u32 %v7564_v42, %v6019_v41  ;;  %v6277_v36 = vld [vmem:[%s12142_s5 + $0x898] sm:$0xf0]  ;;  %v7837_v41 = vld [vmem:[%s12142_s5 + $0xf24] sm:$0xf] }
 0x143   :  { %3617 = vmatmul.bf16.vlgmr.msra.gmra.mxu2 %v8771_v5  ;;  %3643 = vmatmul.bf16.vlgmr.msrb.gmra.mxu0 %v8771_v5  ;;  %v7756_v49 = vld [vmem:[%s12142_s5 + $0xc94] sm:$0xf0]  ;;  %v7181_v42 = vld [vmem:[%s12142_s5 + $0xfa0] sm:$0xf0] }
 0x144   :  { %3665 = vmatpush.bf16.msrb.mxu2 %v5628_v54  ;;  %3691 = vmatpush.bf16.msra.mxu0 %v5632_v55  ;;  %v5891_v54 = vld [vmem:[%s12142_s5 + $0x518] sm:$0xf]  ;;  %v6788_v58 = vor.u32 %v7756_v49, %v6787_v48  ;;  %v7184_v51 = vor.u32 %v7837_v41, %v7181_v42 }
 0x145   :  { %v7532_v55 = vld [vmem:[%s12142_s5 + $0x594] sm:$0xf0] }
 0x146   :  { %3680 = vmatpush.bf16.msrb.mxu3 %v6396_v60  ;;  %3706 = vmatpush.bf16.msra.mxu1 %v6400_v61  ;;  %v6659_v60 = vld [vmem:[%s12142_s5 + $0xb18] sm:$0xf]  ;;  %v5892_v0 = vor.u32 %v7532_v55, %v5891_v54  ;;  %v7805_v54 = vld [vmem:[%s12142_s5 + $0xe24] sm:$0xf]  ;;  %v5380_v55 = vor.u32 %v7404_v44, %v5379_v43  ;;  %v6539_v43 = vld [vmem:[%s12142_s5 + $0xa20] sm:$0xf] }
 0x147   :  { %v7724_v61 = vld [vmem:[%s12142_s5 + $0xb94] sm:$0xf0]  ;;  %v7693_v44 = vld [vmem:[%s12142_s5 + $0xa9c] sm:$0xf0] }
 0x148   :  { %3666 = vmatpush.bf16.msrb.mxu2 %v5500_v4  ;;  %3692 = vmatpush.bf16.msra.mxu0 %v5504_v6  ;;  %v7484_v4 = vld [vmem:[%s12142_s5 + $0x41c] sm:$0xf]  ;;  %v6660_v7 = vor.u32 %v7724_v61, %v6659_v60 }
 0x149   :  { %v5765_v6 = vld [vmem:[%s12142_s5 + $0x498] sm:$0xf0] }
 0x14a   :  { %3681 = vmatpush.bf16.msrb.mxu3 %v6268_v13  ;;  %3707 = vmatpush.bf16.msra.mxu1 %v6272_v14  ;;  %v5764_v13 = vor.u32 %v7500_v3, %v5763_v2  ;;  %v5768_v14 = vor.u32 %v7484_v4, %v5765_v6  ;;  %v7356_v60 = vld [vmem:[%s12142_s5 + $0x1c] sm:$0xf]  ;;  %v7056_v3 = vor.u32 %v7805_v54, %v7053_v57  ;;  %v7661_v57 = vld [vmem:[%s12142_s5 + $0x99c] sm:$0xf0] }
 0x14b   :  { %v5253_v61 = vld [vmem:[%s12142_s5 + $0x98] sm:$0xf0]  ;;  %v6540_v54 = vor.u32 %v7693_v44, %v6539_v43 }
 0x14c   :  { %3667 = vmatpush.bf16.msrb.mxu2 %v5372_v20  ;;  %3693 = vmatpush.bf16.msra.mxu0 %v5376_v21  ;;  %v6536_v20 = vor.u32 %v7676_v11, %v6533_v12  ;;  %v6403_v21 = vld [vmem:[%s12142_s5 + $0x918] sm:$0xf]  ;;  %v5256_v6 = vor.u32 %v7356_v60, %v5253_v61  ;;  %v7773_v11 = vld [vmem:[%s12142_s5 + $0xd24] sm:$0xf] }
 0x14d   :  { %3682 = vmatmul.bf16.vlgmr.msrb.gmra.mxu3 %v8731_v46  ;;  %3708 = vmatmul.bf16.vlgmr.msra.gmra.mxu1 %v8731_v46  ;;  %v6925_v12 = vld [vmem:[%s12142_s5 + $0xda0] sm:$0xf0] }
 0x14e   :  { %3726 = vmatpush.bf16.msra.mxu3 %v7172_v15  ;;  %3752 = vmatpush.bf16.msrb.mxu1 %v7176_v16  ;;  %v5635_v15 = vld [vmem:[%s12142_s5 + $0x318] sm:$0xf]  ;;  %v6928_v18 = vor.u32 %v7773_v11, %v6925_v12  ;;  %v7645_v60 = vld [vmem:[%s12142_s5 + $0x924] sm:$0xf]  ;;  %v7187_v11 = vld [vmem:[%s12142_s5 + $0xf28] sm:$0xf] }
 0x14f   :  { %v7468_v16 = vld [vmem:[%s12142_s5 + $0x394] sm:$0xf0]  ;;  %v6413_v61 = vld [vmem:[%s12142_s5 + $0x9a0] sm:$0xf0]  ;;  %v7854_v12 = vld [vmem:[%s12142_s5 + $0xfa4] sm:$0xf0] }
 0x150   :  { %3668 = vmatpush.bf16.msrb.mxu2 %v5244_v34  ;;  %3694 = vmatpush.bf16.msra.mxu0 %v5248_v35  ;;  %v5636_v25 = vor.u32 %v7468_v16, %v5635_v15  ;;  %v7628_v34 = vld [vmem:[%s12142_s5 + $0x894] sm:$0xf0]  ;;  %v7612_v35 = vld [vmem:[%s12142_s5 + $0x81c] sm:$0xf]  ;;  %v7549_v15 = vld [vmem:[%s12142_s5 + $0x624] sm:$0xf] }
 0x151   :  { %v6276_v48 = vor.u32 %v7628_v34, %v6275_v33  ;;  %v6280_v49 = vor.u32 %v7612_v35, %v6277_v36  ;;  %v6029_v16 = vld [vmem:[%s12142_s5 + $0x6a0] sm:$0xf0] }
 0x152   :  { %3727 = vmatpush.bf16.msra.mxu3 %v7044_v31  ;;  %3753 = vmatpush.bf16.msrb.mxu1 %v7048_v32  ;;  %v6404_v31 = vor.u32 %v7660_v22, %v6403_v21  ;;  %v6408_v32 = vor.u32 %v7644_v23, %v6405_v24  ;;  %v6032_v22 = vor.u32 %v7549_v15, %v6029_v16  ;;  %v7741_v23 = vld [vmem:[%s12142_s5 + $0xc24] sm:$0xf]  ;;  %v5387_v15 = vld [vmem:[%s12142_s5 + $0x120] sm:$0xf] }
 0x153   :  { %3669 = vmatmul.bf16.vlgmr.msrb.gmra.mxu2 %v8771_v5  ;;  %3695 = vmatmul.bf16.vlgmr.msra.gmra.mxu0 %v8771_v5  ;;  %v6797_v24 = vld [vmem:[%s12142_s5 + $0xca0] sm:$0xf0]  ;;  %v7405_v16 = vld [vmem:[%s12142_s5 + $0x19c] sm:$0xf0] }
 0x154   :  { %3713 = vmatpush.bf16.msra.mxu2 %v6148_v39  ;;  %3739 = vmatpush.bf16.msrb.mxu0 %v6152_v40  ;;  %v5508_v39 = vor.u32 %v7436_v28, %v5507_v27  ;;  %v5512_v40 = vor.u32 %v7420_v29, %v5509_v30  ;;  %v7517_v27 = vld [vmem:[%s12142_s5 + $0x524] sm:$0xf]  ;;  %v6800_v30 = vor.u32 %v7741_v23, %v6797_v24  ;;  %v7059_v23 = vld [vmem:[%s12142_s5 + $0xe28] sm:$0xf] }
 0x155   :  { %v5901_v28 = vld [vmem:[%s12142_s5 + $0x5a0] sm:$0xf0]  ;;  %v7822_v24 = vld [vmem:[%s12142_s5 + $0xea4] sm:$0xf0] }
 0x156   :  { %3728 = vmatpush.bf16.msra.mxu3 %v6916_v45  ;;  %3754 = vmatpush.bf16.msrb.mxu1 %v6920_v47  ;;  %v7388_v45 = vld [vmem:[%s12142_s5 + $0x11c] sm:$0xf]  ;;  %v5904_v34 = vor.u32 %v7517_v27, %v5901_v28  ;;  %v7709_v35 = vld [vmem:[%s12142_s5 + $0xb24] sm:$0xf]  ;;  %v7061_v28 = vld [vmem:[%s12142_s5 + $0xea8] sm:$0xf0] }
 0x157   :  { %v5381_v47 = vld [vmem:[%s12142_s5 + $0x198] sm:$0xf0]  ;;  %v6669_v36 = vld [vmem:[%s12142_s5 + $0xba0] sm:$0xf0] }
 0x158   :  { %3714 = vmatpush.bf16.msra.mxu2 %v6020_v52  ;;  %3740 = vmatpush.bf16.msrb.mxu0 %v6024_v53  ;;  %v7051_v52 = vld [vmem:[%s12142_s5 + $0xe20] sm:$0xf]  ;;  %v5384_v56 = vor.u32 %v7388_v45, %v5381_v47  ;;  %v6672_v42 = vor.u32 %v7709_v35, %v6669_v36  ;;  %v5772_v45 = vor.u32 %v7501_v38, %v5771_v37  ;;  %v7582_v35 = vld [vmem:[%s12142_s5 + $0x72c] sm:$0xf] }
 0x159   :  { %v7821_v53 = vld [vmem:[%s12142_s5 + $0xe9c] sm:$0xf0]  ;;  %v6165_v36 = vld [vmem:[%s12142_s5 + $0x7a8] sm:$0xf0]  ;;  %v7060_v37 = vor.u32 %v7822_v24, %v7059_v23 }
 0x15a   :  { %3729 = vmatpush.bf16.msra.mxu3 %v6788_v58  ;;  %3755 = vmatpush.bf16.msrb.mxu1 %v6792_v59  ;;  %v5251_v58 = vld [vmem:[%s12142_s5 + $0x18] sm:$0xf]  ;;  %v7052_v2 = vor.u32 %v7821_v53, %v7051_v52  ;;  %v7453_v52 = vld [vmem:[%s12142_s5 + $0x324] sm:$0xf]  ;;  %v6168_v44 = vor.u32 %v7582_v35, %v6165_v36  ;;  %v7454_v23 = vld [vmem:[%s12142_s5 + $0x32c] sm:$0xf] }
 0x15b   :  { %v7372_v59 = vld [vmem:[%s12142_s5 + $0x94] sm:$0xf0]  ;;  %v5645_v53 = vld [vmem:[%s12142_s5 + $0x3a0] sm:$0xf0]  ;;  %v5653_v24 = vld [vmem:[%s12142_s5 + $0x3a8] sm:$0xf0] }
 0x15c   :  { %3715 = vmatpush.bf16.msra.mxu2 %v5892_v0  ;;  %3741 = vmatpush.bf16.msrb.mxu0 %v5896_v1  ;;  %v7581_v0 = vld [vmem:[%s12142_s5 + $0x724] sm:$0xf]  ;;  %v5252_v4 = vor.u32 %v7372_v59, %v5251_v58  ;;  %v5648_v59 = vor.u32 %v7453_v52, %v5645_v53  ;;  %v7422_v35 = vld [vmem:[%s12142_s5 + $0x22c] sm:$0xf] }
 0x15d   :  { %v6157_v1 = vld [vmem:[%s12142_s5 + $0x7a0] sm:$0xf0]  ;;  %v5525_v36 = vld [vmem:[%s12142_s5 + $0x2a8] sm:$0xf0] }
 0x15e   :  { %3730 = vmatpush.bf16.msra.mxu3 %v6660_v7  ;;  %3756 = vmatpush.bf16.msrb.mxu1 %v6664_v8  ;;  %v6923_v7 = vld [vmem:[%s12142_s5 + $0xd20] sm:$0xf]  ;;  %v6160_v10 = vor.u32 %v7581_v0, %v6157_v1  ;;  %v7421_v0 = vld [vmem:[%s12142_s5 + $0x224] sm:$0xf] }
 0x15f   :  { %v7789_v8 = vld [vmem:[%s12142_s5 + $0xd9c] sm:$0xf0]  ;;  %v5517_v1 = vld [vmem:[%s12142_s5 + $0x2a0] sm:$0xf0] }
 0x160   :  { %3716 = vmatpush.bf16.msra.mxu2 %v5764_v13  ;;  %3742 = vmatpush.bf16.msrb.mxu0 %v5768_v14  ;;  %v6027_v13 = vld [vmem:[%s12142_s5 + $0x620] sm:$0xf]  ;;  %v6924_v17 = vor.u32 %v7789_v8, %v6923_v7  ;;  %v7613_v7 = vld [vmem:[%s12142_s5 + $0x824] sm:$0xf]  ;;  %v5516_v8 = vor.u32 %v7437_v63, %v5515_v62  ;;  %v7518_v62 = vld [vmem:[%s12142_s5 + $0x52c] sm:$0xf] }
 0x161   :  { %v7565_v14 = vld [vmem:[%s12142_s5 + $0x69c] sm:$0xf0]  ;;  %v5909_v63 = vld [vmem:[%s12142_s5 + $0x5a8] sm:$0xf0] }
 0x162   :  { %3731 = vmatpush.bf16.msra.mxu3 %v6532_v19  ;;  %3757 = vmatpush.bf16.msrb.mxu1 %v6536_v20  ;;  %v6795_v19 = vld [vmem:[%s12142_s5 + $0xc20] sm:$0xf]  ;;  %v6028_v21 = vor.u32 %v7565_v14, %v6027_v13  ;;  %v7838_v13 = vld [vmem:[%s12142_s5 + $0xf2c] sm:$0xf] }
 0x163   :  { %v7757_v20 = vld [vmem:[%s12142_s5 + $0xc9c] sm:$0xf0]  ;;  %v7189_v14 = vld [vmem:[%s12142_s5 + $0xfa8] sm:$0xf0] }
 0x164   :  { %3717 = vmatpush.bf16.msra.mxu2 %v5636_v25  ;;  %3743 = vmatpush.bf16.msrb.mxu0 %v5640_v26  ;;  %v5899_v25 = vld [vmem:[%s12142_s5 + $0x520] sm:$0xf]  ;;  %v6796_v29 = vor.u32 %v7757_v20, %v6795_v19 }
 0x165   :  { %v7533_v26 = vld [vmem:[%s12142_s5 + $0x59c] sm:$0xf0] }
 0x166   :  { %3732 = vmatpush.bf16.msra.mxu3 %v6404_v31  ;;  %3758 = vmatpush.bf16.msrb.mxu1 %v6408_v32  ;;  %v6667_v31 = vld [vmem:[%s12142_s5 + $0xb20] sm:$0xf]  ;;  %v5900_v33 = vor.u32 %v7533_v26, %v5899_v25  ;;  %v7806_v25 = vld [vmem:[%s12142_s5 + $0xe2c] sm:$0xf]  ;;  %v5388_v26 = vor.u32 %v7405_v16, %v5387_v15  ;;  %v6547_v15 = vld [vmem:[%s12142_s5 + $0xa28] sm:$0xf] }
 0x167   :  { %v7725_v32 = vld [vmem:[%s12142_s5 + $0xb9c] sm:$0xf0]  ;;  %v7064_v38 = vor.u32 %v7806_v25, %v7061_v28  ;;  %v7694_v16 = vld [vmem:[%s12142_s5 + $0xaa4] sm:$0xf0] }
 0x168   :  { %3718 = vmatpush.bf16.msra.mxu2 %v5508_v39  ;;  %3744 = vmatpush.bf16.msrb.mxu0 %v5512_v40  ;;  %v7485_v39 = vld [vmem:[%s12142_s5 + $0x424] sm:$0xf]  ;;  %v6668_v41 = vor.u32 %v7725_v32, %v6667_v31  ;;  %v6548_v25 = vor.u32 %v7694_v16, %v6547_v15  ;;  %v7662_v28 = vld [vmem:[%s12142_s5 + $0x9a4] sm:$0xf0] }
 0x169   :  { %v5773_v40 = vld [vmem:[%s12142_s5 + $0x4a0] sm:$0xf0] }
 0x16a   :  { %3733 = vmatpush.bf16.msra.mxu3 %v6276_v48  ;;  %3759 = vmatpush.bf16.msrb.mxu1 %v6280_v49  ;;  %v5776_v47 = vor.u32 %v7485_v39, %v5773_v40  ;;  %v7677_v48 = vld [vmem:[%s12142_s5 + $0xa24] sm:$0xf] }
 0x16b   :  { %v6541_v49 = vld [vmem:[%s12142_s5 + $0xaa0] sm:$0xf0] }
 0x16c   :  { %3719 = vmatpush.bf16.msra.mxu2 %v5380_v55  ;;  %3745 = vmatpush.bf16.msrb.mxu0 %v5384_v56  ;;  %v6544_v55 = vor.u32 %v7677_v48, %v6541_v49  ;;  %v6411_v56 = vld [vmem:[%s12142_s5 + $0x920] sm:$0xf]  ;;  %v7357_v31 = vld [vmem:[%s12142_s5 + $0x24] sm:$0xf]  ;;  %v6035_v48 = vld [vmem:[%s12142_s5 + $0x628] sm:$0xf] }
 0x16d   :  { %3734 = vmatmul.bf16.vlgmr.msra.gmra.mxu3 %v8731_v46  ;;  %3760 = vmatmul.bf16.vlgmr.msrb.gmra.mxu1 %v8731_v46  ;;  %v5261_v32 = vld [vmem:[%s12142_s5 + $0xa0] sm:$0xf0]  ;;  %v7566_v49 = vld [vmem:[%s12142_s5 + $0x6a4] sm:$0xf0] }
 0x16e   :  { %3778 = vmatpush.bf16.msrb.mxu3 %v7180_v50  ;;  %3804 = vmatpush.bf16.msra.mxu1 %v7184_v51  ;;  %v5643_v50 = vld [vmem:[%s12142_s5 + $0x320] sm:$0xf]  ;;  %v5264_v40 = vor.u32 %v7357_v31, %v5261_v32  ;;  %v7646_v31 = vld [vmem:[%s12142_s5 + $0x92c] sm:$0xf] }
 0x16f   :  { %v7469_v51 = vld [vmem:[%s12142_s5 + $0x39c] sm:$0xf0]  ;;  %v6421_v32 = vld [vmem:[%s12142_s5 + $0x9a8] sm:$0xf0] }
 0x170   :  { %3720 = vmatpush.bf16.msra.mxu2 %v5252_v4  ;;  %3746 = vmatpush.bf16.msrb.mxu0 %v5256_v6  ;;  %v5644_v58 = vor.u32 %v7469_v51, %v5643_v50  ;;  %v6283_v4 = vld [vmem:[%s12142_s5 + $0x820] sm:$0xf]  ;;  %v7550_v50 = vld [vmem:[%s12142_s5 + $0x62c] sm:$0xf] }
 0x171   :  { %v7629_v6 = vld [vmem:[%s12142_s5 + $0x89c] sm:$0xf0]  ;;  %v6037_v51 = vld [vmem:[%s12142_s5 + $0x6a8] sm:$0xf0] }
 0x172   :  { %3779 = vmatpush.bf16.msrb.mxu3 %v7052_v2  ;;  %3805 = vmatpush.bf16.msra.mxu1 %v7056_v3  ;;  %v6412_v2 = vor.u32 %v7661_v57, %v6411_v56  ;;  %v6416_v3 = vor.u32 %v7645_v60, %v6413_v61  ;;  %v6284_v19 = vor.u32 %v7629_v6, %v6283_v4  ;;  %v5907_v60 = vld [vmem:[%s12142_s5 + $0x528] sm:$0xf] }
 0x173   :  { %3721 = vmatmul.bf16.vlgmr.msra.gmra.mxu2 %v8771_v5  ;;  %3747 = vmatmul.bf16.vlgmr.msrb.gmra.mxu0 %v8771_v5  ;;  %v6036_v56 = vor.u32 %v7566_v49, %v6035_v48  ;;  %v6040_v57 = vor.u32 %v7550_v50, %v6037_v51  ;;  %v7534_v61 = vld [vmem:[%s12142_s5 + $0x5a4] sm:$0xf0]  ;;  %v5912_v6 = vor.u32 %v7518_v62, %v5909_v63  ;;  %v7839_v48 = vld [vmem:[%s12142_s5 + $0xf34] sm:$0xf] }
 0x174   :  { %3765 = vmatpush.bf16.msrb.mxu2 %v6156_v9  ;;  %3791 = vmatpush.bf16.msra.mxu0 %v6160_v10  ;;  %v5520_v9 = vor.u32 %v7421_v0, %v5517_v1  ;;  %v6285_v10 = vld [vmem:[%s12142_s5 + $0x8a0] sm:$0xf0]  ;;  %v5908_v4 = vor.u32 %v7534_v61, %v5907_v60  ;;  %v7197_v49 = vld [vmem:[%s12142_s5 + $0xfb0] sm:$0xf0]  ;;  %v5395_v50 = vld [vmem:[%s12142_s5 + $0x128] sm:$0xf] }
 0x175   :  { %v6288_v20 = vor.u32 %v7613_v7, %v6285_v10  ;;  %v7710_v7 = vld [vmem:[%s12142_s5 + $0xb2c] sm:$0xf]  ;;  %v7502_v10 = vld [vmem:[%s12142_s5 + $0x4a4] sm:$0xf0]  ;;  %v7807_v60 = vld [vmem:[%s12142_s5 + $0xe34] sm:$0xf] }
 0x176   :  { %3780 = vmatpush.bf16.msrb.mxu3 %v6924_v17  ;;  %3806 = vmatpush.bf16.msra.mxu1 %v6928_v18  ;;  %v7389_v17 = vld [vmem:[%s12142_s5 + $0x124] sm:$0xf]  ;;  %v7406_v51 = vld [vmem:[%s12142_s5 + $0x1a4] sm:$0xf0]  ;;  %v7069_v63 = vld [vmem:[%s12142_s5 + $0xeb0] sm:$0xf0] }
 0x177   :  { %v5389_v18 = vld [vmem:[%s12142_s5 + $0x1a0] sm:$0xf0]  ;;  %v5396_v61 = vor.u32 %v7406_v51, %v5395_v50  ;;  %v5789_v50 = vld [vmem:[%s12142_s5 + $0x4b0] sm:$0xf0] }
 0x178   :  { %3766 = vmatpush.bf16.msrb.mxu2 %v6028_v21  ;;  %3792 = vmatpush.bf16.msra.mxu0 %v6032_v22  ;;  %v7188_v21 = vor.u32 %v7854_v12, %v7187_v11  ;;  %v7192_v22 = vor.u32 %v7838_v13, %v7189_v14  ;;  %v5392_v27 = vor.u32 %v7389_v17, %v5389_v18  ;;  %v7486_v11 = vld [vmem:[%s12142_s5 + $0x42c] sm:$0xf] }
 0x179   :  { %v5781_v12 = vld [vmem:[%s12142_s5 + $0x4a8] sm:$0xf0] }
 0x17a   :  { %3781 = vmatpush.bf16.msrb.mxu3 %v6796_v29  ;;  %3807 = vmatpush.bf16.msra.mxu1 %v6800_v30  ;;  %v5259_v29 = vld [vmem:[%s12142_s5 + $0x20] sm:$0xf]  ;;  %v5784_v18 = vor.u32 %v7486_v11, %v5781_v12 }
 0x17b   :  { %v7373_v30 = vld [vmem:[%s12142_s5 + $0x9c] sm:$0xf0] }
 0x17c   :  { %3767 = vmatpush.bf16.msrb.mxu2 %v5900_v33  ;;  %3793 = vmatpush.bf16.msra.mxu0 %v5904_v34  ;;  %v6163_v33 = vld [vmem:[%s12142_s5 + $0x728] sm:$0xf]  ;;  %v5260_v39 = vor.u32 %v7373_v30, %v5259_v29  ;;  %v5656_v30 = vor.u32 %v7454_v23, %v5653_v24 }
 0x17d   :  { %v7598_v34 = vld [vmem:[%s12142_s5 + $0x7a4] sm:$0xf0] }
 0x17e   :  { %3782 = vmatpush.bf16.msrb.mxu3 %v6668_v41  ;;  %3808 = vmatpush.bf16.msra.mxu1 %v6672_v42  ;;  %v6931_v41 = vld [vmem:[%s12142_s5 + $0xd28] sm:$0xf]  ;;  %v6164_v43 = vor.u32 %v7598_v34, %v6163_v33 }
 0x17f   :  { %v7790_v42 = vld [vmem:[%s12142_s5 + $0xda4] sm:$0xf0] }
 0x180   :  { %3768 = vmatpush.bf16.msrb.mxu2 %v5772_v45  ;;  %3794 = vmatpush.bf16.msra.mxu0 %v5776_v47  ;;  %v7774_v45 = vld [vmem:[%s12142_s5 + $0xd2c] sm:$0xf]  ;;  %v6932_v52 = vor.u32 %v7790_v42, %v6931_v41  ;;  %v5523_v33 = vld [vmem:[%s12142_s5 + $0x228] sm:$0xf] }
 0x181   :  { %v6933_v47 = vld [vmem:[%s12142_s5 + $0xda8] sm:$0xf0]  ;;  %v7438_v34 = vld [vmem:[%s12142_s5 + $0x2a4] sm:$0xf0] }
 0x182   :  { %3783 = vmatpush.bf16.msrb.mxu3 %v6540_v54  ;;  %3809 = vmatpush.bf16.msra.mxu1 %v6544_v55  ;;  %v6936_v53 = vor.u32 %v7774_v45, %v6933_v47  ;;  %v6803_v54 = vld [vmem:[%s12142_s5 + $0xc28] sm:$0xf]  ;;  %v7614_v41 = vld [vmem:[%s12142_s5 + $0x82c] sm:$0xf]  ;;  %v5524_v42 = vor.u32 %v7438_v34, %v5523_v33  ;;  %v7195_v45 = vld [vmem:[%s12142_s5 + $0xf30] sm:$0xf] }
 0x183   :  { %v7758_v55 = vld [vmem:[%s12142_s5 + $0xca4] sm:$0xf0]  ;;  %v7855_v47 = vld [vmem:[%s12142_s5 + $0xfac] sm:$0xf0]  ;;  %v9588_v33 = vld [vmem:[%s12145_s6] sm:$0xff] }
 0x184   :  { %3769 = vmatpush.bf16.msrb.mxu2 %v5644_v58  ;;  %3795 = vmatpush.bf16.msra.mxu0 %v5648_v59  ;;  %v7742_v58 = vld [vmem:[%s12142_s5 + $0xc2c] sm:$0xf]  ;;  %v6804_v0 = vor.u32 %v7758_v55, %v6803_v54  ;;  %v7535_v34 = vld [vmem:[%s12142_s5 + $0x5ac] sm:$0xf0] }
 0x185   :  { %v6805_v59 = vld [vmem:[%s12142_s5 + $0xca8] sm:$0xf0] }
 0x186   :  { %3784 = vmatpush.bf16.msrb.mxu3 %v6412_v2  ;;  %3810 = vmatpush.bf16.msra.mxu1 %v6416_v3  ;;  %v6808_v1 = vor.u32 %v7742_v58, %v6805_v59  ;;  %v6675_v2 = vld [vmem:[%s12142_s5 + $0xb28] sm:$0xf]  ;;  %v7067_v58 = vld [vmem:[%s12142_s5 + $0xe30] sm:$0xf] }
 0x187   :  { %v7726_v3 = vld [vmem:[%s12142_s5 + $0xba4] sm:$0xf0]  ;;  %v7823_v59 = vld [vmem:[%s12142_s5 + $0xeac] sm:$0xf0] }
 0x188   :  { %3770 = vmatpush.bf16.msrb.mxu2 %v5516_v8  ;;  %3796 = vmatpush.bf16.msra.mxu0 %v5520_v9  ;;  %v6677_v8 = vld [vmem:[%s12142_s5 + $0xba8] sm:$0xf0]  ;;  %v5779_v9 = vld [vmem:[%s12142_s5 + $0x428] sm:$0xf]  ;;  %v6676_v13 = vor.u32 %v7726_v3, %v6675_v2 }
 0x189   :  { %v6680_v14 = vor.u32 %v7710_v7, %v6677_v8  ;;  %v5780_v17 = vor.u32 %v7502_v10, %v5779_v9  ;;  %v7358_v2 = vld [vmem:[%s12142_s5 + $0x2c] sm:$0xf]  ;;  %v7583_v7 = vld [vmem:[%s12142_s5 + $0x734] sm:$0xf]  ;;  %v7068_v9 = vor.u32 %v7823_v59, %v7067_v58  ;;  %v7072_v10 = vor.u32 %v7807_v60, %v7069_v63  ;;  %v5659_v63 = vld [vmem:[%s12142_s5 + $0x330] sm:$0xf] }
 0x18a   :  { %3785 = vmatpush.bf16.msrb.mxu3 %v6284_v19  ;;  %3811 = vmatpush.bf16.msra.mxu1 %v6288_v20  ;;  %v7678_v19 = vld [vmem:[%s12142_s5 + $0xa2c] sm:$0xf]  ;;  %v6173_v8 = vld [vmem:[%s12142_s5 + $0x7b0] sm:$0xf0] }
 0x18b   :  { %v6549_v20 = vld [vmem:[%s12142_s5 + $0xaa8] sm:$0xf0]  ;;  %v6176_v16 = vor.u32 %v7583_v7, %v6173_v8  ;;  %v7679_v58 = vld [vmem:[%s12142_s5 + $0xa34] sm:$0xf] }
 0x18c   :  { %3771 = vmatpush.bf16.msrb.mxu2 %v5388_v26  ;;  %3797 = vmatpush.bf16.msra.mxu0 %v5392_v27  ;;  %v6552_v26 = vor.u32 %v7678_v19, %v6549_v20  ;;  %v6419_v27 = vld [vmem:[%s12142_s5 + $0x928] sm:$0xf]  ;;  %v5269_v3 = vld [vmem:[%s12142_s5 + $0xa8] sm:$0xf0]  ;;  %v6043_v19 = vld [vmem:[%s12142_s5 + $0x630] sm:$0xf] }
 0x18d   :  { %3786 = vmatmul.bf16.vlgmr.msrb.gmra.mxu3 %v8731_v46  ;;  %3812 = vmatmul.bf16.vlgmr.msra.gmra.mxu1 %v8731_v46  ;;  %v5272_v12 = vor.u32 %v7358_v2, %v5269_v3  ;;  %v7567_v20 = vld [vmem:[%s12142_s5 + $0x6ac] sm:$0xf0]  ;;  %v933_v2 = vperm.slane %v9588_v33, 0  ;;  %v7455_v3 = vld [vmem:[%s12142_s5 + $0x334] sm:$0xf] }
 0x18e   :  { %3830 = vmatpush.bf16.msra.mxu3 %v7188_v21  ;;  %3856 = vmatpush.bf16.msrb.mxu1 %v7192_v22  ;;  %v5651_v21 = vld [vmem:[%s12142_s5 + $0x328] sm:$0xf] }
 0x18f   :  { %v7470_v22 = vld [vmem:[%s12142_s5 + $0x3a4] sm:$0xf0] }
 0x190   :  { %3772 = vmatpush.bf16.msrb.mxu2 %v5260_v39  ;;  %3798 = vmatpush.bf16.msra.mxu0 %v5264_v40  ;;  %v5652_v29 = vor.u32 %v7470_v22, %v5651_v21  ;;  %v6291_v39 = vld [vmem:[%s12142_s5 + $0x828] sm:$0xf]  ;;  %v7551_v21 = vld [vmem:[%s12142_s5 + $0x634] sm:$0xf] }
 0x191   :  { %v7630_v40 = vld [vmem:[%s12142_s5 + $0x8a4] sm:$0xf0]  ;;  %v6045_v22 = vld [vmem:[%s12142_s5 + $0x6b0] sm:$0xf0] }
 0x192   :  { %3831 = vmatpush.bf16.msra.mxu3 %v7060_v37  ;;  %3857 = vmatpush.bf16.msrb.mxu1 %v7064_v38  ;;  %v6420_v37 = vor.u32 %v7662_v28, %v6419_v27  ;;  %v6424_v38 = vor.u32 %v7646_v31, %v6421_v32  ;;  %v6292_v54 = vor.u32 %v7630_v40, %v6291_v39  ;;  %v7743_v27 = vld [vmem:[%s12142_s5 + $0xc34] sm:$0xf]  ;;  %v5915_v32 = vld [vmem:[%s12142_s5 + $0x530] sm:$0xf]  ;;  %v934_v39 = vperm.slane %v9588_v33, 1 }
 0x193   :  { %3773 = vmatmul.bf16.vlgmr.msrb.gmra.mxu2 %v8771_v5  ;;  %3799 = vmatmul.bf16.vlgmr.msra.gmra.mxu0 %v8771_v5  ;;  %v6813_v31 = vld [vmem:[%s12142_s5 + $0xcb0] sm:$0xf0]  ;;  %v6683_v40 = vld [vmem:[%s12142_s5 + $0xb30] sm:$0xf] }
 0x194   :  { %3817 = vmatpush.bf16.msra.mxu2 %v6164_v43  ;;  %3843 = vmatpush.bf16.msrb.mxu0 %v6168_v44  ;;  %v5528_v43 = vor.u32 %v7422_v35, %v5525_v36  ;;  %v6293_v44 = vld [vmem:[%s12142_s5 + $0x8a8] sm:$0xf0]  ;;  %v7519_v35 = vld [vmem:[%s12142_s5 + $0x534] sm:$0xf] }
 0x195   :  { %v6296_v55 = vor.u32 %v7614_v41, %v6293_v44  ;;  %v5917_v36 = vld [vmem:[%s12142_s5 + $0x5b0] sm:$0xf0]  ;;  %v7727_v41 = vld [vmem:[%s12142_s5 + $0xbac] sm:$0xf0] }
 0x196   :  { %3832 = vmatpush.bf16.msra.mxu3 %v6932_v52  ;;  %3858 = vmatpush.bf16.msrb.mxu1 %v6936_v53  ;;  %v7390_v52 = vld [vmem:[%s12142_s5 + $0x12c] sm:$0xf]  ;;  %v7711_v44 = vld [vmem:[%s12142_s5 + $0xb34] sm:$0xf] }
 0x197   :  { %v5397_v53 = vld [vmem:[%s12142_s5 + $0x1a8] sm:$0xf0] }
 0x198   :  { %3818 = vmatpush.bf16.msra.mxu2 %v6036_v56  ;;  %3844 = vmatpush.bf16.msrb.mxu0 %v6040_v57  ;;  %v7196_v56 = vor.u32 %v7855_v47, %v7195_v45  ;;  %v7200_v57 = vor.u32 %v7839_v48, %v7197_v49  ;;  %v5400_v62 = vor.u32 %v7390_v52, %v5397_v53  ;;  %v6685_v45 = vld [vmem:[%s12142_s5 + $0xbb0] sm:$0xf0]  ;;  %v5787_v47 = vld [vmem:[%s12142_s5 + $0x430] sm:$0xf] }
 0x199   :  { %v7503_v48 = vld [vmem:[%s12142_s5 + $0x4ac] sm:$0xf0]  ;;  %v7487_v49 = vld [vmem:[%s12142_s5 + $0x434] sm:$0xf] }
 0x19a   :  { %3833 = vmatpush.bf16.msra.mxu3 %v6804_v0  ;;  %3859 = vmatpush.bf16.msrb.mxu1 %v6808_v1  ;;  %v5267_v0 = vld [vmem:[%s12142_s5 + $0x28] sm:$0xf]  ;;  %v5788_v60 = vor.u32 %v7503_v48, %v5787_v47  ;;  %v936_v47 = vperm.slane %v9588_v33, 3  ;;  %v7075_v48 = vld [vmem:[%s12142_s5 + $0xe38] sm:$0xf] }
 0x19b   :  { %v7374_v1 = vld [vmem:[%s12142_s5 + $0xa4] sm:$0xf0] }
 0x19c   :  { %3819 = vmatpush.bf16.msra.mxu2 %v5908_v4  ;;  %3845 = vmatpush.bf16.msrb.mxu0 %v5912_v6  ;;  %v6171_v4 = vld [vmem:[%s12142_s5 + $0x730] sm:$0xf]  ;;  %v5268_v11 = vor.u32 %v7374_v1, %v5267_v0 }
 0x19d   :  { %v7599_v6 = vld [vmem:[%s12142_s5 + $0x7ac] sm:$0xf0] }
 0x19e   :  { %3834 = vmatpush.bf16.msra.mxu3 %v6676_v13  ;;  %3860 = vmatpush.bf16.msrb.mxu1 %v6680_v14  ;;  %v6939_v13 = vld [vmem:[%s12142_s5 + $0xd30] sm:$0xf]  ;;  %v6172_v15 = vor.u32 %v7599_v6, %v6171_v4  ;;  %v5661_v4 = vld [vmem:[%s12142_s5 + $0x3b0] sm:$0xf0] }
 0x19f   :  { %v7791_v14 = vld [vmem:[%s12142_s5 + $0xdac] sm:$0xf0] }
 0x1a0   :  { %3820 = vmatpush.bf16.msra.mxu2 %v5780_v17  ;;  %3846 = vmatpush.bf16.msrb.mxu0 %v5784_v18  ;;  %v7775_v17 = vld [vmem:[%s12142_s5 + $0xd34] sm:$0xf]  ;;  %v6940_v23 = vor.u32 %v7791_v14, %v6939_v13  ;;  %v7471_v0 = vld [vmem:[%s12142_s5 + $0x3ac] sm:$0xf0]  ;;  %v5664_v13 = vor.u32 %v7455_v3, %v5661_v4  ;;  %v7584_v3 = vld [vmem:[%s12142_s5 + $0x73c] sm:$0xf] }
 0x1a1   :  { %v6941_v18 = vld [vmem:[%s12142_s5 + $0xdb0] sm:$0xf0]  ;;  %v6181_v4 = vld [vmem:[%s12142_s5 + $0x7b8] sm:$0xf0] }
 0x1a2   :  { %3835 = vmatpush.bf16.msra.mxu3 %v6548_v25  ;;  %3861 = vmatpush.bf16.msrb.mxu1 %v6552_v26  ;;  %v6944_v24 = vor.u32 %v7775_v17, %v6941_v18  ;;  %v6811_v25 = vld [vmem:[%s12142_s5 + $0xc30] sm:$0xf]  ;;  %v7647_v14 = vld [vmem:[%s12142_s5 + $0x934] sm:$0xf] }
 0x1a3   :  { %v7759_v26 = vld [vmem:[%s12142_s5 + $0xcac] sm:$0xf0] }
 0x1a4   :  { %3821 = vmatpush.bf16.msra.mxu2 %v5652_v29  ;;  %3847 = vmatpush.bf16.msrb.mxu0 %v5656_v30  ;;  %v6044_v29 = vor.u32 %v7567_v20, %v6043_v19  ;;  %v6048_v30 = vor.u32 %v7551_v21, %v6045_v22  ;;  %v7439_v18 = vld [vmem:[%s12142_s5 + $0x2ac] sm:$0xf0]  ;;  %v7423_v19 = vld [vmem:[%s12142_s5 + $0x234] sm:$0xf] }
 0x1a5   :  { %v5533_v20 = vld [vmem:[%s12142_s5 + $0x2b0] sm:$0xf0] }
 0x1a6   :  { %3836 = vmatpush.bf16.msra.mxu3 %v6420_v37  ;;  %3862 = vmatpush.bf16.msrb.mxu1 %v6424_v38  ;;  %v6812_v37 = vor.u32 %v7759_v26, %v6811_v25  ;;  %v6816_v38 = vor.u32 %v7743_v27, %v6813_v31  ;;  %v7631_v27 = vld [vmem:[%s12142_s5 + $0x8ac] sm:$0xf0] }
 0x1a8   :  { %3822 = vmatpush.bf16.msra.mxu2 %v5524_v42  ;;  %3848 = vmatpush.bf16.msrb.mxu0 %v5528_v43  ;;  %v5916_v42 = vor.u32 %v7535_v34, %v5915_v32  ;;  %v5920_v43 = vor.u32 %v7519_v35, %v5917_v36  ;;  %v5536_v32 = vor.u32 %v7423_v19, %v5533_v20  ;;  %v7203_v34 = vld [vmem:[%s12142_s5 + $0xf38] sm:$0xf]  ;;  %v7840_v36 = vld [vmem:[%s12142_s5 + $0xf3c] sm:$0xf] }
 0x1a9   :  { %v7856_v35 = vld [vmem:[%s12142_s5 + $0xfb4] sm:$0xf0]  ;;  %v6184_v20 = vor.u32 %v7584_v3, %v6181_v4 }
 0x1aa   :  { %3837 = vmatpush.bf16.msra.mxu3 %v6292_v54  ;;  %3863 = vmatpush.bf16.msrb.mxu1 %v6296_v55  ;;  %v3605_v28 = vpop.f32.mrf.mxu1  ;;  %v6684_v54 = vor.u32 %v7727_v41, %v6683_v40  ;;  %v6688_v55 = vor.u32 %v7711_v44, %v6685_v45  ;;  %v7407_v40 = vld [vmem:[%s12142_s5 + $0x1ac] sm:$0xf0]  ;;  %v7391_v41 = vld [vmem:[%s12142_s5 + $0x134] sm:$0xf] }
 0x1ac   :  { %3823 = vmatpush.bf16.msra.mxu2 %v5396_v61  ;;  %3849 = vmatpush.bf16.msrb.mxu0 %v5400_v62  ;;  %v5792_v61 = vor.u32 %v7487_v49, %v5789_v50  ;;  %v6557_v62 = vld [vmem:[%s12142_s5 + $0xab0] sm:$0xf0] }
 0x1ad   :  { %3838 = vmatmul.bf16.vlgmr.msra.gmra.mxu3 %v8731_v46  ;;  %3864 = vmatmul.bf16.vlgmr.msrb.gmra.mxu1 %v8731_v46  ;;  %v6560_v8 = vor.u32 %v7679_v58, %v6557_v62  ;;  %v5275_v58 = vld [vmem:[%s12142_s5 + $0x30] sm:$0xf]  ;;  %v7359_v62 = vld [vmem:[%s12142_s5 + $0x34] sm:$0xf] }
 0x1ae   :  { %3882 = vmatpush.bf16.msrb.mxu3 %v7196_v56  ;;  %3908 = vmatpush.bf16.msra.mxu1 %v7200_v57  ;;  %v6555_v56 = vld [vmem:[%s12142_s5 + $0xa30] sm:$0xf] }
 0x1af   :  { %v7695_v57 = vld [vmem:[%s12142_s5 + $0xaac] sm:$0xf0] }
 0x1b0   :  { %3824 = vmatpush.bf16.msra.mxu2 %v5268_v11  ;;  %3850 = vmatpush.bf16.msrb.mxu0 %v5272_v12  ;;  %v3579_v51 = vpop.f32.mrf.mxu3  ;;  %v3592_v52 = vpop.f32.mrf.mxu0  ;;  %v6556_v7 = vor.u32 %v7695_v57, %v6555_v56  ;;  %v5660_v12 = vor.u32 %v7471_v0, %v5659_v63  ;;  %v7077_v57 = vld [vmem:[%s12142_s5 + $0xeb8] sm:$0xf0]  ;;  %v5277_v63 = vld [vmem:[%s12142_s5 + $0xb0] sm:$0xf0]  ;;  %v6179_v0 = vld [vmem:[%s12142_s5 + $0x738] sm:$0xf] }
 0x1b1   :  { %v3593_v53 = vadd.f32 %v3592_v52, %v934_v39  ;;  %v5403_v39 = vld [vmem:[%s12142_s5 + $0x130] sm:$0xf] }
 0x1b2   :  { %3883 = vmatpush.bf16.msrb.mxu3 %v7068_v9  ;;  %3909 = vmatpush.bf16.msra.mxu1 %v7072_v10  ;;  %v3607_v59 = vpop.f32.mrf.mxu1  ;;  %v6427_v9 = vld [vmem:[%s12142_s5 + $0x930] sm:$0xf] }
 0x1b3   :  { %3825 = vmatmul.bf16.vlgmr.msra.gmra.mxu2 %v8771_v5  ;;  %3851 = vmatmul.bf16.vlgmr.msrb.gmra.mxu0 %v8771_v5  ;;  %v3606_v1 = vadd.f32 %v3605_v28, %v3593_v53  ;;  %v7663_v10 = vld [vmem:[%s12142_s5 + $0x9ac] sm:$0xf0]  ;;  %v7615_v28 = vld [vmem:[%s12142_s5 + $0x834] sm:$0xf]  ;;  %v7824_v53 = vld [vmem:[%s12142_s5 + $0xeb4] sm:$0xf0] }
 0x1b4   :  { %3869 = vmatpush.bf16.msrb.mxu2 %v6172_v15  ;;  %3895 = vmatpush.bf16.msra.mxu0 %v6176_v16  ;;  %v6429_v15 = vld [vmem:[%s12142_s5 + $0x9b0] sm:$0xf0]  ;;  %v5531_v16 = vld [vmem:[%s12142_s5 + $0x230] sm:$0xf]  ;;  %v6428_v25 = vor.u32 %v7663_v10, %v6427_v9  ;;  %v6947_v9 = vld [vmem:[%s12142_s5 + $0xd38] sm:$0xf] }
 0x1b5   :  { %v7274_v6 = vmul.f32 -1.442695, %v3606_v1  ;;  %v6432_v26 = vor.u32 %v7647_v14, %v6429_v15  ;;  %v5532_v31 = vor.u32 %v7439_v18, %v5531_v16  ;;  %v7375_v59 = vld [vmem:[%s12142_s5 + $0xac] sm:$0xf0]  ;;  %v7792_v10 = vld [vmem:[%s12142_s5 + $0xdb4] sm:$0xf0]  ;;  %v5280_v14 = vor.u32 %v7359_v62, %v5277_v63 }
 0x1b6   :  { %3884 = vmatpush.bf16.msrb.mxu3 %v6940_v23  ;;  %3910 = vmatpush.bf16.msra.mxu1 %v6944_v24  ;;  %v3566_v11 = vpop.f32.mrf.mxu2  ;;  %v6299_v23 = vld [vmem:[%s12142_s5 + $0x830] sm:$0xf]  ;;  %v935_v15 = vperm.slane %v9588_v33, 2  ;;  %v7776_v16 = vld [vmem:[%s12142_s5 + $0xd3c] sm:$0xf]  ;;  %v938_v63 = vperm.slane %v9588_v33, 5 }
 0x1b7   :  { %7865 = vpow2.f32 %v7274_v6  ;;  %v3567_v17 = vadd.f32 %v3566_v11, %v933_v2  ;;  %v6300_v44 = vor.u32 %v7631_v27, %v6299_v23  ;;  %v7600_v2 = vld [vmem:[%s12142_s5 + $0x7b4] sm:$0xf0] }
 0x1b8   :  { %3870 = vmatpush.bf16.msrb.mxu2 %v6044_v29  ;;  %3896 = vmatpush.bf16.msra.mxu0 %v6048_v30  ;;  %v3581_v21 = vpop.f32.mrf.mxu3  ;;  %v3594_v22 = vpop.f32.mrf.mxu0  ;;  %v6301_v29 = vld [vmem:[%s12142_s5 + $0x8b0] sm:$0xf0]  ;;  %v6180_v19 = vor.u32 %v7600_v2, %v6179_v0  ;;  %v5795_v0 = vld [vmem:[%s12142_s5 + $0x438] sm:$0xf] }
 0x1b9   :  { %v3580_v24 = vadd.f32 %v3579_v51, %v3567_v17  ;;  %v6304_v45 = vor.u32 %v7615_v28, %v6301_v29  ;;  %v7204_v51 = vor.u32 %v7856_v35, %v7203_v34  ;;  %v6949_v17 = vld [vmem:[%s12142_s5 + $0xdb8] sm:$0xf0]  ;;  %v6051_v21 = vld [vmem:[%s12142_s5 + $0x638] sm:$0xf]  ;;  %v6948_v28 = vor.u32 %v7792_v10, %v6947_v9 }
 0x1ba   :  { %3885 = vmatpush.bf16.msrb.mxu3 %v6812_v37  ;;  %3911 = vmatpush.bf16.msra.mxu1 %v6816_v38  ;;  %v3657_v30 = vpop.f32.mrf.mxu1  ;;  %v7205_v38 = vld [vmem:[%s12142_s5 + $0xfb8] sm:$0xf0]  ;;  %v7568_v22 = vld [vmem:[%s12142_s5 + $0x6b4] sm:$0xf0] }
 0x1bb   :  { %v7273_v37 = vmul.f32 -1.442695, %v3580_v24  ;;  %v7208_v52 = vor.u32 %v7840_v36, %v7205_v38  ;;  %v7552_v24 = vld [vmem:[%s12142_s5 + $0x63c] sm:$0xf]  ;;  %v9788_v29 = vld [vmem:[%s12142_s5 + $0xc38] sm:$0xf] }
 0x1bc   :  { %3871 = vmatpush.bf16.msrb.mxu2 %v5916_v42  ;;  %3897 = vmatpush.bf16.msra.mxu0 %v5920_v43  ;;  %v5405_v42 = vld [vmem:[%s12142_s5 + $0x1b0] sm:$0xf0]  ;;  %v7760_v34 = vld [vmem:[%s12142_s5 + $0xcb4] sm:$0xf0]  ;;  %v7744_v35 = vld [vmem:[%s12142_s5 + $0xc3c] sm:$0xf] }
 0x1bd   :  { %v7866_v43 = vpop.eup %7865  ;;  %7867 = vpow2.f32 %v7273_v37  ;;  %v5408_v56 = vor.u32 %v7391_v41, %v5405_v42  ;;  %v6821_v36 = vld [vmem:[%s12142_s5 + $0xcb8] sm:$0xf0]  ;;  %v5923_v41 = vld [vmem:[%s12142_s5 + $0x538] sm:$0xf] }
 0x1be   :  { %3886 = vmatpush.bf16.msrb.mxu3 %v6684_v54  ;;  %3912 = vmatpush.bf16.msra.mxu1 %v6688_v55  ;;  %v9715_v49 = vadd.f32 1.0, %v7866_v43  ;;  %v3568_v50 = vpop.f32.mrf.mxu2  ;;  %v7808_v54 = vld [vmem:[%s12142_s5 + $0xe3c] sm:$0xf]  ;;  %v5404_v55 = vor.u32 %v7407_v40, %v5403_v39  ;;  %v6052_v39 = vor.u32 %v7568_v22, %v6051_v21  ;;  %v7536_v42 = vld [vmem:[%s12142_s5 + $0x5b4] sm:$0xf0] }
 0x1bf   :  { %v7520_v43 = vld [vmem:[%s12142_s5 + $0x53c] sm:$0xf]  ;;  %v5667_v21 = vld [vmem:[%s12142_s5 + $0x338] sm:$0xf] }
 0x1c0   :  { %3872 = vmatpush.bf16.msrb.mxu2 %v5788_v60  ;;  %3898 = vmatpush.bf16.msra.mxu0 %v5792_v61  ;;  %7869 = vrcp.f32 %v9715_v49  ;;  %v9733_v60 = vpop.f32.mrf.mxu3  ;;  %v3644_v61 = vpop.f32.mrf.mxu0  ;;  %v4543_v50 = vand.u32 2147483648, %v9715_v49  ;;  %vm4537_vm1 = vweird.f32 %v9715_v49 }
 0x1c1   :  { %v3645_v1 = vadd.f32 %v3644_v61, %v936_v47  ;;  %v5925_v47 = vld [vmem:[%s12142_s5 + $0x5b8] sm:$0xf0]  ;;  %v5924_v61 = vor.u32 %v7536_v42, %v5923_v41 }
 0x1c2   :  { %3887 = vmatpush.bf16.msrb.mxu3 %v6556_v7  ;;  %3913 = vmatpush.bf16.msra.mxu1 %v6560_v8  ;;  %v3659_v6 = vpop.f32.mrf.mxu1  ;;  %v7076_v7 = vor.u32 %v7824_v53, %v7075_v48  ;;  %v7080_v8 = vor.u32 %v7808_v54, %v7077_v57  ;;  %v9817_v48 = vld [vmem:[%s12142_s5 + $0xb38] sm:$0xf]  ;;  %v6824_v53 = vor.u32 %v7744_v35, %v6821_v36  ;;  %v4541_v57 = vand.u32 2147483647, %v9715_v49 }
 0x1c3   :  { %v7868_v11 = vpop.eup %7867  ;;  %v9828_v54 = vld [vmem:[%s12142_s5 + $0xbb4] sm:$0xf0]  ;;  %v5928_v62 = vor.u32 %v7520_v43, %v5925_v47  ;;  %v7488_v6 = vld [vmem:[%s12142_s5 + $0x43c] sm:$0xf]  ;;  %v4544_v9 = vor.u32 1.1754944e-38, %v4543_v50  ;;  %v937_v43 = vperm.slane %v9588_v33, 4 }
 0x1c4   :  { %3873 = vmatpush.bf16.msrb.mxu2 %v5660_v12  ;;  %3899 = vmatpush.bf16.msra.mxu0 %v5664_v13  ;;  %v3658_v12 = vadd.f32 %v3657_v30, %v3645_v1  ;;  %v5276_v13 = vor.u32 %v7375_v59, %v5275_v58  ;;  %v9766_v18 = vadd.f32 1.0, %v7868_v11  ;;  %v6693_v59 = vld [vmem:[%s12142_s5 + $0xbb8] sm:$0xf0]  ;;  %v7504_v1 = vld [vmem:[%s12142_s5 + $0x4b4] sm:$0xf0]  ;;  %vm4542_vm3 = vcmp.eq.f32.partialorder %v4541_v57, 8.507059e+37 }
 0x1c6   :  { %3888 = vmatpush.bf16.msrb.mxu3 %v6428_v25  ;;  %3914 = vmatpush.bf16.msra.mxu1 %v6432_v26  ;;  %v7276_v23 = vmul.f32 -1.442695, %v3658_v12  ;;  %v6053_v25 = vld [vmem:[%s12142_s5 + $0x6b8] sm:$0xf0]  ;;  %v9782_v26 = vpop.eup %7869  ;;  %7871 = vrcp.f32 %v9766_v18  ;;  %v3618_v27 = vpop.f32.mrf.mxu2  ;;  %v6692_v12 = vor.u32 %v9828_v54, %v9817_v48  ;;  %vm4522_vm5 = vweird.f32 %v9766_v18 }
 0x1c7   :  { %v4533_v30 = vmul.f32 %v9782_v26, %v9715_v49  ;;  %v6056_v40 = vor.u32 %v7552_v24, %v6053_v25  ;;  %vm4538_vm0 = vweird.f32 %v9782_v26  ;;  %v7841_v49 = vld [vmem:[%s12142_s5 + $0xf44] sm:$0xf] }
 0x1c8   :  { %3874 = vmatpush.bf16.msrb.mxu2 %v5532_v31  ;;  %3900 = vmatpush.bf16.msra.mxu0 %v5536_v32  ;;  %7873 = vpow2.f32 %v7276_v23  ;;  %v3619_v31 = vadd.f32 %v3618_v27, %v935_v15  ;;  %v6952_v32 = vor.u32 %v7776_v16, %v6949_v17  ;;  %v3633_v37 = vpop.f32.mrf.mxu3  ;;  %v3646_v38 = vpop.f32.mrf.mxu0  ;;  %vm9867_vm2 = vmor %vm4537_vm1, %vm4538_vm0  ;;  %v9884_v15 = vld [vmem:[%s12142_s5 + $0xa3c] sm:$0xf]  ;;  %v4528_v23 = vand.u32 2147483648, %v9766_v18 }
 0x1c9   :  { %v7456_v27 = vld [vmem:[%s12142_s5 + $0x33c] sm:$0xf]  ;;  %v9920_v37 = vld [vmem:[%s12142_s5 + $0x938] sm:$0xf] }
 0x1ca   :  { %3889 = vmatpush.bf16.msrb.mxu3 %v6300_v44  ;;  %3915 = vmatpush.bf16.msra.mxu1 %v6304_v45  ;;  %v4534_v44 = vsub.f32 1.0, %v4533_v30  ;;  %v3632_v45 = vadd.f32 %v9733_v60, %v3619_v31  ;;  %v5669_v31 = vld [vmem:[%s12142_s5 + $0x3b8] sm:$0xf0]  ;;  %v7664_v38 = vld [vmem:[%s12142_s5 + $0x9b4] sm:$0xf0]  ;;  %v4529_v47 = vor.u32 1.1754944e-38, %v4528_v23 }
 0x1cb   :  { %v5672_v50 = vor.u32 %v7456_v27, %v5669_v31 }
 0x1cc   :  { %3875 = vmatpush.bf16.msrb.mxu2 %v5404_v55  ;;  %3901 = vmatpush.bf16.msra.mxu0 %v5408_v56  ;;  %v9833_v55 = vld [vmem:[%s12142_s5 + $0xb3c] sm:$0xf]  ;;  %v4535_v56 = vmul.f32 %v9782_v26, %v4534_v44  ;;  %v7275_v58 = vmul.f32 -1.442695, %v3632_v45  ;;  %v9841_v60 = vpop.eup %7871  ;;  %v5539_v45 = vld [vmem:[%s12142_s5 + $0x238] sm:$0xf] }
 0x1cd   :  { %3890 = vmatmul.bf16.vlgmr.msrb.gmra.mxu3 %v8731_v46  ;;  %3916 = vmatmul.bf16.vlgmr.msra.gmra.mxu1 %v8731_v46  ;;  %v4518_v4 = vmul.f32 %v9841_v60, %v9766_v18  ;;  %vm4523_vm4 = vweird.f32 %v9841_v60  ;;  %v6437_v44 = vld [vmem:[%s12142_s5 + $0x9b8] sm:$0xf0] }
 0x1ce   :  { %3934 = vmatpush.bf16.msra.mxu3 %v7204_v51  ;;  %3960 = vmatpush.bf16.msrb.mxu1 %v7208_v52  ;;  %v9822_v51 = vpop.f32.mrf.mxu1  ;;  %v6820_v52 = vor.u32 %v7760_v34, %v9788_v29  ;;  %v7874_v2 = vpop.eup %7873  ;;  %v4536_v3 = vadd.f32 %v9782_v26, %v4535_v56  ;;  %7875 = vpow2.f32 %v7275_v58  ;;  %v4526_v29 = vand.u32 2147483647, %v9766_v18  ;;  %vm4524_vm6 = vmor %vm4522_vm5, %vm4523_vm4 }
 0x1cf   :  { %v9871_v10 = vadd.f32 1.0, %v7874_v2  ;;  %v3620_v11 = vpop.f32.mrf.mxu2  ;;  %v4519_v17 = vsub.f32 1.0, %v4518_v4  ;;  %v6436_v58 = vor.u32 %v7664_v38, %v9920_v37  ;;  %v9984_v2 = vld [vmem:[%s12142_s5 + $0xf40] sm:$0xf]  ;;  %v7376_v38 = vld [vmem:[%s12142_s5 + $0xb4] sm:$0xf0] }
 0x1d0   :  { %3876 = vmatpush.bf16.msrb.mxu2 %v5276_v13  ;;  %3902 = vmatpush.bf16.msra.mxu0 %v5280_v14  ;;  %v6696_v13 = vor.u32 %v9833_v55, %v6693_v59  ;;  %v9879_v14 = vld [vmem:[%s12142_s5 + $0xab4] sm:$0xf0]  ;;  %v4540_v16 = vsel %vm9867_vm2, %v9782_v26, %v4536_v3  ;;  %v9897_v24 = vpop.f32.mrf.mxu3  ;;  %v3696_v30 = vpop.f32.mrf.mxu0  ;;  %vm4527_vm7 = vcmp.eq.f32.partialorder %v4526_v29, 8.507059e+37  ;;  %v5541_v55 = vld [vmem:[%s12142_s5 + $0x2b8] sm:$0xf0] }
 0x1d1   :  { %v4545_v22 = vsel %vm4542_vm3, %v4544_v9, %v4540_v16  ;;  %7877 = vrcp.f32 %v9871_v10  ;;  %v7472_v26 = vld [vmem:[%s12142_s5 + $0x3b4] sm:$0xf0]  ;;  %v9989_v3 = vld [vmem:[%s12142_s5 + $0xfbc] sm:$0xf0]  ;;  %v7213_v9 = vld [vmem:[%s12142_s5 + $0xfc0] sm:$0xf0]  ;;  %vm4567_vm9 = vweird.f32 %v9871_v10 }
 0x1d2   :  { %3935 = vmatpush.bf16.msra.mxu3 %v7076_v7  ;;  %3961 = vmatpush.bf16.msrb.mxu1 %v7080_v8  ;;  %v5797_v7 = vld [vmem:[%s12142_s5 + $0x4b8] sm:$0xf0]  ;;  %v9863_v8 = vld [vmem:[%s12142_s5 + $0xa38] sm:$0xf]  ;;  %4998 = vst [vmem:[%s12146_s7 + $0x8] sm:$0xff] %v4545_v22  ;;  %v5668_v42 = vor.u32 %v7472_v26, %v5667_v21  ;;  %v4573_v16 = vand.u32 2147483648, %v9871_v10  ;;  %v7212_v29 = vor.u32 %v9989_v3, %v9984_v2 }
 0x1d3   :  { %3877 = vmatmul.bf16.vlgmr.msrb.gmra.mxu2 %v8771_v5  ;;  %3903 = vmatmul.bf16.vlgmr.msra.gmra.mxu0 %v8771_v5  ;;  %v5800_v25 = vor.u32 %v7488_v6, %v5797_v7  ;;  %v6564_v35 = vor.u32 %v9879_v14, %v9863_v8  ;;  %v9964_v59 = vld [vmem:[%s12142_s5 + $0x8b4] sm:$0xf0]  ;;  %v10016_v21 = vld [vmem:[%s12142_s5 + $0xe40] sm:$0xf]  ;;  %v4571_v23 = vand.u32 2147483647, %v9871_v10 }
 0x1d4   :  { %3921 = vmatpush.bf16.msra.mxu2 %v6180_v19  ;;  %3947 = vmatpush.bf16.msrb.mxu0 %v6184_v20  ;;  %v5796_v19 = vor.u32 %v7504_v1, %v5795_v0  ;;  %v6565_v20 = vld [vmem:[%s12142_s5 + $0xab8] sm:$0xf0]  ;;  %v5411_v11 = vld [vmem:[%s12142_s5 + $0x138] sm:$0xf]  ;;  %v10031_v26 = vld [vmem:[%s12142_s5 + $0xe44] sm:$0xf] }
 0x1d5   :  { %v6568_v36 = vor.u32 %v9884_v15, %v6565_v20  ;;  %v7408_v14 = vld [vmem:[%s12142_s5 + $0x1b4] sm:$0xf0]  ;;  %v7392_v15 = vld [vmem:[%s12142_s5 + $0x13c] sm:$0xf]  ;;  %vm4572_vm11 = vcmp.eq.f32.partialorder %v4571_v23, 8.507059e+37 }
 0x1d6   :  { %3936 = vmatpush.bf16.msra.mxu3 %v6948_v28  ;;  %3962 = vmatpush.bf16.msrb.mxu1 %v6952_v32  ;;  %v4520_v28 = vmul.f32 %v9841_v60, %v4519_v17  ;;  %v3697_v32 = vadd.f32 %v3696_v30, %v938_v63  ;;  %v3711_v34 = vpop.f32.mrf.mxu1  ;;  %v5413_v20 = vld [vmem:[%s12142_s5 + $0x1b8] sm:$0xf0]  ;;  %v7216_v30 = vor.u32 %v7841_v49, %v7213_v9  ;;  %v6957_v2 = vld [vmem:[%s12142_s5 + $0xdc0] sm:$0xf0]  ;;  %v6059_v3 = vld [vmem:[%s12142_s5 + $0x640] sm:$0xf] }
 0x1d7   :  { %v3670_v0 = vpop.f32.mrf.mxu2  ;;  %v5412_v31 = vor.u32 %v7408_v14, %v5411_v11  ;;  %v10043_v34 = vld [vmem:[%s12142_s5 + $0x38] sm:$0xf]  ;;  %v5416_v37 = vor.u32 %v7392_v15, %v5413_v20  ;;  %v7745_v14 = vld [vmem:[%s12142_s5 + $0xc44] sm:$0xf]  ;;  %v5931_v20 = vld [vmem:[%s12142_s5 + $0x540] sm:$0xf] }
 0x1d8   :  { %3922 = vmatpush.bf16.msra.mxu2 %v6052_v39  ;;  %3948 = vmatpush.bf16.msrb.mxu0 %v6056_v40  ;;  %v7648_v39 = vld [vmem:[%s12142_s5 + $0x93c] sm:$0xf]  ;;  %v7876_v40 = vpop.eup %7875  ;;  %v4521_v41 = vadd.f32 %v9841_v60, %v4520_v28  ;;  %v3710_v18 = vadd.f32 %v9822_v51, %v3697_v32  ;;  %v9955_v51 = vld [vmem:[%s12142_s5 + $0x838] sm:$0xf]  ;;  %v3671_v4 = vadd.f32 %v3670_v0, %v937_v43  ;;  %v3685_v6 = vpop.f32.mrf.mxu3  ;;  %v7085_v32 = vld [vmem:[%s12142_s5 + $0xec0] sm:$0xf0] }
 0x1d9   :  { %v9939_v48 = vadd.f32 1.0, %v7876_v40  ;;  %v9957_v56 = vpop.eup %7877  ;;  %v6440_v1 = vor.u32 %v7648_v39, %v6437_v44  ;;  %v7360_v39 = vld [vmem:[%s12142_s5 + $0x3c] sm:$0xf]  ;;  %v6187_v43 = vld [vmem:[%s12142_s5 + $0x740] sm:$0xf] }
 0x1da   :  { %3937 = vmatpush.bf16.msra.mxu3 %v6820_v52  ;;  %3963 = vmatpush.bf16.msrb.mxu1 %v6824_v53  ;;  %v7440_v52 = vld [vmem:[%s12142_s5 + $0x2b4] sm:$0xf0]  ;;  %v7424_v53 = vld [vmem:[%s12142_s5 + $0x23c] sm:$0xf]  ;;  %v4525_v54 = vsel %vm4524_vm6, %v9841_v60, %v4521_v41  ;;  %v7278_v63 = vmul.f32 -1.442695, %v3710_v18  ;;  %v3684_v17 = vadd.f32 %v9897_v24, %v3671_v4  ;;  %vm4568_vm8 = vweird.f32 %v9957_v56 }
 0x1db   :  { %v4530_v57 = vsel %vm4527_vm7, %v4529_v47, %v4525_v54  ;;  %7879 = vrcp.f32 %v9939_v48  ;;  %v9969_v60 = vld [vmem:[%s12142_s5 + $0x83c] sm:$0xf]  ;;  %v5540_v7 = vor.u32 %v7440_v52, %v5539_v45  ;;  %v5544_v8 = vor.u32 %v7424_v53, %v5541_v55  ;;  %vm10060_vm10 = vmor %vm4567_vm9, %vm4568_vm8  ;;  %v7601_v44 = vld [vmem:[%s12142_s5 + $0x7bc] sm:$0xf0] }
 0x1dc   :  { %3923 = vmatpush.bf16.msra.mxu2 %v5924_v61  ;;  %3949 = vmatpush.bf16.msrb.mxu0 %v5928_v62  ;;  %v9974_v61 = vld [vmem:[%s12142_s5 + $0x8b8] sm:$0xf0]  ;;  %4997 = vst [vmem:[%s12146_s7] sm:$0xff] %v4530_v57  ;;  %v4563_v62 = vmul.f32 %v9957_v56, %v9871_v10  ;;  %7881 = vpow2.f32 %v7278_v63  ;;  %v7277_v28 = vmul.f32 -1.442695, %v3684_v17  ;;  %v4574_v41 = vor.u32 1.1754944e-38, %v4573_v16 }
 0x1dd   :  { %v6312_v24 = vor.u32 %v9969_v60, %v9974_v61  ;;  %v5285_v40 = vld [vmem:[%s12142_s5 + $0xb8] sm:$0xf0]  ;;  %v7088_v52 = vor.u32 %v10031_v26, %v7085_v32  ;;  %v7585_v53 = vld [vmem:[%s12142_s5 + $0x744] sm:$0xf]  ;;  %v4556_v60 = vand.u32 2147483647, %v9939_v48  ;;  %v6188_v63 = vor.u32 %v7601_v44, %v6187_v43 }
 0x1de   :  { %3938 = vmatpush.bf16.msra.mxu3 %v6692_v12  ;;  %3964 = vmatpush.bf16.msrb.mxu1 %v6696_v13  ;;  %v4564_v12 = vsub.f32 1.0, %v4563_v62  ;;  %v3698_v13 = vpop.f32.mrf.mxu0  ;;  %7883 = vpow2.f32 %v7277_v28  ;;  %v6189_v54 = vld [vmem:[%s12142_s5 + $0x7c0] sm:$0xf0]  ;;  %v5288_v61 = vor.u32 %v7360_v39, %v5285_v40  ;;  %v7793_v62 = vld [vmem:[%s12142_s5 + $0xdbc] sm:$0xf0]  ;;  %vm4552_vm13 = vweird.f32 %v9939_v48 }
 0x1df   :  { %v6192_v0 = vor.u32 %v7585_v53, %v6189_v54  ;;  %v7569_v6 = vld [vmem:[%s12142_s5 + $0x6bc] sm:$0xf0]  ;;  %v6829_v15 = vld [vmem:[%s12142_s5 + $0xcc0] sm:$0xf0]  ;;  %vm4557_vm15 = vcmp.eq.f32.partialorder %v4556_v60, 8.507059e+37 }
 0x1e0   :  { %3924 = vmatpush.bf16.msra.mxu2 %v5796_v19  ;;  %3950 = vmatpush.bf16.msrb.mxu0 %v5800_v25  ;;  %v6308_v19 = vor.u32 %v9964_v59, %v9955_v51  ;;  %v4565_v22 = vmul.f32 %v9957_v56, %v4564_v12  ;;  %v10026_v25 = vld [vmem:[%s12142_s5 + $0xebc] sm:$0xf0]  ;;  %v4558_v51 = vand.u32 2147483648, %v9939_v48  ;;  %v5933_v26 = vld [vmem:[%s12142_s5 + $0x5c0] sm:$0xf0]  ;;  %v6832_v39 = vor.u32 %v7745_v14, %v6829_v15 }
 0x1e1   :  { %v10033_v27 = vpop.eup %7879  ;;  %v6827_v12 = vld [vmem:[%s12142_s5 + $0xc40] sm:$0xf]  ;;  %v7489_v40 = vld [vmem:[%s12142_s5 + $0x444] sm:$0xf] }
 0x1e2   :  { %3939 = vmatpush.bf16.msra.mxu3 %v6564_v35  ;;  %3965 = vmatpush.bf16.msrb.mxu1 %v6568_v36  ;;  %v4566_v35 = vadd.f32 %v9957_v56, %v4565_v22  ;;  %v4548_v36 = vmul.f32 %v10033_v27, %v9939_v48  ;;  %v7882_v45 = vpop.eup %7881  ;;  %vm4553_vm12 = vweird.f32 %v10033_v27  ;;  %v4559_v48 = vor.u32 1.1754944e-38, %v4558_v51  ;;  %v7761_v13 = vld [vmem:[%s12142_s5 + $0xcbc] sm:$0xf0]  ;;  %v7521_v22 = vld [vmem:[%s12142_s5 + $0x544] sm:$0xf] }
 0x1e3   :  { %v10083_v57 = vadd.f32 1.0, %v7882_v45  ;;  %vm10123_vm14 = vmor %vm4552_vm13, %vm4553_vm12  ;;  %v10164_v28 = vld [vmem:[%s12142_s5 + $0xbbc] sm:$0xf0]  ;;  %v5805_v10 = vld [vmem:[%s12142_s5 + $0x4c0] sm:$0xf0]  ;;  %v5936_v43 = vor.u32 %v7521_v22, %v5933_v26 }
 0x1e4   :  { %3925 = vmatpush.bf16.msra.mxu2 %v5668_v42  ;;  %3951 = vmatpush.bf16.msrb.mxu0 %v5672_v50  ;;  %v7084_v42 = vor.u32 %v10026_v25, %v10016_v21  ;;  %v4570_v47 = vsel %vm10060_vm10, %v9957_v56, %v4566_v35  ;;  %v4549_v18 = vsub.f32 1.0, %v4548_v36  ;;  %v3672_v50 = vpop.f32.mrf.mxu2  ;;  %v5284_v56 = vor.u32 %v7376_v38, %v10043_v34  ;;  %v7884_v49 = vpop.eup %7883  ;;  %v7537_v21 = vld [vmem:[%s12142_s5 + $0x5bc] sm:$0xf0]  ;;  %v10216_v45 = vld [vmem:[%s12142_s5 + $0xa44] sm:$0xf] }
 0x1e5   :  { %v4575_v55 = vsel %vm4572_vm11, %v4574_v41, %v4570_v47  ;;  %7885 = vrcp.f32 %v10083_v57  ;;  %v10142_v17 = vadd.f32 1.0, %v7884_v49  ;;  %v940_v34 = vperm.slane %v9588_v33, 7  ;;  %v10188_v35 = vld [vmem:[%s12142_s5 + $0x440] sm:$0xf]  ;;  %v10221_v47 = vld [vmem:[%s12142_s5 + $0xac0] sm:$0xf0] }
 0x1e6   :  { %3940 = vmatpush.bf16.msra.mxu3 %v6436_v58  ;;  %3966 = vmatpush.bf16.msrb.mxu1 %v6440_v1  ;;  %v6955_v58 = vld [vmem:[%s12142_s5 + $0xd40] sm:$0xf]  ;;  %5000 = vst [vmem:[%s12146_s7 + $0x18] sm:$0xff] %v4575_v55  ;;  %v4550_v59 = vmul.f32 %v10033_v27, %v4549_v18  ;;  %v7777_v1 = vld [vmem:[%s12142_s5 + $0xd44] sm:$0xf]  ;;  %v6828_v38 = vor.u32 %v7761_v13, %v6827_v12  ;;  %v4603_v54 = vand.u32 2147483648, %v10083_v57  ;;  %vm4597_vm1 = vweird.f32 %v10083_v57 }
 0x1e7   :  { %v6956_v11 = vor.u32 %v7793_v62, %v6955_v58  ;;  %7887 = vrcp.f32 %v10142_v17  ;;  %v10193_v36 = vld [vmem:[%s12142_s5 + $0x4bc] sm:$0xf0]  ;;  %v10243_v58 = vld [vmem:[%s12142_s5 + $0x344] sm:$0xf]  ;;  %v4601_v62 = vand.u32 2147483647, %v10083_v57  ;;  %vm4582_vm5 = vweird.f32 %v10142_v17 }
 0x1e8   :  { %3926 = vmatpush.bf16.msra.mxu2 %v5540_v7  ;;  %3952 = vmatpush.bf16.msrb.mxu0 %v5544_v8  ;;  %v4551_v4 = vadd.f32 %v10033_v27, %v4550_v59  ;;  %v7553_v7 = vld [vmem:[%s12142_s5 + $0x644] sm:$0xf]  ;;  %v10206_v41 = vld [vmem:[%s12142_s5 + $0xa40] sm:$0xf]  ;;  %v5804_v51 = vor.u32 %v10193_v36, %v10188_v35  ;;  %v939_v13 = vperm.slane %v9588_v33, 6  ;;  %v4588_v33 = vand.u32 2147483648, %v10142_v17 }
 0x1e9   :  { %v6061_v8 = vld [vmem:[%s12142_s5 + $0x6c0] sm:$0xf0]  ;;  %v10211_v44 = vld [vmem:[%s12142_s5 + $0xabc] sm:$0xf0]  ;;  %vm4602_vm3 = vcmp.eq.f32.partialorder %v4601_v62, 8.507059e+37 }
 0x1ea   :  { %3941 = vmatpush.bf16.msra.mxu3 %v6308_v19  ;;  %3967 = vmatpush.bf16.msrb.mxu1 %v6312_v24  ;;  %v4555_v16 = vsel %vm10123_vm14, %v10033_v27, %v4551_v4  ;;  %v6960_v19 = vor.u32 %v7777_v1, %v6957_v2  ;;  %v6060_v24 = vor.u32 %v7569_v6, %v6059_v3  ;;  %v10159_v27 = vld [vmem:[%s12142_s5 + $0xb40] sm:$0xf]  ;;  %v10248_v59 = vld [vmem:[%s12142_s5 + $0x3c0] sm:$0xf0]  ;;  %v4589_v36 = vor.u32 1.1754944e-38, %v4588_v33 }
 0x1eb   :  { %v4560_v23 = vsel %vm4557_vm15, %v4559_v48, %v4555_v16  ;;  %v6064_v25 = vor.u32 %v7553_v7, %v6061_v8  ;;  %v10180_v32 = vpop.eup %7885  ;;  %v6700_v50 = vor.u32 %v10164_v28, %v10159_v27  ;;  %v10233_v53 = vld [vmem:[%s12142_s5 + $0x3bc] sm:$0xf0]  ;;  %v6572_v1 = vor.u32 %v10211_v44, %v10206_v41  ;;  %v7649_v15 = vld [vmem:[%s12142_s5 + $0x944] sm:$0xf]  ;;  %v7219_v41 = vld [vmem:[%s12142_s5 + $0xf48] sm:$0xf] }
 0x1ec   :  { %3927 = vmatpush.bf16.msra.mxu2 %v5412_v31  ;;  %3953 = vmatpush.bf16.msrb.mxu0 %v5416_v37  ;;  %4999 = vst [vmem:[%s12146_s7 + $0x10] sm:$0xff] %v4560_v23  ;;  %v10178_v31 = vld [vmem:[%s12142_s5 + $0xbc0] sm:$0xf0]  ;;  %v4593_v37 = vmul.f32 %v10180_v32, %v10083_v57  ;;  %vm4598_vm0 = vweird.f32 %v10180_v32  ;;  %v6576_v4 = vor.u32 %v10216_v45, %v10221_v47  ;;  %v4604_v48 = vor.u32 1.1754944e-38, %v4603_v54  ;;  %v6443_v57 = vld [vmem:[%s12142_s5 + $0x940] sm:$0xf] }
 0x1ed   :  { %3942 = vmatmul.bf16.vlgmr.msra.gmra.mxu3 %v8731_v46  ;;  %3968 = vmatmul.bf16.vlgmr.msrb.gmra.mxu1 %v8731_v46  ;;  %v10250_v60 = vpop.eup %7887  ;;  %v5680_v49 = vor.u32 %v10243_v58, %v10248_v59  ;;  %vm10271_vm2 = vmor %vm4597_vm1, %vm4598_vm0  ;;  %v7665_v14 = vld [vmem:[%s12142_s5 + $0x9bc] sm:$0xf0]  ;;  %v7425_v27 = vld [vmem:[%s12142_s5 + $0x244] sm:$0xf] }
 0x1ee   :  { %3986 = vmatpush.bf16.msrb.mxu3 %v7212_v29  ;;  %4012 = vmatpush.bf16.msra.mxu1 %v7216_v30  ;;  %v3761_v29 = vpop.f32.mrf.mxu1  ;;  %v10173_v30 = vld [vmem:[%s12142_s5 + $0xb44] sm:$0xf]  ;;  %v4594_v18 = vsub.f32 1.0, %v4593_v37  ;;  %v4578_v2 = vmul.f32 %v10250_v60, %v10142_v17  ;;  %vm4583_vm4 = vweird.f32 %v10250_v60  ;;  %v6444_v37 = vor.u32 %v7665_v14, %v6443_v57  ;;  %v7842_v47 = vld [vmem:[%s12142_s5 + $0xf4c] sm:$0xf] }
 0x1ef   :  { %v6704_v55 = vor.u32 %v10173_v30, %v10178_v31  ;;  %v5549_v28 = vld [vmem:[%s12142_s5 + $0x2c0] sm:$0xf0]  ;;  %v6315_v31 = vld [vmem:[%s12142_s5 + $0x840] sm:$0xf]  ;;  %vm10326_vm6 = vmor %vm4582_vm5, %vm4583_vm4 }
 0x1f0   :  { %3928 = vmatpush.bf16.msra.mxu2 %v5284_v56  ;;  %3954 = vmatpush.bf16.msrb.mxu0 %v5288_v61  ;;  %v5808_v56 = vor.u32 %v7489_v40, %v5805_v10  ;;  %v4595_v61 = vmul.f32 %v10180_v32, %v4594_v18  ;;  %v6317_v35 = vld [vmem:[%s12142_s5 + $0x8c0] sm:$0xf0]  ;;  %v5552_v45 = vor.u32 %v7425_v27, %v5549_v28  ;;  %v7221_v18 = vld [vmem:[%s12142_s5 + $0xfc8] sm:$0xf0]  ;;  %v7091_v59 = vld [vmem:[%s12142_s5 + $0xe48] sm:$0xf] }
 0x1f1   :  { %v7393_v54 = vld [vmem:[%s12142_s5 + $0x144] sm:$0xf]  ;;  %v7224_v62 = vor.u32 %v7842_v47, %v7221_v18  ;;  %v7794_v33 = vld [vmem:[%s12142_s5 + $0xdc4] sm:$0xf0]  ;;  %v7554_v28 = vld [vmem:[%s12142_s5 + $0x64c] sm:$0xf] }
 0x1f2   :  { %3987 = vmatpush.bf16.msrb.mxu3 %v7084_v42  ;;  %4013 = vmatpush.bf16.msra.mxu1 %v7088_v52  ;;  %v5932_v42 = vor.u32 %v7537_v21, %v5931_v20  ;;  %v10228_v52 = vld [vmem:[%s12142_s5 + $0x340] sm:$0xf]  ;;  %v4596_v6 = vadd.f32 %v10180_v32, %v4595_v61  ;;  %v6445_v20 = vld [vmem:[%s12142_s5 + $0x9c0] sm:$0xf0]  ;;  %v7730_v47 = vld [vmem:[%s12142_s5 + $0xbc4] sm:$0xf0] }
 0x1f3   :  { %3929 = vmatmul.bf16.vlgmr.msra.gmra.mxu2 %v8771_v5  ;;  %3955 = vmatmul.bf16.vlgmr.msrb.gmra.mxu0 %v8771_v5  ;;  %v5676_v8 = vor.u32 %v10233_v53, %v10228_v52  ;;  %v5419_v52 = vld [vmem:[%s12142_s5 + $0x140] sm:$0xf]  ;;  %v5293_v9 = vld [vmem:[%s12142_s5 + $0xc0] sm:$0xf0] }
 0x1f4   :  { %3973 = vmatpush.bf16.msrb.mxu2 %v6188_v63  ;;  %3999 = vmatpush.bf16.msra.mxu0 %v6192_v0  ;;  %v10255_v63 = vpop.f32.mrf.mxu3  ;;  %v3748_v0 = vpop.f32.mrf.mxu0  ;;  %v4600_v16 = vsel %vm10271_vm2, %v10180_v32, %v4596_v6  ;;  %v7633_v32 = vld [vmem:[%s12142_s5 + $0x8bc] sm:$0xf0] }
 0x1f5   :  { %v3749_v3 = vadd.f32 %v3748_v0, %v940_v34  ;;  %v4605_v21 = vsel %vm4602_vm3, %v4604_v48, %v4600_v16  ;;  %v7617_v34 = vld [vmem:[%s12142_s5 + $0x844] sm:$0xf]  ;;  %v7409_v53 = vld [vmem:[%s12142_s5 + $0x1bc] sm:$0xf0]  ;;  %v7810_v0 = vld [vmem:[%s12142_s5 + $0xe4c] sm:$0xf] }
 0x1f6   :  { %3988 = vmatpush.bf16.msrb.mxu3 %v6956_v11  ;;  %4014 = vmatpush.bf16.msra.mxu1 %v6960_v19  ;;  %v3763_v7 = vpop.f32.mrf.mxu1  ;;  %v4579_v11 = vsub.f32 1.0, %v4578_v2  ;;  %v4586_v19 = vand.u32 2147483647, %v10142_v17  ;;  %5002 = vst [vmem:[%s12146_s7 + $0x28] sm:$0xff] %v4605_v21  ;;  %v3722_v26 = vpop.f32.mrf.mxu2  ;;  %v6320_v58 = vor.u32 %v7617_v34, %v6317_v35  ;;  %v6195_v48 = vld [vmem:[%s12142_s5 + $0x748] sm:$0xf] }
 0x1f7   :  { %v3762_v12 = vadd.f32 %v3761_v29, %v3749_v3  ;;  %v3723_v30 = vadd.f32 %v3722_v26, %v939_v13  ;;  %v5420_v3 = vor.u32 %v7409_v53, %v5419_v52  ;;  %v5291_v7 = vld [vmem:[%s12142_s5 + $0x40] sm:$0xf]  ;;  %v6197_v13 = vld [vmem:[%s12142_s5 + $0x7c8] sm:$0xf0]  ;;  %v7570_v26 = vld [vmem:[%s12142_s5 + $0x6c4] sm:$0xf0] }
 0x1f8   :  { %3974 = vmatpush.bf16.msrb.mxu2 %v6060_v24  ;;  %4000 = vmatpush.bf16.msra.mxu0 %v6064_v25  ;;  %v4580_v22 = vmul.f32 %v10250_v60, %v4579_v11  ;;  %v5547_v24 = vld [vmem:[%s12142_s5 + $0x240] sm:$0xf]  ;;  %vm4587_vm7 = vcmp.eq.f32.partialorder %v4586_v19, 8.507059e+37  ;;  %v7602_v11 = vld [vmem:[%s12142_s5 + $0x7c4] sm:$0xf0] }
 0x1f9   :  { %v7280_v23 = vmul.f32 -1.442695, %v3762_v12  ;;  %v7441_v25 = vld [vmem:[%s12142_s5 + $0x2bc] sm:$0xf0]  ;;  %v3736_v44 = vadd.f32 %v10255_v63, %v3723_v30  ;;  %v7826_v63 = vld [vmem:[%s12142_s5 + $0xec4] sm:$0xf0] }
 0x1fa   :  { %3989 = vmatpush.bf16.msrb.mxu3 %v6828_v38  ;;  %4015 = vmatpush.bf16.msra.mxu1 %v6832_v39  ;;  %v4581_v29 = vadd.f32 %v10250_v60, %v4580_v22  ;;  %v6448_v38 = vor.u32 %v7649_v15, %v6445_v20  ;;  %v5548_v10 = vor.u32 %v7441_v25, %v5547_v24  ;;  %v7586_v12 = vld [vmem:[%s12142_s5 + $0x74c] sm:$0xf]  ;;  %v6963_v19 = vld [vmem:[%s12142_s5 + $0xd48] sm:$0xf] }
 0x1fb   :  { %7889 = vpow2.f32 %v7280_v23  ;;  %v7092_v57 = vor.u32 %v7826_v63, %v7091_v59  ;;  %v7778_v20 = vld [vmem:[%s12142_s5 + $0xd4c] sm:$0xf]  ;;  %v6196_v22 = vor.u32 %v7602_v11, %v6195_v48  ;;  %v6200_v23 = vor.u32 %v7586_v12, %v6197_v13  ;;  %v6067_v25 = vld [vmem:[%s12142_s5 + $0x648] sm:$0xf] }
 0x1fc   :  { %3975 = vmatpush.bf16.msrb.mxu2 %v5932_v42  ;;  %4001 = vmatpush.bf16.msra.mxu0 %v5936_v43  ;;  %v3737_v39 = vpop.f32.mrf.mxu3  ;;  %v3750_v40 = vpop.f32.mrf.mxu0  ;;  %v7858_v42 = vld [vmem:[%s12142_s5 + $0xfc4] sm:$0xf0]  ;;  %v4585_v43 = vsel %vm10326_vm6, %v10250_v60, %v4581_v29  ;;  %v6965_v24 = vld [vmem:[%s12142_s5 + $0xdc8] sm:$0xf0]  ;;  %v6964_v34 = vor.u32 %v7794_v33, %v6963_v19 }
 0x1fd   :  { %v7220_v61 = vor.u32 %v7858_v42, %v7219_v41  ;;  %v6069_v29 = vld [vmem:[%s12142_s5 + $0x6c8] sm:$0xf0]  ;;  %v6835_v30 = vld [vmem:[%s12142_s5 + $0xc48] sm:$0xf]  ;;  %v6968_v35 = vor.u32 %v7778_v20, %v6965_v24  ;;  %v6068_v39 = vor.u32 %v7570_v26, %v6067_v25 }
 0x1fe   :  { %3990 = vmatpush.bf16.msrb.mxu3 %v6700_v50  ;;  %4016 = vmatpush.bf16.msra.mxu1 %v6704_v55  ;;  %v4590_v50 = vsel %vm4587_vm7, %v4589_v36, %v4585_v43  ;;  %v7279_v55 = vmul.f32 -1.442695, %v3736_v44  ;;  %v3724_v6 = vpop.f32.mrf.mxu2  ;;  %v7746_v17 = vld [vmem:[%s12142_s5 + $0xc4c] sm:$0xf]  ;;  %v6072_v40 = vor.u32 %v7554_v28, %v6069_v29  ;;  %v7506_v59 = vld [vmem:[%s12142_s5 + $0x4c4] sm:$0xf0] }
 0x1ff   :  { %5001 = vst [vmem:[%s12146_s7 + $0x20] sm:$0xff] %v4590_v50  ;;  %v6837_v36 = vld [vmem:[%s12142_s5 + $0xcc8] sm:$0xf0]  ;;  %v5683_v33 = vld [vmem:[%s12142_s5 + $0x348] sm:$0xf] }
 0x200   :  { %3976 = vmatpush.bf16.msrb.mxu2 %v5804_v51  ;;  %4002 = vmatpush.bf16.msra.mxu0 %v5808_v56  ;;  %v5421_v51 = vld [vmem:[%s12142_s5 + $0x1c0] sm:$0xf0]  ;;  %v6316_v56 = vor.u32 %v7633_v32, %v6315_v31  ;;  %7891 = vpow2.f32 %v7279_v55  ;;  %v7762_v31 = vld [vmem:[%s12142_s5 + $0xcc4] sm:$0xf0]  ;;  %v7522_v41 = vld [vmem:[%s12142_s5 + $0x54c] sm:$0xf]  ;;  %v6840_v55 = vor.u32 %v7746_v17, %v6837_v36 }
 0x201   :  { %v7890_v60 = vpop.eup %7889  ;;  %v10457_v42 = vld [vmem:[%s12145_s6 + $0x8] sm:$0xff]  ;;  %v6836_v50 = vor.u32 %v7762_v31, %v6835_v30 }
 0x202   :  { %3991 = vmatpush.bf16.msrb.mxu3 %v6572_v1  ;;  %4017 = vmatpush.bf16.msra.mxu1 %v6576_v4  ;;  %v7093_v1 = vld [vmem:[%s12142_s5 + $0xec8] sm:$0xf0]  ;;  %v10373_v2 = vadd.f32 1.0, %v7890_v60  ;;  %v5424_v4 = vor.u32 %v7393_v54, %v5421_v51  ;;  %v7474_v20 = vld [vmem:[%s12142_s5 + $0x3c4] sm:$0xf0]  ;;  %v941_v26 = vperm.slane %v10457_v42, 0 }
 0x203   :  { %v7096_v14 = vor.u32 %v7810_v0, %v7093_v1  ;;  %v5941_v44 = vld [vmem:[%s12142_s5 + $0x5c8] sm:$0xf0]  ;;  %v6451_v31 = vld [vmem:[%s12142_s5 + $0x948] sm:$0xf] }
 0x204   :  { %3977 = vmatpush.bf16.msrb.mxu2 %v5676_v8  ;;  %4003 = vmatpush.bf16.msra.mxu0 %v5680_v49  ;;  %v7377_v8 = vld [vmem:[%s12142_s5 + $0xbc] sm:$0xf0]  ;;  %v7361_v49 = vld [vmem:[%s12142_s5 + $0x44] sm:$0xf]  ;;  %7893 = vrcp.f32 %v10373_v2  ;;  %v7714_v52 = vld [vmem:[%s12142_s5 + $0xb4c] sm:$0xf]  ;;  %vm4627_vm9 = vweird.f32 %v10373_v2 }
 0x205   :  { %v5292_v15 = vor.u32 %v7377_v8, %v5291_v7  ;;  %v5296_v16 = vor.u32 %v7361_v49, %v5293_v9  ;;  %v6709_v53 = vld [vmem:[%s12142_s5 + $0xbc8] sm:$0xf0]  ;;  %v4633_v54 = vand.u32 2147483648, %v10373_v2  ;;  %v6579_v7 = vld [vmem:[%s12142_s5 + $0xa48] sm:$0xf] }
 0x206   :  { %3992 = vmatpush.bf16.msrb.mxu3 %v6444_v37  ;;  %4018 = vmatpush.bf16.msra.mxu1 %v6448_v38  ;;  %v7892_v21 = vpop.eup %7891  ;;  %v5939_v37 = vld [vmem:[%s12142_s5 + $0x548] sm:$0xf]  ;;  %v7490_v63 = vld [vmem:[%s12142_s5 + $0x44c] sm:$0xf] }
 0x207   :  { %v10420_v27 = vadd.f32 1.0, %v7892_v21  ;;  %v5813_v0 = vld [vmem:[%s12142_s5 + $0x4c8] sm:$0xf0]  ;;  %v7698_v8 = vld [vmem:[%s12142_s5 + $0xac4] sm:$0xf0]  ;;  %v4634_v9 = vor.u32 1.1754944e-38, %v4633_v54 }
 0x208   :  { %3978 = vmatpush.bf16.msrb.mxu2 %v5548_v10  ;;  %4004 = vmatpush.bf16.msra.mxu0 %v5552_v45  ;;  %v7538_v10 = vld [vmem:[%s12142_s5 + $0x5c4] sm:$0xf0]  ;;  %v5816_v13 = vor.u32 %v7490_v63, %v5813_v0  ;;  %v7458_v24 = vld [vmem:[%s12142_s5 + $0x34c] sm:$0xf]  ;;  %v7859_v0 = vld [vmem:[%s12142_s5 + $0xfcc] sm:$0xf0] }
 0x209   :  { %7895 = vrcp.f32 %v10420_v27  ;;  %v6707_v45 = vld [vmem:[%s12142_s5 + $0xb48] sm:$0xf]  ;;  %v5940_v51 = vor.u32 %v7538_v10, %v5939_v37  ;;  %v5685_v25 = vld [vmem:[%s12142_s5 + $0x3c8] sm:$0xf0]  ;;  %v4616_v29 = vand.u32 2147483647, %v10420_v27  ;;  %vm4612_vm13 = vweird.f32 %v10420_v27 }
 0x20a   :  { %3993 = vmatpush.bf16.msrb.mxu3 %v6316_v56  ;;  %4019 = vmatpush.bf16.msra.mxu1 %v6320_v58  ;;  %v10434_v32 = vpop.eup %7893  ;;  %v3813_v43 = vpop.f32.mrf.mxu1  ;;  %v942_v56 = vperm.slane %v10457_v42, 1  ;;  %v5811_v58 = vld [vmem:[%s12142_s5 + $0x448] sm:$0xf]  ;;  %v6708_v6 = vor.u32 %v7730_v47, %v6707_v45  ;;  %v7650_v36 = vld [vmem:[%s12142_s5 + $0x94c] sm:$0xf] }
 0x20b   :  { %v4623_v38 = vmul.f32 %v10434_v32, %v10373_v2  ;;  %vm4628_vm8 = vweird.f32 %v10434_v32  ;;  %v5812_v12 = vor.u32 %v7506_v59, %v5811_v58  ;;  %v7666_v17 = vld [vmem:[%s12142_s5 + $0x9c4] sm:$0xf0]  ;;  %v6453_v37 = vld [vmem:[%s12142_s5 + $0x9c8] sm:$0xf0]  ;;  %vm4617_vm15 = vcmp.eq.f32.partialorder %v4616_v29, 8.507059e+37 }
 0x20c   :  { %3979 = vmatpush.bf16.msrb.mxu2 %v5420_v3  ;;  %4005 = vmatpush.bf16.msra.mxu0 %v5424_v4  ;;  %vm10505_vm10 = vmor %vm4627_vm9, %vm4628_vm8  ;;  %v5555_v10 = vld [vmem:[%s12142_s5 + $0x248] sm:$0xf]  ;;  %v5557_v45 = vld [vmem:[%s12142_s5 + $0x2c8] sm:$0xf0]  ;;  %v6452_v54 = vor.u32 %v7666_v17, %v6451_v31 }
 0x20d   :  { %3994 = vmatmul.bf16.vlgmr.msrb.gmra.mxu3 %v8731_v46  ;;  %4020 = vmatmul.bf16.vlgmr.msra.gmra.mxu1 %v8731_v46  ;;  %v4624_v18 = vsub.f32 1.0, %v4623_v38  ;;  %v7618_v58 = vld [vmem:[%s12142_s5 + $0x84c] sm:$0xf]  ;;  %v6205_v29 = vld [vmem:[%s12142_s5 + $0x7d0] sm:$0xf0] }
 0x20e   :  { %4038 = vmatpush.bf16.msra.mxu3 %v7220_v61  ;;  %4064 = vmatpush.bf16.msrb.mxu1 %v7224_v62  ;;  %v4631_v61 = vand.u32 2147483647, %v10373_v2  ;;  %v5944_v62 = vor.u32 %v7522_v41, %v5941_v44  ;;  %v6712_v2 = vor.u32 %v7714_v52, %v6709_v53  ;;  %v7442_v41 = vld [vmem:[%s12142_s5 + $0x2c4] sm:$0xf0]  ;;  %v6325_v59 = vld [vmem:[%s12142_s5 + $0x8c8] sm:$0xf0] }
 0x20f   :  { %v4625_v60 = vmul.f32 %v10434_v32, %v4624_v18  ;;  %v10493_v1 = vpop.eup %7895  ;;  %v7634_v52 = vld [vmem:[%s12142_s5 + $0x8c4] sm:$0xf0]  ;;  %v5429_v49 = vld [vmem:[%s12142_s5 + $0x1c8] sm:$0xf0]  ;;  %v7795_v17 = vld [vmem:[%s12142_s5 + $0xdcc] sm:$0xf0] }
 0x210   :  { %3980 = vmatpush.bf16.msrb.mxu2 %v5292_v15  ;;  %4006 = vmatpush.bf16.msra.mxu0 %v5296_v16  ;;  %v4608_v4 = vmul.f32 %v10493_v1, %v10420_v27  ;;  %v10509_v48 = vpop.f32.mrf.mxu3  ;;  %v3800_v11 = vpop.f32.mrf.mxu0  ;;  %vm4632_vm11 = vcmp.eq.f32.partialorder %v4631_v61, 8.507059e+37  ;;  %vm4613_vm12 = vweird.f32 %v10493_v1 }
 0x211   :  { %v4626_v3 = vadd.f32 %v10434_v32, %v4625_v60  ;;  %v3801_v19 = vadd.f32 %v3800_v11, %v942_v56  ;;  %vm4614_vm14 = vmor %vm4612_vm13, %vm4613_vm12  ;;  %v7227_v60 = vld [vmem:[%s12142_s5 + $0xf50] sm:$0xf] }
 0x212   :  { %4039 = vmatpush.bf16.msra.mxu3 %v7092_v57  ;;  %4065 = vmatpush.bf16.msrb.mxu1 %v7096_v14  ;;  %v7682_v57 = vld [vmem:[%s12142_s5 + $0xa4c] sm:$0xf]  ;;  %v4609_v16 = vsub.f32 1.0, %v4608_v4  ;;  %v5427_v4 = vld [vmem:[%s12142_s5 + $0x148] sm:$0xf] }
 0x213   :  { %3981 = vmatmul.bf16.vlgmr.msrb.gmra.mxu2 %v8771_v5  ;;  %4007 = vmatmul.bf16.vlgmr.msra.gmra.mxu0 %v8771_v5  ;;  %v6581_v14 = vld [vmem:[%s12142_s5 + $0xac8] sm:$0xf0]  ;;  %v4630_v15 = vsel %vm10505_vm10, %v10434_v32, %v4626_v3  ;;  %v3814_v30 = vadd.f32 %v3813_v43, %v3801_v19  ;;  %v6580_v32 = vor.u32 %v7698_v8, %v6579_v7  ;;  %v7229_v3 = vld [vmem:[%s12142_s5 + $0xfd0] sm:$0xf0] }
 0x214   :  { %4025 = vmatpush.bf16.msra.mxu2 %v6196_v22  ;;  %4051 = vmatpush.bf16.msrb.mxu0 %v6200_v23  ;;  %v4635_v21 = vsel %vm4632_vm11, %v4634_v9, %v4630_v15  ;;  %v4618_v22 = vand.u32 2147483648, %v10420_v27  ;;  %v3815_v23 = vpop.f32.mrf.mxu1  ;;  %v4610_v28 = vmul.f32 %v10493_v1, %v4609_v16  ;;  %v7426_v27 = vld [vmem:[%s12142_s5 + $0x24c] sm:$0xf]  ;;  %v7101_v15 = vld [vmem:[%s12142_s5 + $0xed0] sm:$0xf0] }
 0x215   :  { %5004 = vst [vmem:[%s12146_s7 + $0x38] sm:$0xff] %v4635_v21  ;;  %v5560_v63 = vor.u32 %v7426_v27, %v5557_v45  ;;  %v7394_v8 = vld [vmem:[%s12142_s5 + $0x14c] sm:$0xf]  ;;  %v5299_v21 = vld [vmem:[%s12142_s5 + $0x48] sm:$0xf] }
 0x216   :  { %4040 = vmatpush.bf16.msra.mxu3 %v6964_v34  ;;  %4066 = vmatpush.bf16.msrb.mxu1 %v6968_v35  ;;  %v6584_v34 = vor.u32 %v7682_v57, %v6581_v14  ;;  %v5684_v35 = vor.u32 %v7474_v20, %v5683_v33  ;;  %v4611_v38 = vadd.f32 %v10493_v1, %v4610_v28  ;;  %v4619_v43 = vor.u32 1.1754944e-38, %v4618_v22  ;;  %v3774_v44 = vpop.f32.mrf.mxu2  ;;  %v7827_v57 = vld [vmem:[%s12142_s5 + $0xecc] sm:$0xf0]  ;;  %v7811_v14 = vld [vmem:[%s12142_s5 + $0xe54] sm:$0xf] }
 0x217   :  { %v3775_v18 = vadd.f32 %v3774_v44, %v941_v26  ;;  %v5432_v33 = vor.u32 %v7394_v8, %v5429_v49  ;;  %v7378_v22 = vld [vmem:[%s12142_s5 + $0xc4] sm:$0xf0]  ;;  %v7362_v23 = vld [vmem:[%s12142_s5 + $0x4c] sm:$0xf]  ;;  %v7603_v26 = vld [vmem:[%s12142_s5 + $0x7cc] sm:$0xf0]  ;;  %v7104_v31 = vor.u32 %v7811_v14, %v7101_v15 }
 0x218   :  { %4026 = vmatpush.bf16.msra.mxu2 %v6068_v39  ;;  %4052 = vmatpush.bf16.msrb.mxu0 %v6072_v40  ;;  %v7282_v39 = vmul.f32 -1.442695, %v3814_v30  ;;  %v5688_v40 = vor.u32 %v7458_v24, %v5685_v25  ;;  %v4615_v47 = vsel %vm4614_vm14, %v10493_v1, %v4611_v38  ;;  %v3802_v56 = vpop.f32.mrf.mxu0  ;;  %v7843_v1 = vld [vmem:[%s12142_s5 + $0xf54] sm:$0xf]  ;;  %v5301_v24 = vld [vmem:[%s12142_s5 + $0xc8] sm:$0xf0] }
 0x219   :  { %v4620_v53 = vsel %vm4617_vm15, %v4619_v43, %v4615_v47  ;;  %v3788_v61 = vadd.f32 %v10509_v48, %v3775_v18  ;;  %v7099_v48 = vld [vmem:[%s12142_s5 + $0xe50] sm:$0xf]  ;;  %v7587_v28 = vld [vmem:[%s12142_s5 + $0x754] sm:$0xf] }
 0x21a   :  { %4041 = vmatpush.bf16.msra.mxu3 %v6836_v50  ;;  %4067 = vmatpush.bf16.msrb.mxu1 %v6840_v55  ;;  %7897 = vpow2.f32 %v7282_v39  ;;  %v6323_v50 = vld [vmem:[%s12142_s5 + $0x848] sm:$0xf]  ;;  %v6456_v55 = vor.u32 %v7650_v36, %v6453_v37  ;;  %5003 = vst [vmem:[%s12146_s7 + $0x30] sm:$0xff] %v4620_v53  ;;  %v6203_v25 = vld [vmem:[%s12142_s5 + $0x750] sm:$0xf]  ;;  %v7100_v30 = vor.u32 %v7827_v57, %v7099_v48 }
 0x21b   :  { %v7281_v7 = vmul.f32 -1.442695, %v3788_v61  ;;  %v6324_v9 = vor.u32 %v7634_v52, %v6323_v50  ;;  %v7779_v36 = vld [vmem:[%s12142_s5 + $0xd54] sm:$0xf]  ;;  %v6204_v38 = vor.u32 %v7603_v26, %v6203_v25  ;;  %v6208_v39 = vor.u32 %v7587_v28, %v6205_v29  ;;  %v6843_v45 = vld [vmem:[%s12142_s5 + $0xc50] sm:$0xf] }
 0x21c   :  { %4027 = vmatpush.bf16.msra.mxu2 %v5940_v51  ;;  %4053 = vmatpush.bf16.msrb.mxu0 %v5944_v62  ;;  %v3789_v51 = vpop.f32.mrf.mxu3  ;;  %v5556_v62 = vor.u32 %v7442_v41, %v5555_v10  ;;  %v6075_v10 = vld [vmem:[%s12142_s5 + $0x650] sm:$0xf]  ;;  %v7555_v44 = vld [vmem:[%s12142_s5 + $0x654] sm:$0xf] }
 0x21d   :  { %7899 = vpow2.f32 %v7281_v7  ;;  %v7571_v41 = vld [vmem:[%s12142_s5 + $0x6cc] sm:$0xf0]  ;;  %v6077_v27 = vld [vmem:[%s12142_s5 + $0x6d0] sm:$0xf0] }
 0x21e   :  { %4042 = vmatpush.bf16.msra.mxu3 %v6708_v6  ;;  %4068 = vmatpush.bf16.msrb.mxu1 %v6712_v2  ;;  %v7410_v6 = vld [vmem:[%s12142_s5 + $0x1c4] sm:$0xf0]  ;;  %v6328_v2 = vor.u32 %v7618_v58, %v6325_v59  ;;  %v3776_v20 = vpop.f32.mrf.mxu2  ;;  %v7763_v52 = vld [vmem:[%s12142_s5 + $0xccc] sm:$0xf0]  ;;  %v7747_v53 = vld [vmem:[%s12142_s5 + $0xc54] sm:$0xf]  ;;  %v6076_v51 = vor.u32 %v7571_v41, %v6075_v10  ;;  %v6080_v56 = vor.u32 %v7555_v44, %v6077_v27 }
 0x21f   :  { %v5428_v19 = vor.u32 %v7410_v6, %v5427_v4  ;;  %v5947_v58 = vld [vmem:[%s12142_s5 + $0x550] sm:$0xf]  ;;  %v7715_v4 = vld [vmem:[%s12142_s5 + $0xb54] sm:$0xf]  ;;  %v943_v41 = vperm.slane %v10457_v42, 2 }
 0x220   :  { %4028 = vmatpush.bf16.msra.mxu2 %v5812_v12  ;;  %4054 = vmatpush.bf16.msrb.mxu0 %v5816_v13  ;;  %v7898_v11 = vpop.eup %7897  ;;  %v7228_v12 = vor.u32 %v7859_v0, %v7227_v60  ;;  %v7232_v13 = vor.u32 %v7843_v1, %v7229_v3  ;;  %v7539_v59 = vld [vmem:[%s12142_s5 + $0x5cc] sm:$0xf0]  ;;  %v7523_v60 = vld [vmem:[%s12142_s5 + $0x554] sm:$0xf]  ;;  %v6844_v3 = vor.u32 %v7763_v52, %v6843_v45 }
 0x221   :  { %v10621_v16 = vadd.f32 1.0, %v7898_v11  ;;  %v7731_v0 = vld [vmem:[%s12142_s5 + $0xbcc] sm:$0xf0]  ;;  %v6717_v6 = vld [vmem:[%s12142_s5 + $0xbd0] sm:$0xf0]  ;;  %v5948_v49 = vor.u32 %v7539_v59, %v5947_v58 }
 0x222   :  { %4043 = vmatpush.bf16.msra.mxu3 %v6580_v32  ;;  %4069 = vmatpush.bf16.msrb.mxu1 %v6584_v34  ;;  %v5300_v32 = vor.u32 %v7378_v22, %v5299_v21  ;;  %v5304_v34 = vor.u32 %v7362_v23, %v5301_v24  ;;  %v7507_v48 = vld [vmem:[%s12142_s5 + $0x4cc] sm:$0xf0]  ;;  %v7491_v57 = vld [vmem:[%s12142_s5 + $0x454] sm:$0xf] }
 0x223   :  { %7901 = vrcp.f32 %v10621_v16  ;;  %v7900_v37 = vpop.eup %7899  ;;  %v4663_v7 = vand.u32 2147483648, %v10621_v16  ;;  %v5821_v14 = vld [vmem:[%s12142_s5 + $0x4d0] sm:$0xf0]  ;;  %vm4657_vm1 = vweird.f32 %v10621_v16  ;;  %v6587_v21 = vld [vmem:[%s12142_s5 + $0xa50] sm:$0xf] }
 0x224   :  { %4029 = vmatpush.bf16.msra.mxu2 %v5684_v35  ;;  %4055 = vmatpush.bf16.msrb.mxu0 %v5688_v40  ;;  %v6971_v35 = vld [vmem:[%s12142_s5 + $0xd50] sm:$0xf]  ;;  %v6973_v40 = vld [vmem:[%s12142_s5 + $0xdd0] sm:$0xf0]  ;;  %v10668_v43 = vadd.f32 1.0, %v7900_v37  ;;  %v5824_v29 = vor.u32 %v7491_v57, %v5821_v14 }
 0x225   :  { %v6972_v18 = vor.u32 %v7795_v17, %v6971_v35  ;;  %v6976_v50 = vor.u32 %v7779_v36, %v6973_v40  ;;  %v7699_v22 = vld [vmem:[%s12142_s5 + $0xacc] sm:$0xf0]  ;;  %v4664_v24 = vor.u32 1.1754944e-38, %v4663_v7  ;;  %v7459_v40 = vld [vmem:[%s12142_s5 + $0x354] sm:$0xf] }
 0x226   :  { %4044 = vmatpush.bf16.msra.mxu3 %v6452_v54  ;;  %4070 = vmatpush.bf16.msrb.mxu1 %v6456_v55  ;;  %7903 = vrcp.f32 %v10668_v43  ;;  %v6845_v54 = vld [vmem:[%s12142_s5 + $0xcd0] sm:$0xf0]  ;;  %v5691_v17 = vld [vmem:[%s12142_s5 + $0x350] sm:$0xf]  ;;  %v4646_v27 = vand.u32 2147483647, %v10668_v43  ;;  %vm4642_vm5 = vweird.f32 %v10668_v43 }
 0x227   :  { %v6848_v8 = vor.u32 %v7747_v53, %v6845_v54  ;;  %v7475_v36 = vld [vmem:[%s12142_s5 + $0x3cc] sm:$0xf0]  ;;  %v5693_v10 = vld [vmem:[%s12142_s5 + $0x3d0] sm:$0xf0]  ;;  %v7860_v14 = vld [vmem:[%s12142_s5 + $0xfd4] sm:$0xf0] }
 0x228   :  { %4030 = vmatpush.bf16.msra.mxu2 %v5556_v62  ;;  %4056 = vmatpush.bf16.msrb.mxu0 %v5560_v63  ;;  %v5949_v62 = vld [vmem:[%s12142_s5 + $0x5d0] sm:$0xf0]  ;;  %v6715_v63 = vld [vmem:[%s12142_s5 + $0xb50] sm:$0xf]  ;;  %v5692_v52 = vor.u32 %v7475_v36, %v5691_v17  ;;  %v5696_v58 = vor.u32 %v7459_v40, %v5693_v10  ;;  %vm4647_vm7 = vcmp.eq.f32.partialorder %v4646_v27, 8.507059e+37 }
 0x229   :  { %v10679_v47 = vpop.eup %7901  ;;  %v6716_v20 = vor.u32 %v7731_v0, %v6715_v63  ;;  %v7667_v53 = vld [vmem:[%s12142_s5 + $0x9cc] sm:$0xf0]  ;;  %v7651_v54 = vld [vmem:[%s12142_s5 + $0x954] sm:$0xf]  ;;  %v6211_v10 = vld [vmem:[%s12142_s5 + $0x758] sm:$0xf] }
 0x22a   :  { %4045 = vmatpush.bf16.msra.mxu3 %v6324_v9  ;;  %4071 = vmatpush.bf16.msrb.mxu1 %v6328_v2  ;;  %v4653_v55 = vmul.f32 %v10679_v47, %v10621_v16  ;;  %v3865_v61 = vpop.f32.mrf.mxu1  ;;  %v944_v9 = vperm.slane %v10457_v42, 3  ;;  %v5819_v2 = vld [vmem:[%s12142_s5 + $0x450] sm:$0xf]  ;;  %vm4658_vm0 = vweird.f32 %v10679_v47  ;;  %v5565_v63 = vld [vmem:[%s12142_s5 + $0x2d0] sm:$0xf0] }
 0x22b   :  { %vm10748_vm2 = vmor %vm4657_vm1, %vm4658_vm0  ;;  %v5820_v28 = vor.u32 %v7507_v48, %v5819_v2  ;;  %v5563_v59 = vld [vmem:[%s12142_s5 + $0x250] sm:$0xf]  ;;  %v7619_v2 = vld [vmem:[%s12142_s5 + $0x854] sm:$0xf] }
 0x22c   :  { %4031 = vmatpush.bf16.msra.mxu2 %v5428_v19  ;;  %4057 = vmatpush.bf16.msrb.mxu0 %v5432_v33  ;;  %v4654_v1 = vsub.f32 1.0, %v4653_v55  ;;  %v10736_v15 = vpop.eup %7903  ;;  %v6461_v55 = vld [vmem:[%s12142_s5 + $0x9d0] sm:$0xf0]  ;;  %v6213_v27 = vld [vmem:[%s12142_s5 + $0x7d8] sm:$0xf0] }
 0x22d   :  { %4046 = vmatmul.bf16.vlgmr.msra.gmra.mxu3 %v8731_v46  ;;  %4072 = vmatmul.bf16.vlgmr.msrb.gmra.mxu1 %v8731_v46  ;;  %v4638_v33 = vmul.f32 %v10736_v15, %v10668_v43  ;;  %vm4643_vm4 = vweird.f32 %v10736_v15  ;;  %v6333_v48 = vld [vmem:[%s12142_s5 + $0x8d0] sm:$0xf0] }
 0x22e   :  { %4090 = vmatpush.bf16.msrb.mxu3 %v7228_v12  ;;  %4116 = vmatpush.bf16.msra.mxu1 %v7232_v13  ;;  %v4655_v11 = vmul.f32 %v10679_v47, %v4654_v1  ;;  %v4661_v12 = vand.u32 2147483647, %v10621_v16  ;;  %v5952_v13 = vor.u32 %v7523_v60, %v5949_v62  ;;  %v6720_v16 = vor.u32 %v7715_v4, %v6717_v6  ;;  %v7443_v60 = vld [vmem:[%s12142_s5 + $0x2cc] sm:$0xf0]  ;;  %vm4644_vm6 = vmor %vm4642_vm5, %vm4643_vm4  ;;  %v5437_v23 = vld [vmem:[%s12142_s5 + $0x1d0] sm:$0xf0] }
 0x22f   :  { %v7635_v4 = vld [vmem:[%s12142_s5 + $0x8cc] sm:$0xf0]  ;;  %v5309_v40 = vld [vmem:[%s12142_s5 + $0xd0] sm:$0xf0] }
 0x230   :  { %4032 = vmatpush.bf16.msra.mxu2 %v5300_v32  ;;  %4058 = vmatpush.bf16.msrb.mxu0 %v5304_v34  ;;  %v4656_v19 = vadd.f32 %v10679_v47, %v4655_v11  ;;  %v10752_v25 = vpop.f32.mrf.mxu3  ;;  %v3852_v26 = vpop.f32.mrf.mxu0  ;;  %vm4662_vm3 = vcmp.eq.f32.partialorder %v4661_v12, 8.507059e+37  ;;  %v4639_v34 = vsub.f32 1.0, %v4638_v33  ;;  %v7235_v11 = vld [vmem:[%s12142_s5 + $0xf58] sm:$0xf]  ;;  %v5435_v33 = vld [vmem:[%s12142_s5 + $0x150] sm:$0xf] }
 0x231   :  { %v3853_v35 = vadd.f32 %v3852_v26, %v944_v9 }
 0x232   :  { %4091 = vmatpush.bf16.msrb.mxu3 %v7100_v30  ;;  %4117 = vmatpush.bf16.msra.mxu1 %v7104_v31  ;;  %v7683_v30 = vld [vmem:[%s12142_s5 + $0xa54] sm:$0xf]  ;;  %v4660_v32 = vsel %vm10748_vm2, %v10679_v47, %v4656_v19  ;;  %v4640_v44 = vmul.f32 %v10736_v15, %v4639_v34  ;;  %v6459_v47 = vld [vmem:[%s12142_s5 + $0x950] sm:$0xf]  ;;  %v7237_v19 = vld [vmem:[%s12142_s5 + $0xfd8] sm:$0xf0] }
 0x233   :  { %4033 = vmatmul.bf16.vlgmr.msra.gmra.mxu2 %v8771_v5  ;;  %4059 = vmatmul.bf16.vlgmr.msrb.gmra.mxu0 %v8771_v5  ;;  %v6589_v31 = vld [vmem:[%s12142_s5 + $0xad0] sm:$0xf0]  ;;  %v4665_v37 = vsel %vm4662_vm3, %v4664_v24, %v4660_v32  ;;  %v3866_v45 = vadd.f32 %v3865_v61, %v3853_v35  ;;  %v6460_v7 = vor.u32 %v7667_v53, %v6459_v47  ;;  %v7109_v32 = vld [vmem:[%s12142_s5 + $0xed8] sm:$0xf0]  ;;  %v7796_v53 = vld [vmem:[%s12142_s5 + $0xdd4] sm:$0xf0] }
 0x234   :  { %4077 = vmatpush.bf16.msrb.mxu2 %v6204_v38  ;;  %4103 = vmatpush.bf16.msra.mxu0 %v6208_v39  ;;  %v4648_v38 = vand.u32 2147483648, %v10668_v43  ;;  %v3867_v39 = vpop.f32.mrf.mxu1  ;;  %5006 = vst [vmem:[%s12146_s7 + $0x48] sm:$0xff] %v4665_v37  ;;  %v7427_v43 = vld [vmem:[%s12142_s5 + $0x254] sm:$0xf]  ;;  %v5307_v37 = vld [vmem:[%s12142_s5 + $0x50] sm:$0xf] }
 0x235   :  { %v5568_v57 = vor.u32 %v7427_v43, %v5565_v63  ;;  %v7363_v39 = vld [vmem:[%s12142_s5 + $0x54] sm:$0xf]  ;;  %v6085_v43 = vld [vmem:[%s12142_s5 + $0x6d8] sm:$0xf0]  ;;  %v6851_v63 = vld [vmem:[%s12142_s5 + $0xc58] sm:$0xf] }
 0x236   :  { %4092 = vmatpush.bf16.msrb.mxu3 %v6972_v18  ;;  %4118 = vmatpush.bf16.msra.mxu1 %v6976_v50  ;;  %v6588_v18 = vor.u32 %v7699_v22, %v6587_v21  ;;  %v6592_v50 = vor.u32 %v7683_v30, %v6589_v31  ;;  %v4649_v61 = vor.u32 1.1754944e-38, %v4648_v38  ;;  %v3826_v62 = vpop.f32.mrf.mxu2  ;;  %v7395_v22 = vld [vmem:[%s12142_s5 + $0x154] sm:$0xf]  ;;  %v7828_v30 = vld [vmem:[%s12142_s5 + $0xed4] sm:$0xf0] }
 0x237   :  { %v3827_v1 = vadd.f32 %v3826_v62, %v943_v41  ;;  %v7812_v31 = vld [vmem:[%s12142_s5 + $0xe5c] sm:$0xf]  ;;  %v5440_v17 = vor.u32 %v7395_v22, %v5437_v23  ;;  %v7379_v38 = vld [vmem:[%s12142_s5 + $0xcc] sm:$0xf0]  ;;  %v7604_v41 = vld [vmem:[%s12142_s5 + $0x7d4] sm:$0xf0] }
 0x238   :  { %4078 = vmatpush.bf16.msrb.mxu2 %v6076_v51  ;;  %4104 = vmatpush.bf16.msra.mxu0 %v6080_v56  ;;  %v4641_v51 = vadd.f32 %v10736_v15, %v4640_v44  ;;  %v7284_v56 = vmul.f32 -1.442695, %v3866_v45  ;;  %v3854_v9 = vpop.f32.mrf.mxu0  ;;  %v7588_v44 = vld [vmem:[%s12142_s5 + $0x75c] sm:$0xf]  ;;  %v7112_v47 = vor.u32 %v7812_v31, %v7109_v32 }
 0x239   :  { %v3840_v12 = vadd.f32 %v10752_v25, %v3827_v1  ;;  %v7107_v25 = vld [vmem:[%s12142_s5 + $0xe58] sm:$0xf]  ;;  %v7556_v62 = vld [vmem:[%s12142_s5 + $0x65c] sm:$0xf] }
 0x23a   :  { %4093 = vmatpush.bf16.msrb.mxu3 %v6844_v3  ;;  %4119 = vmatpush.bf16.msra.mxu1 %v6848_v8  ;;  %v4645_v0 = vsel %vm4644_vm6, %v10736_v15, %v4641_v51  ;;  %7905 = vpow2.f32 %v7284_v56  ;;  %v6331_v3 = vld [vmem:[%s12142_s5 + $0x850] sm:$0xf]  ;;  %v6464_v8 = vor.u32 %v7651_v54, %v6461_v55  ;;  %v7844_v15 = vld [vmem:[%s12142_s5 + $0xf5c] sm:$0xf]  ;;  %v7108_v45 = vor.u32 %v7828_v30, %v7107_v25  ;;  %v7508_v25 = vld [vmem:[%s12142_s5 + $0x4d4] sm:$0xf0] }
 0x23b   :  { %v4650_v6 = vsel %vm4647_vm7, %v4649_v61, %v4645_v0  ;;  %v7283_v21 = vmul.f32 -1.442695, %v3840_v12  ;;  %v6332_v24 = vor.u32 %v7635_v4, %v6331_v3  ;;  %v7780_v54 = vld [vmem:[%s12142_s5 + $0xd5c] sm:$0xf]  ;;  %v6212_v51 = vor.u32 %v7604_v41, %v6211_v10  ;;  %v7764_v4 = vld [vmem:[%s12142_s5 + $0xcd4] sm:$0xf0] }
 0x23c   :  { %4079 = vmatpush.bf16.msrb.mxu2 %v5948_v49  ;;  %4105 = vmatpush.bf16.msra.mxu0 %v5952_v13  ;;  %v3841_v49 = vpop.f32.mrf.mxu3  ;;  %5005 = vst [vmem:[%s12146_s7 + $0x40] sm:$0xff] %v4650_v6  ;;  %v5564_v13 = vor.u32 %v7443_v60, %v5563_v59  ;;  %v6216_v56 = vor.u32 %v7588_v44, %v6213_v27  ;;  %v6083_v59 = vld [vmem:[%s12142_s5 + $0x658] sm:$0xf]  ;;  %v7748_v6 = vld [vmem:[%s12142_s5 + $0xc5c] sm:$0xf] }
 0x23d   :  { %7907 = vpow2.f32 %v7283_v21  ;;  %v7572_v60 = vld [vmem:[%s12142_s5 + $0x6d4] sm:$0xf0]  ;;  %v6088_v9 = vor.u32 %v7556_v62, %v6085_v43  ;;  %v7492_v30 = vld [vmem:[%s12142_s5 + $0x45c] sm:$0xf] }
 0x23e   :  { %4094 = vmatpush.bf16.msrb.mxu3 %v6716_v20  ;;  %4120 = vmatpush.bf16.msra.mxu1 %v6720_v16  ;;  %v7411_v20 = vld [vmem:[%s12142_s5 + $0x1cc] sm:$0xf0]  ;;  %v6336_v16 = vor.u32 %v7619_v2, %v6333_v48  ;;  %v3828_v36 = vpop.f32.mrf.mxu2  ;;  %v6084_v49 = vor.u32 %v7572_v60, %v6083_v59  ;;  %v5955_v2 = vld [vmem:[%s12142_s5 + $0x558] sm:$0xf]  ;;  %v5829_v31 = vld [vmem:[%s12142_s5 + $0x4d8] sm:$0xf0] }
 0x23f   :  { %v5436_v35 = vor.u32 %v7411_v20, %v5435_v33  ;;  %v7540_v48 = vld [vmem:[%s12142_s5 + $0x5d4] sm:$0xf0]  ;;  %v7716_v33 = vld [vmem:[%s12142_s5 + $0xb5c] sm:$0xf]  ;;  %v5832_v27 = vor.u32 %v7492_v30, %v5829_v31  ;;  %v945_v60 = vperm.slane %v10457_v42, 4 }
 0x240   :  { %4080 = vmatpush.bf16.msrb.mxu2 %v5820_v28  ;;  %4106 = vmatpush.bf16.msra.mxu0 %v5824_v29  ;;  %v7906_v26 = vpop.eup %7905  ;;  %v7236_v28 = vor.u32 %v7860_v14, %v7235_v11  ;;  %v7240_v29 = vor.u32 %v7844_v15, %v7237_v19  ;;  %v7524_v11 = vld [vmem:[%s12142_s5 + $0x55c] sm:$0xf]  ;;  %v7732_v14 = vld [vmem:[%s12142_s5 + $0xbd4] sm:$0xf0]  ;;  %v6852_v19 = vor.u32 %v7764_v4, %v6851_v63  ;;  %v7861_v30 = vld [vmem:[%s12142_s5 + $0xfdc] sm:$0xf0] }
 0x241   :  { %v10864_v34 = vadd.f32 1.0, %v7906_v26  ;;  %v6725_v20 = vld [vmem:[%s12142_s5 + $0xbd8] sm:$0xf0]  ;;  %v5956_v23 = vor.u32 %v7540_v48, %v5955_v2  ;;  %v7668_v4 = vld [vmem:[%s12142_s5 + $0x9d4] sm:$0xf0] }
 0x242   :  { %4095 = vmatpush.bf16.msrb.mxu3 %v6588_v18  ;;  %4121 = vmatpush.bf16.msra.mxu1 %v6592_v50  ;;  %v5308_v18 = vor.u32 %v7379_v38, %v5307_v37  ;;  %v5312_v50 = vor.u32 %v7363_v39, %v5309_v40  ;;  %v6595_v37 = vld [vmem:[%s12142_s5 + $0xa58] sm:$0xf]  ;;  %v5701_v59 = vld [vmem:[%s12142_s5 + $0x3d8] sm:$0xf0]  ;;  %v7845_v31 = vld [vmem:[%s12142_s5 + $0xf64] sm:$0xf] }
 0x243   :  { %7909 = vrcp.f32 %v10864_v34  ;;  %v7908_v55 = vpop.eup %7907  ;;  %v4693_v21 = vand.u32 2147483648, %v10864_v34  ;;  %vm4687_vm9 = vweird.f32 %v10864_v34  ;;  %v7700_v38 = vld [vmem:[%s12142_s5 + $0xad4] sm:$0xf0] }
 0x244   :  { %4081 = vmatpush.bf16.msrb.mxu2 %v5692_v52  ;;  %4107 = vmatpush.bf16.msra.mxu0 %v5696_v58  ;;  %v6979_v52 = vld [vmem:[%s12142_s5 + $0xd58] sm:$0xf]  ;;  %v6981_v58 = vld [vmem:[%s12142_s5 + $0xdd8] sm:$0xf0]  ;;  %v10911_v61 = vadd.f32 1.0, %v7908_v55 }
 0x245   :  { %v6980_v1 = vor.u32 %v7796_v53, %v6979_v52  ;;  %v6984_v3 = vor.u32 %v7780_v54, %v6981_v58  ;;  %v4694_v40 = vor.u32 1.1754944e-38, %v4693_v21  ;;  %v5699_v53 = vld [vmem:[%s12142_s5 + $0x358] sm:$0xf]  ;;  %v7460_v58 = vld [vmem:[%s12142_s5 + $0x35c] sm:$0xf] }
 0x246   :  { %4096 = vmatpush.bf16.msrb.mxu3 %v6460_v7  ;;  %4122 = vmatpush.bf16.msra.mxu1 %v6464_v8  ;;  %7911 = vrcp.f32 %v10911_v61  ;;  %v6853_v7 = vld [vmem:[%s12142_s5 + $0xcd8] sm:$0xf0]  ;;  %v7476_v54 = vld [vmem:[%s12142_s5 + $0x3d4] sm:$0xf0]  ;;  %v4676_v43 = vand.u32 2147483647, %v10911_v61  ;;  %vm4672_vm13 = vweird.f32 %v10911_v61 }
 0x247   :  { %v6856_v22 = vor.u32 %v7748_v6, %v6853_v7  ;;  %v7652_v6 = vld [vmem:[%s12142_s5 + $0x95c] sm:$0xf]  ;;  %v5571_v2 = vld [vmem:[%s12142_s5 + $0x258] sm:$0xf] }
 0x248   :  { %4082 = vmatpush.bf16.msrb.mxu2 %v5564_v13  ;;  %4108 = vmatpush.bf16.msra.mxu0 %v5568_v57  ;;  %v5957_v13 = vld [vmem:[%s12142_s5 + $0x5d8] sm:$0xf0]  ;;  %v6723_v57 = vld [vmem:[%s12142_s5 + $0xb58] sm:$0xf]  ;;  %vm4677_vm15 = vcmp.eq.f32.partialorder %v4676_v43, 8.507059e+37 }
 0x249   :  { %v10922_v0 = vpop.eup %7909  ;;  %v6724_v36 = vor.u32 %v7732_v14, %v6723_v57  ;;  %v6469_v7 = vld [vmem:[%s12142_s5 + $0x9d8] sm:$0xf0]  ;;  %v7444_v48 = vld [vmem:[%s12142_s5 + $0x2d4] sm:$0xf0] }
 0x24a   :  { %4097 = vmatpush.bf16.msrb.mxu3 %v6332_v24  ;;  %4123 = vmatpush.bf16.msra.mxu1 %v6336_v16  ;;  %v4683_v8 = vmul.f32 %v10922_v0, %v10864_v34  ;;  %v3917_v12 = vpop.f32.mrf.mxu1  ;;  %v946_v24 = vperm.slane %v10457_v42, 5  ;;  %v5827_v16 = vld [vmem:[%s12142_s5 + $0x458] sm:$0xf]  ;;  %vm4688_vm8 = vweird.f32 %v10922_v0  ;;  %v5700_v42 = vor.u32 %v7476_v54, %v5699_v53 }
 0x24b   :  { %vm10991_vm10 = vmor %vm4687_vm9, %vm4688_vm8  ;;  %v5828_v44 = vor.u32 %v7508_v25, %v5827_v16  ;;  %v6472_v21 = vor.u32 %v7652_v6, %v6469_v7  ;;  %v6341_v16 = vld [vmem:[%s12142_s5 + $0x8d8] sm:$0xf0]  ;;  %v7243_v25 = vld [vmem:[%s12142_s5 + $0xf60] sm:$0xf] }
 0x24c   :  { %4083 = vmatpush.bf16.msrb.mxu2 %v5436_v35  ;;  %4109 = vmatpush.bf16.msra.mxu0 %v5440_v17  ;;  %v4684_v15 = vsub.f32 1.0, %v4683_v8  ;;  %v10979_v32 = vpop.eup %7911  ;;  %v5315_v54 = vld [vmem:[%s12142_s5 + $0x58] sm:$0xf] }
 0x24d   :  { %4098 = vmatmul.bf16.vlgmr.msrb.gmra.mxu3 %v8731_v46  ;;  %4124 = vmatmul.bf16.vlgmr.msra.gmra.mxu1 %v8731_v46  ;;  %v4668_v17 = vmul.f32 %v10979_v32, %v10911_v61  ;;  %vm4673_vm12 = vweird.f32 %v10979_v32 }
 0x24e   :  { %4142 = vmatpush.bf16.msra.mxu3 %v7236_v28  ;;  %4168 = vmatpush.bf16.msrb.mxu1 %v7240_v29  ;;  %v4685_v26 = vmul.f32 %v10922_v0, %v4684_v15  ;;  %v4691_v28 = vand.u32 2147483647, %v10864_v34  ;;  %v5960_v29 = vor.u32 %v7524_v11, %v5957_v13  ;;  %v6728_v34 = vor.u32 %v7716_v33, %v6725_v20  ;;  %vm4674_vm14 = vmor %vm4672_vm13, %vm4673_vm12  ;;  %v5573_v13 = vld [vmem:[%s12142_s5 + $0x2d8] sm:$0xf0]  ;;  %v6339_v15 = vld [vmem:[%s12142_s5 + $0x858] sm:$0xf] }
 0x250   :  { %4084 = vmatpush.bf16.msrb.mxu2 %v5308_v18  ;;  %4110 = vmatpush.bf16.msra.mxu0 %v5312_v50  ;;  %v4686_v35 = vadd.f32 %v10922_v0, %v4685_v26  ;;  %v10995_v10 = vpop.f32.mrf.mxu3  ;;  %v3904_v41 = vpop.f32.mrf.mxu0  ;;  %vm4692_vm11 = vcmp.eq.f32.partialorder %v4691_v28, 8.507059e+37  ;;  %v4669_v50 = vsub.f32 1.0, %v4668_v17  ;;  %v5572_v28 = vor.u32 %v7444_v48, %v5571_v2  ;;  %v7412_v17 = vld [vmem:[%s12142_s5 + $0x1d4] sm:$0xf0]  ;;  %v7573_v2 = vld [vmem:[%s12142_s5 + $0x6dc] sm:$0xf0] }
 0x251   :  { %v3905_v52 = vadd.f32 %v3904_v41, %v946_v24  ;;  %v7620_v24 = vld [vmem:[%s12142_s5 + $0x85c] sm:$0xf]  ;;  %v7244_v41 = vor.u32 %v7861_v30, %v7243_v25 }
 0x252   :  { %4143 = vmatpush.bf16.msra.mxu3 %v7108_v45  ;;  %4169 = vmatpush.bf16.msrb.mxu1 %v7112_v47  ;;  %v7684_v45 = vld [vmem:[%s12142_s5 + $0xa5c] sm:$0xf]  ;;  %v4690_v18 = vsel %vm10991_vm10, %v10922_v0, %v4686_v35  ;;  %v4670_v62 = vmul.f32 %v10979_v32, %v4669_v50  ;;  %v6467_v0 = vld [vmem:[%s12142_s5 + $0x958] sm:$0xf] }
 0x253   :  { %4085 = vmatmul.bf16.vlgmr.msrb.gmra.mxu2 %v8771_v5  ;;  %4111 = vmatmul.bf16.vlgmr.msra.gmra.mxu0 %v8771_v5  ;;  %v6597_v47 = vld [vmem:[%s12142_s5 + $0xad8] sm:$0xf0]  ;;  %v4695_v55 = vsel %vm4692_vm11, %v4694_v40, %v4690_v18  ;;  %v3918_v63 = vadd.f32 %v3917_v12, %v3905_v52  ;;  %v6468_v20 = vor.u32 %v7668_v4, %v6467_v0  ;;  %v5443_v35 = vld [vmem:[%s12142_s5 + $0x158] sm:$0xf]  ;;  %v7781_v4 = vld [vmem:[%s12142_s5 + $0xd64] sm:$0xf] }
 0x254   :  { %4129 = vmatpush.bf16.msra.mxu2 %v6212_v51  ;;  %4155 = vmatpush.bf16.msrb.mxu0 %v6216_v56  ;;  %v4678_v51 = vand.u32 2147483648, %v10911_v61  ;;  %v3919_v56 = vpop.f32.mrf.mxu1  ;;  %5008 = vst [vmem:[%s12146_s7 + $0x58] sm:$0xff] %v4695_v55  ;;  %v4671_v8 = vadd.f32 %v10979_v32, %v4670_v62  ;;  %v7428_v61 = vld [vmem:[%s12142_s5 + $0x25c] sm:$0xf]  ;;  %v6344_v40 = vor.u32 %v7620_v24, %v6341_v16  ;;  %v7380_v55 = vld [vmem:[%s12142_s5 + $0xd4] sm:$0xf0] }
 0x255   :  { %v5444_v50 = vor.u32 %v7412_v17, %v5443_v35  ;;  %v5317_v56 = vld [vmem:[%s12142_s5 + $0xd8] sm:$0xf0]  ;;  %v6221_v62 = vld [vmem:[%s12142_s5 + $0x7e0] sm:$0xf0]  ;;  %v5316_v0 = vor.u32 %v7380_v55, %v5315_v54  ;;  %v7541_v24 = vld [vmem:[%s12142_s5 + $0x5dc] sm:$0xf0] }
 0x256   :  { %4144 = vmatpush.bf16.msra.mxu3 %v6980_v1  ;;  %4170 = vmatpush.bf16.msrb.mxu1 %v6984_v3  ;;  %v6596_v1 = vor.u32 %v7700_v38, %v6595_v37  ;;  %v6600_v3 = vor.u32 %v7684_v45, %v6597_v47  ;;  %v4679_v11 = vor.u32 1.1754944e-38, %v4678_v51  ;;  %v3878_v12 = vpop.f32.mrf.mxu2  ;;  %v4675_v57 = vsel %vm4674_vm14, %v10979_v32, %v4671_v8  ;;  %v7245_v32 = vld [vmem:[%s12142_s5 + $0xfe0] sm:$0xf0]  ;;  %v7396_v37 = vld [vmem:[%s12142_s5 + $0x15c] sm:$0xf] }
 0x257   :  { %v3879_v14 = vadd.f32 %v3878_v12, %v945_v60  ;;  %v5445_v38 = vld [vmem:[%s12142_s5 + $0x1d8] sm:$0xf0]  ;;  %v7813_v45 = vld [vmem:[%s12142_s5 + $0xe64] sm:$0xf]  ;;  %v6603_v54 = vld [vmem:[%s12142_s5 + $0xa60] sm:$0xf] }
 0x258   :  { %4130 = vmatpush.bf16.msra.mxu2 %v6084_v49  ;;  %4156 = vmatpush.bf16.msrb.mxu0 %v6088_v9  ;;  %v7286_v49 = vmul.f32 -1.442695, %v3918_v63  ;;  %v5704_v9 = vor.u32 %v7460_v58, %v5701_v59  ;;  %v4680_v33 = vsel %vm4677_vm15, %v4679_v11, %v4675_v57  ;;  %v7117_v47 = vld [vmem:[%s12142_s5 + $0xee0] sm:$0xf0]  ;;  %v5448_v52 = vor.u32 %v7396_v37, %v5445_v38  ;;  %v7364_v51 = vld [vmem:[%s12142_s5 + $0x5c] sm:$0xf] }
 0x259   :  { %5007 = vst [vmem:[%s12146_s7 + $0x50] sm:$0xff] %v4680_v33  ;;  %v3892_v26 = vadd.f32 %v10995_v10, %v3879_v14  ;;  %v6219_v58 = vld [vmem:[%s12142_s5 + $0x760] sm:$0xf]  ;;  %v7589_v60 = vld [vmem:[%s12142_s5 + $0x764] sm:$0xf]  ;;  %v7120_v63 = vor.u32 %v7813_v45, %v7117_v47  ;;  %v11213_v38 = vld [vmem:[%s12145_s6 + $0x8] sm:$0xff] }
 0x25a   :  { %4145 = vmatpush.bf16.msra.mxu3 %v6852_v19  ;;  %4171 = vmatpush.bf16.msrb.mxu1 %v6856_v22  ;;  %7913 = vpow2.f32 %v7286_v49  ;;  %v7636_v19 = vld [vmem:[%s12142_s5 + $0x8d4] sm:$0xf0]  ;;  %v3893_v22 = vpop.f32.mrf.mxu3  ;;  %v7605_v59 = vld [vmem:[%s12142_s5 + $0x7dc] sm:$0xf0]  ;;  %v6224_v8 = vor.u32 %v7589_v60, %v6221_v62  ;;  %v6989_v49 = vld [vmem:[%s12142_s5 + $0xde0] sm:$0xf0] }
 0x25b   :  { %v6340_v39 = vor.u32 %v7636_v19, %v6339_v15  ;;  %v6220_v7 = vor.u32 %v7605_v59, %v6219_v58  ;;  %v7557_v11 = vld [vmem:[%s12142_s5 + $0x664] sm:$0xf]  ;;  %v6992_v14 = vor.u32 %v7781_v4, %v6989_v49  ;;  %v7765_v15 = vld [vmem:[%s12142_s5 + $0xcdc] sm:$0xf0] }
 0x25c   :  { %4131 = vmatpush.bf16.msra.mxu2 %v5956_v23  ;;  %4157 = vmatpush.bf16.msrb.mxu0 %v5960_v29  ;;  %v3906_v23 = vpop.f32.mrf.mxu0  ;;  %v5576_v29 = vor.u32 %v7428_v61, %v5573_v13  ;;  %v6093_v12 = vld [vmem:[%s12142_s5 + $0x6e0] sm:$0xf0]  ;;  %v6859_v61 = vld [vmem:[%s12142_s5 + $0xc60] sm:$0xf] }
 0x25d   :  { %v7749_v19 = vld [vmem:[%s12142_s5 + $0xc64] sm:$0xf]  ;;  %v6096_v22 = vor.u32 %v7557_v11, %v6093_v12  ;;  %v5963_v23 = vld [vmem:[%s12142_s5 + $0x560] sm:$0xf] }
 0x25e   :  { %4146 = vmatpush.bf16.msra.mxu3 %v6724_v36  ;;  %4172 = vmatpush.bf16.msrb.mxu1 %v6728_v34  ;;  %v7285_v36 = vmul.f32 -1.442695, %v3892_v26  ;;  %v7115_v34 = vld [vmem:[%s12142_s5 + $0xe60] sm:$0xf]  ;;  %v3880_v53 = vpop.f32.mrf.mxu2  ;;  %v6861_v33 = vld [vmem:[%s12142_s5 + $0xce0] sm:$0xf0]  ;;  %v5964_v37 = vor.u32 %v7541_v24, %v5963_v23 }
 0x25f   :  { %v7525_v16 = vld [vmem:[%s12142_s5 + $0x564] sm:$0xf]  ;;  %v7701_v55 = vld [vmem:[%s12142_s5 + $0xadc] sm:$0xf0] }
 0x260   :  { %4132 = vmatpush.bf16.msra.mxu2 %v5828_v44  ;;  %4158 = vmatpush.bf16.msrb.mxu0 %v5832_v27  ;;  %v7914_v10 = vpop.eup %7913  ;;  %7915 = vpow2.f32 %v7285_v36  ;;  %v7248_v44 = vor.u32 %v7845_v31, %v7245_v32  ;;  %v7829_v27 = vld [vmem:[%s12142_s5 + $0xedc] sm:$0xf0]  ;;  %v5965_v26 = vld [vmem:[%s12142_s5 + $0x5e0] sm:$0xf0]  ;;  %v6860_v31 = vor.u32 %v7765_v15, %v6859_v61  ;;  %v6864_v36 = vor.u32 %v7749_v19, %v6861_v33 }
 0x261   :  { %v11107_v18 = vadd.f32 1.0, %v7914_v10  ;;  %v7116_v43 = vor.u32 %v7829_v27, %v7115_v34  ;;  %v7717_v32 = vld [vmem:[%s12142_s5 + $0xb64] sm:$0xf]  ;;  %v7509_v34 = vld [vmem:[%s12142_s5 + $0x4dc] sm:$0xf0] }
 0x262   :  { %4147 = vmatpush.bf16.msra.mxu3 %v6596_v1  ;;  %4173 = vmatpush.bf16.msrb.mxu1 %v6600_v3  ;;  %v5320_v1 = vor.u32 %v7364_v51, %v5317_v56  ;;  %v6987_v3 = vld [vmem:[%s12142_s5 + $0xd60] sm:$0xf]  ;;  %v6733_v35 = vld [vmem:[%s12142_s5 + $0xbe0] sm:$0xf0] }
 0x263   :  { %7917 = vrcp.f32 %v11107_v18  ;;  %v4723_v17 = vand.u32 2147483648, %v11107_v18  ;;  %v7493_v27 = vld [vmem:[%s12142_s5 + $0x464] sm:$0xf]  ;;  %vm4717_vm1 = vweird.f32 %v11107_v18  ;;  %v7477_v4 = vld [vmem:[%s12142_s5 + $0x3dc] sm:$0xf0] }
 0x264   :  { %4133 = vmatpush.bf16.msra.mxu2 %v5700_v42  ;;  %4159 = vmatpush.bf16.msrb.mxu0 %v5704_v9  ;;  %v7797_v42 = vld [vmem:[%s12142_s5 + $0xddc] sm:$0xf0]  ;;  %v5837_v45 = vld [vmem:[%s12142_s5 + $0x4e0] sm:$0xf0] }
 0x265   :  { %v6091_v9 = vld [vmem:[%s12142_s5 + $0x660] sm:$0xf]  ;;  %v6988_v57 = vor.u32 %v7797_v42, %v6987_v3  ;;  %v4724_v56 = vor.u32 1.1754944e-38, %v4723_v17  ;;  %v5840_v62 = vor.u32 %v7493_v27, %v5837_v45  ;;  %v7461_v49 = vld [vmem:[%s12142_s5 + $0x364] sm:$0xf] }
 0x266   :  { %4148 = vmatpush.bf16.msra.mxu3 %v6468_v20  ;;  %4174 = vmatpush.bf16.msrb.mxu1 %v6472_v21  ;;  %v7916_v6 = vpop.eup %7915  ;;  %v6092_v21 = vor.u32 %v7573_v2, %v6091_v9  ;;  %v5707_v42 = vld [vmem:[%s12142_s5 + $0x360] sm:$0xf]  ;;  %v5709_v9 = vld [vmem:[%s12142_s5 + $0x3e0] sm:$0xf0]  ;;  %v947_v2 = vperm.slane %v11213_v38, 6 }
 0x267   :  { %v11154_v48 = vadd.f32 1.0, %v7916_v6  ;;  %v5708_v15 = vor.u32 %v7477_v4, %v5707_v42  ;;  %v7669_v19 = vld [vmem:[%s12142_s5 + $0x9dc] sm:$0xf0]  ;;  %v7653_v33 = vld [vmem:[%s12142_s5 + $0x964] sm:$0xf]  ;;  %v5712_v23 = vor.u32 %v7461_v49, %v5709_v9 }
 0x268   :  { %4134 = vmatpush.bf16.msra.mxu2 %v5572_v28  ;;  %4160 = vmatpush.bf16.msrb.mxu0 %v5576_v29  ;;  %v11196_v28 = vld [vmem:[%s12142_s5 + $0xb60] sm:$0xf]  ;;  %v7862_v27 = vld [vmem:[%s12142_s5 + $0xfe4] sm:$0xf0]  ;;  %v7846_v45 = vld [vmem:[%s12142_s5 + $0xf6c] sm:$0xf] }
 0x269   :  { %v11165_v13 = vpop.eup %7917  ;;  %7919 = vrcp.f32 %v11154_v48  ;;  %v7733_v29 = vld [vmem:[%s12142_s5 + $0xbdc] sm:$0xf0]  ;;  %v4706_v12 = vand.u32 2147483647, %v11154_v48  ;;  %vm4702_vm5 = vweird.f32 %v11154_v48  ;;  %v6227_v49 = vld [vmem:[%s12142_s5 + $0x768] sm:$0xf] }
 0x26a   :  { %4149 = vmatpush.bf16.msra.mxu3 %v6340_v39  ;;  %4175 = vmatpush.bf16.msrb.mxu1 %v6344_v40  ;;  %v4713_v20 = vmul.f32 %v11165_v13, %v11107_v18  ;;  %v11188_v25 = vpop.f32.mrf.mxu1  ;;  %v948_v39 = vperm.slane %v11213_v38, 7  ;;  %v5835_v40 = vld [vmem:[%s12142_s5 + $0x460] sm:$0xf]  ;;  %vm4718_vm0 = vweird.f32 %v11165_v13  ;;  %v6732_v53 = vor.u32 %v7733_v29, %v11196_v28  ;;  %v5581_v28 = vld [vmem:[%s12142_s5 + $0x2e0] sm:$0xf0] }
 0x26b   :  { %vm11244_vm2 = vmor %vm4717_vm1, %vm4718_vm0  ;;  %v5836_v60 = vor.u32 %v7509_v34, %v5835_v40  ;;  %v5579_v24 = vld [vmem:[%s12142_s5 + $0x260] sm:$0xf]  ;;  %vm4707_vm7 = vcmp.eq.f32.partialorder %v4706_v12, 8.507059e+37  ;;  %v6349_v40 = vld [vmem:[%s12142_s5 + $0x8e0] sm:$0xf0] }
 0x26c   :  { %4135 = vmatpush.bf16.msra.mxu2 %v5444_v50  ;;  %4161 = vmatpush.bf16.msrb.mxu0 %v5448_v52  ;;  %v4714_v30 = vsub.f32 1.0, %v4713_v20  ;;  %v6477_v20 = vld [vmem:[%s12142_s5 + $0x9e0] sm:$0xf0]  ;;  %v7251_v34 = vld [vmem:[%s12142_s5 + $0xf68] sm:$0xf] }
 0x26d   :  { %4150 = vmatmul.bf16.vlgmr.msra.gmra.mxu3 %v8731_v46  ;;  %4176 = vmatmul.bf16.vlgmr.msrb.gmra.mxu1 %v8731_v46  ;;  %v5323_v4 = vld [vmem:[%s12142_s5 + $0x60] sm:$0xf]  ;;  %v7606_v9 = vld [vmem:[%s12142_s5 + $0x7e4] sm:$0xf0] }
 0x26e   :  { %4194 = vmatpush.bf16.msrb.mxu3 %v7244_v41  ;;  %4220 = vmatpush.bf16.msra.mxu1 %v7248_v44  ;;  %v4715_v10 = vmul.f32 %v11165_v13, %v4714_v30  ;;  %v4721_v41 = vand.u32 2147483647, %v11107_v18  ;;  %v5968_v44 = vor.u32 %v7525_v16, %v5965_v26  ;;  %v6736_v18 = vor.u32 %v7717_v32, %v6733_v35  ;;  %v7445_v16 = vld [vmem:[%s12142_s5 + $0x2dc] sm:$0xf0] }
 0x26f   :  { %v11231_v47 = vpop.eup %7919  ;;  %v7637_v32 = vld [vmem:[%s12142_s5 + $0x8dc] sm:$0xf0] }
 0x270   :  { %4136 = vmatpush.bf16.msra.mxu2 %v5316_v0  ;;  %4162 = vmatpush.bf16.msrb.mxu0 %v5320_v1  ;;  %v4716_v50 = vadd.f32 %v11165_v13, %v4715_v10  ;;  %v4698_v52 = vmul.f32 %v11231_v47, %v11154_v48  ;;  %v11248_v58 = vpop.f32.mrf.mxu3  ;;  %v3956_v59 = vpop.f32.mrf.mxu0  ;;  %vm4722_vm3 = vcmp.eq.f32.partialorder %v4721_v41, 8.507059e+37  ;;  %vm4703_vm4 = vweird.f32 %v11231_v47 }
 0x271   :  { %v3957_v3 = vadd.f32 %v3956_v59, %v948_v39  ;;  %vm4704_vm6 = vmor %vm4702_vm5, %vm4703_vm4  ;;  %v7621_v39 = vld [vmem:[%s12142_s5 + $0x864] sm:$0xf]  ;;  %v5580_v41 = vor.u32 %v7445_v16, %v5579_v24  ;;  %v7252_v59 = vor.u32 %v7862_v27, %v7251_v34  ;;  %v7574_v24 = vld [vmem:[%s12142_s5 + $0x6e4] sm:$0xf0] }
 0x272   :  { %4195 = vmatpush.bf16.msrb.mxu3 %v7116_v43  ;;  %4221 = vmatpush.bf16.msra.mxu1 %v7120_v63  ;;  %v7685_v43 = vld [vmem:[%s12142_s5 + $0xa64] sm:$0xf]  ;;  %v4720_v0 = vsel %vm11244_vm2, %v11165_v13, %v4716_v50  ;;  %v4699_v1 = vsub.f32 1.0, %v4698_v52  ;;  %v6475_v13 = vld [vmem:[%s12142_s5 + $0x960] sm:$0xf]  ;;  %v11445_v34 = vld [vmem:[%s12145_s6 + $0x10] sm:$0xff] }
 0x273   :  { %4137 = vmatmul.bf16.vlgmr.msra.gmra.mxu2 %v8771_v5  ;;  %4163 = vmatmul.bf16.vlgmr.msrb.gmra.mxu0 %v8771_v5  ;;  %v6605_v63 = vld [vmem:[%s12142_s5 + $0xae0] sm:$0xf0]  ;;  %v4725_v6 = vsel %vm4722_vm3, %v4724_v56, %v4720_v0  ;;  %v3970_v61 = vadd.f32 %v11188_v25, %v3957_v3  ;;  %v6476_v17 = vor.u32 %v7669_v19, %v6475_v13  ;;  %v5451_v50 = vld [vmem:[%s12142_s5 + $0x160] sm:$0xf]  ;;  %v7782_v19 = vld [vmem:[%s12142_s5 + $0xd6c] sm:$0xf] }
 0x274   :  { %4181 = vmatpush.bf16.msrb.mxu2 %v6220_v7  ;;  %4207 = vmatpush.bf16.msra.mxu0 %v6224_v8  ;;  %v4708_v7 = vand.u32 2147483648, %v11154_v48  ;;  %v3971_v8 = vpop.f32.mrf.mxu1  ;;  %5010 = vst [vmem:[%s12146_s7 + $0x68] sm:$0xff] %v4725_v6  ;;  %v4700_v11 = vmul.f32 %v11231_v47, %v4699_v1  ;;  %v7429_v48 = vld [vmem:[%s12142_s5 + $0x264] sm:$0xf]  ;;  %v7413_v52 = vld [vmem:[%s12142_s5 + $0x1dc] sm:$0xf0]  ;;  %v6352_v56 = vor.u32 %v7621_v39, %v6349_v40 }
 0x275   :  { %v5452_v1 = vor.u32 %v7413_v52, %v5451_v50  ;;  %v7381_v6 = vld [vmem:[%s12142_s5 + $0xdc] sm:$0xf0]  ;;  %v5325_v8 = vld [vmem:[%s12142_s5 + $0xe0] sm:$0xf0]  ;;  %v7542_v39 = vld [vmem:[%s12142_s5 + $0x5e4] sm:$0xf0] }
 0x276   :  { %4196 = vmatpush.bf16.msrb.mxu3 %v6988_v57  ;;  %4222 = vmatpush.bf16.msra.mxu1 %v6992_v14  ;;  %v6604_v57 = vor.u32 %v7701_v55, %v6603_v54  ;;  %v6608_v14 = vor.u32 %v7685_v43, %v6605_v63  ;;  %v4709_v25 = vor.u32 1.1754944e-38, %v4708_v7  ;;  %v3930_v26 = vpop.f32.mrf.mxu2  ;;  %v7397_v54 = vld [vmem:[%s12142_s5 + $0x164] sm:$0xf]  ;;  %v7814_v43 = vld [vmem:[%s12142_s5 + $0xe6c] sm:$0xf]  ;;  %v5324_v13 = vor.u32 %v7381_v6, %v5323_v4 }
 0x277   :  { %v3931_v30 = vadd.f32 %v3930_v26, %v947_v2  ;;  %v5453_v55 = vld [vmem:[%s12142_s5 + $0x1e0] sm:$0xf0]  ;;  %v7125_v63 = vld [vmem:[%s12142_s5 + $0xee8] sm:$0xf0]  ;;  %v7734_v27 = vld [vmem:[%s12142_s5 + $0xbe4] sm:$0xf0] }
 0x278   :  { %4182 = vmatpush.bf16.msrb.mxu2 %v6092_v21  ;;  %4208 = vmatpush.bf16.msra.mxu0 %v6096_v22  ;;  %v4701_v21 = vadd.f32 %v11231_v47, %v4700_v11  ;;  %v7288_v22 = vmul.f32 -1.442695, %v3970_v61  ;;  %v3958_v38 = vpop.f32.mrf.mxu0  ;;  %v5456_v3 = vor.u32 %v7397_v54, %v5453_v55  ;;  %v7365_v7 = vld [vmem:[%s12142_s5 + $0x64] sm:$0xf]  ;;  %v7590_v2 = vld [vmem:[%s12142_s5 + $0x76c] sm:$0xf]  ;;  %v7128_v61 = vor.u32 %v7814_v43, %v7125_v63 }
 0x279   :  { %v3944_v10 = vadd.f32 %v11248_v58, %v3931_v30  ;;  %v6229_v11 = vld [vmem:[%s12142_s5 + $0x7e8] sm:$0xf0]  ;;  %v6611_v4 = vld [vmem:[%s12142_s5 + $0xa68] sm:$0xf] }
 0x27a   :  { %4197 = vmatpush.bf16.msrb.mxu3 %v6860_v31  ;;  %4223 = vmatpush.bf16.msra.mxu1 %v6864_v36  ;;  %v4705_v29 = vsel %vm4704_vm6, %v11231_v47, %v4701_v21  ;;  %7921 = vpow2.f32 %v7288_v22  ;;  %v6347_v31 = vld [vmem:[%s12142_s5 + $0x860] sm:$0xf]  ;;  %v6480_v36 = vor.u32 %v7653_v33, %v6477_v20  ;;  %v7253_v47 = vld [vmem:[%s12142_s5 + $0xfe8] sm:$0xf0]  ;;  %v6228_v20 = vor.u32 %v7606_v9, %v6227_v49  ;;  %v7702_v6 = vld [vmem:[%s12142_s5 + $0xae4] sm:$0xf0] }
 0x27b   :  { %v4710_v35 = vsel %vm4707_vm7, %v4709_v25, %v4705_v29  ;;  %v6348_v51 = vor.u32 %v7637_v32, %v6347_v31  ;;  %v6232_v21 = vor.u32 %v7590_v2, %v6229_v11  ;;  %v6997_v22 = vld [vmem:[%s12142_s5 + $0xde8] sm:$0xf0] }
 0x27c   :  { %4183 = vmatpush.bf16.msrb.mxu2 %v5964_v37  ;;  %4209 = vmatpush.bf16.msra.mxu0 %v5968_v44  ;;  %v3945_v37 = vpop.f32.mrf.mxu3  ;;  %5009 = vst [vmem:[%s12146_s7 + $0x60] sm:$0xff] %v4710_v35  ;;  %v5584_v44 = vor.u32 %v7429_v48, %v5581_v28  ;;  %v7558_v25 = vld [vmem:[%s12142_s5 + $0x66c] sm:$0xf]  ;;  %v6867_v48 = vld [vmem:[%s12142_s5 + $0xc68] sm:$0xf]  ;;  %v7000_v31 = vor.u32 %v7782_v19, %v6997_v22 }
 0x27d   :  { %v6101_v26 = vld [vmem:[%s12142_s5 + $0x6e8] sm:$0xf0]  ;;  %v7766_v28 = vld [vmem:[%s12142_s5 + $0xce4] sm:$0xf0] }
 0x27e   :  { %4198 = vmatpush.bf16.msrb.mxu3 %v6732_v53  ;;  %4224 = vmatpush.bf16.msra.mxu1 %v6736_v18  ;;  %v7287_v53 = vmul.f32 -1.442695, %v3944_v10  ;;  %v7123_v18 = vld [vmem:[%s12142_s5 + $0xe68] sm:$0xf]  ;;  %v3932_v42 = vpop.f32.mrf.mxu2  ;;  %v7750_v32 = vld [vmem:[%s12142_s5 + $0xc6c] sm:$0xf]  ;;  %v6104_v38 = vor.u32 %v7558_v25, %v6101_v26 }
 0x27f   :  { %v6869_v35 = vld [vmem:[%s12142_s5 + $0xce8] sm:$0xf0]  ;;  %v7478_v19 = vld [vmem:[%s12142_s5 + $0x3e4] sm:$0xf0] }
 0x280   :  { %4184 = vmatpush.bf16.msrb.mxu2 %v5836_v60  ;;  %4210 = vmatpush.bf16.msra.mxu0 %v5840_v62  ;;  %v7922_v58 = vpop.eup %7921  ;;  %7923 = vpow2.f32 %v7287_v53  ;;  %v7256_v60 = vor.u32 %v7846_v45, %v7253_v47  ;;  %v7830_v62 = vld [vmem:[%s12142_s5 + $0xee4] sm:$0xf0]  ;;  %v7526_v40 = vld [vmem:[%s12142_s5 + $0x56c] sm:$0xf]  ;;  %v6868_v47 = vor.u32 %v7766_v28, %v6867_v48  ;;  %v6872_v54 = vor.u32 %v7750_v32, %v6869_v35 }
 0x281   :  { %v11361_v0 = vadd.f32 1.0, %v7922_v58  ;;  %v7124_v12 = vor.u32 %v7830_v62, %v7123_v18  ;;  %v7718_v50 = vld [vmem:[%s12142_s5 + $0xb6c] sm:$0xf]  ;;  %v7510_v18 = vld [vmem:[%s12142_s5 + $0x4e4] sm:$0xf0] }
 0x282   :  { %4199 = vmatpush.bf16.msrb.mxu3 %v6604_v57  ;;  %4225 = vmatpush.bf16.msra.mxu1 %v6608_v14  ;;  %v5328_v57 = vor.u32 %v7365_v7, %v5325_v8  ;;  %v6995_v14 = vld [vmem:[%s12142_s5 + $0xd68] sm:$0xf]  ;;  %v6741_v52 = vld [vmem:[%s12142_s5 + $0xbe8] sm:$0xf0] }
 0x283   :  { %7925 = vrcp.f32 %v11361_v0  ;;  %v4753_v53 = vand.u32 2147483648, %v11361_v0  ;;  %v7494_v62 = vld [vmem:[%s12142_s5 + $0x46c] sm:$0xf]  ;;  %vm4747_vm9 = vweird.f32 %v11361_v0  ;;  %v6483_v28 = vld [vmem:[%s12142_s5 + $0x968] sm:$0xf] }
 0x284   :  { %4185 = vmatpush.bf16.msrb.mxu2 %v5708_v15  ;;  %4211 = vmatpush.bf16.msra.mxu0 %v5712_v23  ;;  %v7798_v15 = vld [vmem:[%s12142_s5 + $0xde4] sm:$0xf0]  ;;  %v5845_v43 = vld [vmem:[%s12142_s5 + $0x4e8] sm:$0xf0] }
 0x285   :  { %v6099_v23 = vld [vmem:[%s12142_s5 + $0x668] sm:$0xf]  ;;  %v6996_v30 = vor.u32 %v7798_v15, %v6995_v14  ;;  %v4754_v8 = vor.u32 1.1754944e-38, %v4753_v53  ;;  %v5848_v11 = vor.u32 %v7494_v62, %v5845_v43  ;;  %v7462_v22 = vld [vmem:[%s12142_s5 + $0x36c] sm:$0xf] }
 0x286   :  { %4200 = vmatpush.bf16.msrb.mxu3 %v6476_v17  ;;  %4226 = vmatpush.bf16.msra.mxu1 %v6480_v36  ;;  %v7924_v33 = vpop.eup %7923  ;;  %v5971_v17 = vld [vmem:[%s12142_s5 + $0x568] sm:$0xf]  ;;  %v6100_v37 = vor.u32 %v7574_v24, %v6099_v23  ;;  %v5717_v23 = vld [vmem:[%s12142_s5 + $0x3e8] sm:$0xf0]  ;;  %v949_v24 = vperm.slane %v11445_v34, 0 }
 0x287   :  { %v11408_v16 = vadd.f32 1.0, %v7924_v33  ;;  %v5972_v55 = vor.u32 %v7542_v39, %v5971_v17  ;;  %v5715_v15 = vld [vmem:[%s12142_s5 + $0x368] sm:$0xf]  ;;  %v7654_v35 = vld [vmem:[%s12142_s5 + $0x96c] sm:$0xf] }
 0x288   :  { %4186 = vmatpush.bf16.msrb.mxu2 %v5580_v41  ;;  %4212 = vmatpush.bf16.msra.mxu0 %v5584_v44  ;;  %v5973_v41 = vld [vmem:[%s12142_s5 + $0x5e8] sm:$0xf0]  ;;  %v6739_v44 = vld [vmem:[%s12142_s5 + $0xb68] sm:$0xf]  ;;  %v7863_v43 = vld [vmem:[%s12142_s5 + $0xfec] sm:$0xf0] }
 0x289   :  { %v11422_v29 = vpop.eup %7925  ;;  %7927 = vrcp.f32 %v11408_v16  ;;  %v6740_v42 = vor.u32 %v7734_v27, %v6739_v44  ;;  %v4736_v26 = vand.u32 2147483647, %v11408_v16  ;;  %v7670_v32 = vld [vmem:[%s12142_s5 + $0x9e4] sm:$0xf0]  ;;  %v6485_v17 = vld [vmem:[%s12142_s5 + $0x9e8] sm:$0xf0]  ;;  %vm4732_vm13 = vweird.f32 %v11408_v16 }
 0x28a   :  { %4201 = vmatpush.bf16.msrb.mxu3 %v6348_v51  ;;  %4227 = vmatpush.bf16.msra.mxu1 %v6352_v56  ;;  %v4743_v36 = vmul.f32 %v11422_v29, %v11361_v0  ;;  %v4021_v10 = vpop.f32.mrf.mxu1  ;;  %v950_v51 = vperm.slane %v11445_v34, 1  ;;  %v5843_v56 = vld [vmem:[%s12142_s5 + $0x468] sm:$0xf]  ;;  %vm4748_vm8 = vweird.f32 %v11422_v29  ;;  %v5589_v44 = vld [vmem:[%s12142_s5 + $0x2e8] sm:$0xf0]  ;;  %v6484_v53 = vor.u32 %v7670_v32, %v6483_v28 }
 0x28b   :  { %vm11493_vm10 = vmor %vm4747_vm9, %vm4748_vm8  ;;  %v5844_v2 = vor.u32 %v7510_v18, %v5843_v56  ;;  %v5587_v39 = vld [vmem:[%s12142_s5 + $0x268] sm:$0xf]  ;;  %vm4737_vm15 = vcmp.eq.f32.partialorder %v4736_v26, 8.507059e+37  ;;  %v7622_v56 = vld [vmem:[%s12142_s5 + $0x86c] sm:$0xf] }
 0x28c   :  { %4187 = vmatpush.bf16.msrb.mxu2 %v5452_v1  ;;  %4213 = vmatpush.bf16.msra.mxu0 %v5456_v3  ;;  %v4744_v45 = vsub.f32 1.0, %v4743_v36  ;;  %v6357_v18 = vld [vmem:[%s12142_s5 + $0x8e8] sm:$0xf0]  ;;  %v6237_v26 = vld [vmem:[%s12142_s5 + $0x7f0] sm:$0xf0] }
 0x28d   :  { %4202 = vmatmul.bf16.vlgmr.msrb.gmra.mxu3 %v8731_v46  ;;  %4228 = vmatmul.bf16.vlgmr.msra.gmra.mxu1 %v8731_v46  ;;  %v5461_v7 = vld [vmem:[%s12142_s5 + $0x1e8] sm:$0xf0]  ;;  %v7799_v32 = vld [vmem:[%s12142_s5 + $0xdec] sm:$0xf0] }
 0x28e   :  { %4246 = vmatpush.bf16.msra.mxu3 %v7252_v59  ;;  %4272 = vmatpush.bf16.msrb.mxu1 %v7256_v60  ;;  %v4745_v58 = vmul.f32 %v11422_v29, %v4744_v45  ;;  %v4751_v59 = vand.u32 2147483647, %v11361_v0  ;;  %v5976_v60 = vor.u32 %v7526_v40, %v5973_v41  ;;  %v6744_v0 = vor.u32 %v7718_v50, %v6741_v52  ;;  %v7446_v40 = vld [vmem:[%s12142_s5 + $0x2e4] sm:$0xf0] }
 0x28f   :  { %v11481_v63 = vpop.eup %7927  ;;  %v7638_v50 = vld [vmem:[%s12142_s5 + $0x8e4] sm:$0xf0] }
 0x290   :  { %4188 = vmatpush.bf16.msrb.mxu2 %v5324_v13  ;;  %4214 = vmatpush.bf16.msra.mxu0 %v5328_v57  ;;  %v4746_v1 = vadd.f32 %v11422_v29, %v4745_v58  ;;  %v4728_v3 = vmul.f32 %v11481_v63, %v11408_v16  ;;  %v11497_v49 = vpop.f32.mrf.mxu3  ;;  %v4008_v9 = vpop.f32.mrf.mxu0  ;;  %vm4752_vm11 = vcmp.eq.f32.partialorder %v4751_v59, 8.507059e+37  ;;  %vm4733_vm12 = vweird.f32 %v11481_v63  ;;  %v7259_v58 = vld [vmem:[%s12142_s5 + $0xf70] sm:$0xf] }
 0x291   :  { %v4009_v14 = vadd.f32 %v4008_v9, %v950_v51  ;;  %vm4734_vm14 = vmor %vm4732_vm13, %vm4733_vm12 }
 0x292   :  { %4247 = vmatpush.bf16.msra.mxu3 %v7124_v12  ;;  %4273 = vmatpush.bf16.msrb.mxu1 %v7128_v61  ;;  %v7686_v12 = vld [vmem:[%s12142_s5 + $0xa6c] sm:$0xf]  ;;  %v4750_v13 = vsel %vm11493_vm10, %v11422_v29, %v4746_v1  ;;  %v4729_v57 = vsub.f32 1.0, %v4728_v3  ;;  %v6612_v29 = vor.u32 %v7702_v6, %v6611_v4  ;;  %v7261_v1 = vld [vmem:[%s12142_s5 + $0xff0] sm:$0xf0] }
 0x293   :  { %4189 = vmatmul.bf16.vlgmr.msrb.gmra.mxu2 %v8771_v5  ;;  %4215 = vmatmul.bf16.vlgmr.msra.gmra.mxu0 %v8771_v5  ;;  %v6613_v61 = vld [vmem:[%s12142_s5 + $0xae8] sm:$0xf0]  ;;  %v4755_v33 = vsel %vm4752_vm11, %v4754_v8, %v4750_v13  ;;  %v4022_v48 = vadd.f32 %v4021_v10, %v4009_v14  ;;  %v5459_v3 = vld [vmem:[%s12142_s5 + $0x168] sm:$0xf]  ;;  %v7133_v13 = vld [vmem:[%s12142_s5 + $0xef0] sm:$0xf0] }
 0x294   :  { %4233 = vmatpush.bf16.msra.mxu2 %v6228_v20  ;;  %4259 = vmatpush.bf16.msrb.mxu0 %v6232_v21  ;;  %v4738_v20 = vand.u32 2147483648, %v11408_v16  ;;  %v4023_v21 = vpop.f32.mrf.mxu1  ;;  %5012 = vst [vmem:[%s12146_s7 + $0x78] sm:$0xff] %v4755_v33  ;;  %v4730_v25 = vmul.f32 %v11481_v63, %v4729_v57  ;;  %v7430_v16 = vld [vmem:[%s12142_s5 + $0x26c] sm:$0xf]  ;;  %v5331_v33 = vld [vmem:[%s12142_s5 + $0x68] sm:$0xf] }
 0x295   :  { %v5592_v62 = vor.u32 %v7430_v16, %v5589_v44  ;;  %v7398_v6 = vld [vmem:[%s12142_s5 + $0x16c] sm:$0xf]  ;;  %v6109_v16 = vld [vmem:[%s12142_s5 + $0x6f0] sm:$0xf0]  ;;  %v6875_v44 = vld [vmem:[%s12142_s5 + $0xc70] sm:$0xf] }
 0x296   :  { %4248 = vmatpush.bf16.msra.mxu3 %v6996_v30  ;;  %4274 = vmatpush.bf16.msrb.mxu1 %v7000_v31  ;;  %v6616_v30 = vor.u32 %v7686_v12, %v6613_v61  ;;  %v5716_v31 = vor.u32 %v7478_v19, %v5715_v15  ;;  %v4731_v36 = vadd.f32 %v11481_v63, %v4730_v25  ;;  %v4739_v10 = vor.u32 1.1754944e-38, %v4738_v20  ;;  %v3982_v41 = vpop.f32.mrf.mxu2  ;;  %v7831_v12 = vld [vmem:[%s12142_s5 + $0xeec] sm:$0xf0]  ;;  %v7815_v61 = vld [vmem:[%s12142_s5 + $0xe74] sm:$0xf] }
 0x297   :  { %v3983_v45 = vadd.f32 %v3982_v41, %v949_v24  ;;  %v5464_v15 = vor.u32 %v7398_v6, %v5461_v7  ;;  %v7382_v20 = vld [vmem:[%s12142_s5 + $0xe4] sm:$0xf0]  ;;  %v7366_v21 = vld [vmem:[%s12142_s5 + $0x6c] sm:$0xf]  ;;  %v7607_v24 = vld [vmem:[%s12142_s5 + $0x7ec] sm:$0xf0]  ;;  %v7136_v28 = vor.u32 %v7815_v61, %v7133_v13 }
 0x298   :  { %4234 = vmatpush.bf16.msra.mxu2 %v6100_v37  ;;  %4260 = vmatpush.bf16.msrb.mxu0 %v6104_v38  ;;  %v7290_v37 = vmul.f32 -1.442695, %v4022_v48  ;;  %v5720_v38 = vor.u32 %v7462_v22, %v5717_v23  ;;  %v4735_v27 = vsel %vm4734_vm14, %v11481_v63, %v4731_v36  ;;  %v4010_v51 = vpop.f32.mrf.mxu0  ;;  %v7847_v63 = vld [vmem:[%s12142_s5 + $0xf74] sm:$0xf]  ;;  %v5333_v22 = vld [vmem:[%s12142_s5 + $0xe8] sm:$0xf0] }
 0x299   :  { %v4740_v52 = vsel %vm4737_vm15, %v4739_v10, %v4735_v27  ;;  %v3996_v59 = vadd.f32 %v11497_v49, %v3983_v45  ;;  %v7131_v49 = vld [vmem:[%s12142_s5 + $0xe70] sm:$0xf]  ;;  %v7591_v25 = vld [vmem:[%s12142_s5 + $0x774] sm:$0xf] }
 0x29a   :  { %4249 = vmatpush.bf16.msra.mxu3 %v6868_v47  ;;  %4275 = vmatpush.bf16.msrb.mxu1 %v6872_v54  ;;  %7929 = vpow2.f32 %v7290_v37  ;;  %v6355_v47 = vld [vmem:[%s12142_s5 + $0x868] sm:$0xf]  ;;  %v6488_v54 = vor.u32 %v7654_v35, %v6485_v17  ;;  %5011 = vst [vmem:[%s12146_s7 + $0x70] sm:$0xff] %v4740_v52  ;;  %v6235_v23 = vld [vmem:[%s12142_s5 + $0x770] sm:$0xf]  ;;  %v7132_v48 = vor.u32 %v7831_v12, %v7131_v49 }
 0x29b   :  { %v7289_v4 = vmul.f32 -1.442695, %v3996_v59  ;;  %v6356_v8 = vor.u32 %v7638_v50, %v6355_v47  ;;  %v7783_v35 = vld [vmem:[%s12142_s5 + $0xd74] sm:$0xf]  ;;  %v6236_v36 = vor.u32 %v7607_v24, %v6235_v23  ;;  %v6240_v37 = vor.u32 %v7591_v25, %v6237_v26  ;;  %v7767_v50 = vld [vmem:[%s12142_s5 + $0xcec] sm:$0xf0] }
 0x29c   :  { %4235 = vmatpush.bf16.msra.mxu2 %v5972_v55  ;;  %4261 = vmatpush.bf16.msrb.mxu0 %v5976_v60  ;;  %v3997_v55 = vpop.f32.mrf.mxu3  ;;  %v5588_v60 = vor.u32 %v7446_v40, %v5587_v39  ;;  %v6107_v39 = vld [vmem:[%s12142_s5 + $0x670] sm:$0xf]  ;;  %v7559_v41 = vld [vmem:[%s12142_s5 + $0x674] sm:$0xf] }
 0x29d   :  { %7931 = vpow2.f32 %v7289_v4  ;;  %v7575_v40 = vld [vmem:[%s12142_s5 + $0x6ec] sm:$0xf0]  ;;  %v7751_v52 = vld [vmem:[%s12142_s5 + $0xc74] sm:$0xf]  ;;  %v6112_v51 = vor.u32 %v7559_v41, %v6109_v16 }
 0x29e   :  { %4250 = vmatpush.bf16.msra.mxu3 %v6740_v42  ;;  %4276 = vmatpush.bf16.msrb.mxu1 %v6744_v0  ;;  %v7414_v42 = vld [vmem:[%s12142_s5 + $0x1e4] sm:$0xf0]  ;;  %v6360_v0 = vor.u32 %v7622_v56, %v6357_v18  ;;  %v3984_v19 = vpop.f32.mrf.mxu2  ;;  %v6108_v55 = vor.u32 %v7575_v40, %v6107_v39  ;;  %v5979_v56 = vld [vmem:[%s12142_s5 + $0x570] sm:$0xf]  ;;  %v7495_v12 = vld [vmem:[%s12142_s5 + $0x474] sm:$0xf] }
 0x29f   :  { %v5460_v14 = vor.u32 %v7414_v42, %v5459_v3  ;;  %v7543_v18 = vld [vmem:[%s12142_s5 + $0x5ec] sm:$0xf0]  ;;  %v7719_v3 = vld [vmem:[%s12142_s5 + $0xb74] sm:$0xf]  ;;  %v951_v40 = vperm.slane %v11445_v34, 2 }
 0x2a0   :  { %4236 = vmatpush.bf16.msra.mxu2 %v5844_v2  ;;  %4262 = vmatpush.bf16.msrb.mxu0 %v5848_v11  ;;  %v7930_v9 = vpop.eup %7929  ;;  %v7260_v2 = vor.u32 %v7863_v43, %v7259_v58  ;;  %v7264_v11 = vor.u32 %v7847_v63, %v7261_v1  ;;  %v7527_v58 = vld [vmem:[%s12142_s5 + $0x574] sm:$0xf]  ;;  %v7735_v43 = vld [vmem:[%s12142_s5 + $0xbec] sm:$0xf0]  ;;  %v6876_v1 = vor.u32 %v7767_v50, %v6875_v44 }
 0x2a1   :  { %v11609_v57 = vadd.f32 1.0, %v7930_v9  ;;  %v6749_v42 = vld [vmem:[%s12142_s5 + $0xbf0] sm:$0xf0]  ;;  %v5980_v7 = vor.u32 %v7543_v18, %v5979_v56  ;;  %v7511_v49 = vld [vmem:[%s12142_s5 + $0x4ec] sm:$0xf0] }
 0x2a2   :  { %4251 = vmatpush.bf16.msra.mxu3 %v6612_v29  ;;  %4277 = vmatpush.bf16.msrb.mxu1 %v6616_v30  ;;  %v5332_v29 = vor.u32 %v7382_v20, %v5331_v33  ;;  %v5336_v30 = vor.u32 %v7366_v21, %v5333_v22  ;;  %v5853_v61 = vld [vmem:[%s12142_s5 + $0x4f0] sm:$0xf0]  ;;  %v6619_v33 = vld [vmem:[%s12142_s5 + $0xa70] sm:$0xf] }
 0x2a3   :  { %7933 = vrcp.f32 %v11609_v57  ;;  %v7932_v17 = vpop.eup %7931  ;;  %v4783_v4 = vand.u32 2147483648, %v11609_v57  ;;  %vm4777_vm1 = vweird.f32 %v11609_v57  ;;  %v7703_v20 = vld [vmem:[%s12142_s5 + $0xaec] sm:$0xf0]  ;;  %v5856_v26 = vor.u32 %v7495_v12, %v5853_v61  ;;  %v5725_v39 = vld [vmem:[%s12142_s5 + $0x3f0] sm:$0xf0] }
 0x2a4   :  { %4237 = vmatpush.bf16.msra.mxu2 %v5716_v31  ;;  %4263 = vmatpush.bf16.msrb.mxu0 %v5720_v38  ;;  %v7003_v31 = vld [vmem:[%s12142_s5 + $0xd70] sm:$0xf]  ;;  %v7005_v38 = vld [vmem:[%s12142_s5 + $0xdf0] sm:$0xf0]  ;;  %v11656_v10 = vadd.f32 1.0, %v7932_v17 }
 0x2a5   :  { %v7004_v45 = vor.u32 %v7799_v32, %v7003_v31  ;;  %v7008_v47 = vor.u32 %v7783_v35, %v7005_v38  ;;  %v4784_v22 = vor.u32 1.1754944e-38, %v4783_v4  ;;  %v5723_v32 = vld [vmem:[%s12142_s5 + $0x370] sm:$0xf]  ;;  %v7463_v38 = vld [vmem:[%s12142_s5 + $0x374] sm:$0xf] }
 0x2a6   :  { %4252 = vmatpush.bf16.msra.mxu3 %v6484_v53  ;;  %4278 = vmatpush.bf16.msrb.mxu1 %v6488_v54  ;;  %7935 = vrcp.f32 %v11656_v10  ;;  %v6877_v53 = vld [vmem:[%s12142_s5 + $0xcf0] sm:$0xf0]  ;;  %v7479_v35 = vld [vmem:[%s12142_s5 + $0x3ec] sm:$0xf0]  ;;  %v4766_v16 = vand.u32 2147483647, %v11656_v10  ;;  %vm4762_vm5 = vweird.f32 %v11656_v10  ;;  %v5728_v56 = vor.u32 %v7463_v38, %v5725_v39 }
 0x2a7   :  { %v6880_v6 = vor.u32 %v7751_v52, %v6877_v53  ;;  %v5724_v50 = vor.u32 %v7479_v35, %v5723_v32  ;;  %v7671_v52 = vld [vmem:[%s12142_s5 + $0x9ec] sm:$0xf0]  ;;  %v7655_v53 = vld [vmem:[%s12142_s5 + $0x974] sm:$0xf]  ;;  %v7864_v61 = vld [vmem:[%s12142_s5 + $0xff4] sm:$0xf0] }
 0x2a8   :  { %4238 = vmatpush.bf16.msra.mxu2 %v5588_v60  ;;  %4264 = vmatpush.bf16.msrb.mxu0 %v5592_v62  ;;  %v5981_v60 = vld [vmem:[%s12142_s5 + $0x5f0] sm:$0xf0]  ;;  %v6747_v62 = vld [vmem:[%s12142_s5 + $0xb70] sm:$0xf]  ;;  %vm4767_vm7 = vcmp.eq.f32.partialorder %v4766_v16, 8.507059e+37 }
 0x2a9   :  { %v11667_v27 = vpop.eup %7933  ;;  %v6748_v19 = vor.u32 %v7735_v43, %v6747_v62  ;;  %v5595_v18 = vld [vmem:[%s12142_s5 + $0x270] sm:$0xf]  ;;  %v5597_v62 = vld [vmem:[%s12142_s5 + $0x2f0] sm:$0xf0]  ;;  %v6243_v39 = vld [vmem:[%s12142_s5 + $0x778] sm:$0xf] }
 0x2aa   :  { %4253 = vmatpush.bf16.msra.mxu3 %v6356_v8  ;;  %4279 = vmatpush.bf16.msrb.mxu1 %v6360_v0  ;;  %v4773_v54 = vmul.f32 %v11667_v27, %v11609_v57  ;;  %v4073_v59 = vpop.f32.mrf.mxu1  ;;  %v952_v8 = vperm.slane %v11445_v34, 3  ;;  %v5851_v0 = vld [vmem:[%s12142_s5 + $0x470] sm:$0xf]  ;;  %vm4778_vm0 = vweird.f32 %v11667_v27  ;;  %v5469_v21 = vld [vmem:[%s12142_s5 + $0x1f0] sm:$0xf0] }
 0x2ab   :  { %vm11736_vm2 = vmor %vm4777_vm1, %vm4778_vm0  ;;  %v5852_v25 = vor.u32 %v7511_v49, %v5851_v0  ;;  %v7623_v0 = vld [vmem:[%s12142_s5 + $0x874] sm:$0xf]  ;;  %v6245_v16 = vld [vmem:[%s12142_s5 + $0x7f8] sm:$0xf0] }
 0x2ac   :  { %4239 = vmatpush.bf16.msra.mxu2 %v5460_v14  ;;  %4265 = vmatpush.bf16.msrb.mxu0 %v5464_v15  ;;  %v4774_v63 = vsub.f32 1.0, %v4773_v54  ;;  %v11724_v13 = vpop.eup %7935  ;;  %v6493_v54 = vld [vmem:[%s12142_s5 + $0x9f0] sm:$0xf0] }
 0x2ad   :  { %4254 = vmatmul.bf16.vlgmr.msra.gmra.mxu3 %v8731_v46  ;;  %4280 = vmatmul.bf16.vlgmr.msrb.gmra.mxu1 %v8731_v46  ;;  %v4758_v15 = vmul.f32 %v11724_v13, %v11656_v10  ;;  %vm4763_vm4 = vweird.f32 %v11724_v13  ;;  %v6365_v49 = vld [vmem:[%s12142_s5 + $0x8f0] sm:$0xf0] }
 0x2ae   :  { %4298 = vmatpush.bf16.msrb.mxu3 %v7260_v2  ;;  %4324 = vmatpush.bf16.msra.mxu1 %v7264_v11  ;;  %v4775_v9 = vmul.f32 %v11667_v27, %v4774_v63  ;;  %v4781_v2 = vand.u32 2147483647, %v11609_v57  ;;  %v5984_v11 = vor.u32 %v7527_v58, %v5981_v60  ;;  %v6752_v57 = vor.u32 %v7719_v3, %v6749_v42  ;;  %v7447_v58 = vld [vmem:[%s12142_s5 + $0x2ec] sm:$0xf0]  ;;  %vm4764_vm6 = vmor %vm4762_vm5, %vm4763_vm4  ;;  %v5341_v38 = vld [vmem:[%s12142_s5 + $0xf0] sm:$0xf0] }
 0x2af   :  { %v7639_v3 = vld [vmem:[%s12142_s5 + $0x8ec] sm:$0xf0] }
 0x2b0   :  { %4240 = vmatpush.bf16.msra.mxu2 %v5332_v29  ;;  %4266 = vmatpush.bf16.msrb.mxu0 %v5336_v30  ;;  %v4776_v14 = vadd.f32 %v11667_v27, %v4775_v9  ;;  %v11740_v23 = vpop.f32.mrf.mxu3  ;;  %v4060_v24 = vpop.f32.mrf.mxu0  ;;  %vm4782_vm3 = vcmp.eq.f32.partialorder %v4781_v2, 8.507059e+37  ;;  %v4759_v30 = vsub.f32 1.0, %v4758_v15  ;;  %v7267_v9 = vld [vmem:[%s12142_s5 + $0xf78] sm:$0xf]  ;;  %v5467_v15 = vld [vmem:[%s12142_s5 + $0x170] sm:$0xf] }
 0x2b1   :  { %v4061_v31 = vadd.f32 %v4060_v24, %v952_v8 }
 0x2b2   :  { %4299 = vmatpush.bf16.msrb.mxu3 %v7132_v48  ;;  %4325 = vmatpush.bf16.msra.mxu1 %v7136_v28  ;;  %v7687_v48 = vld [vmem:[%s12142_s5 + $0xa74] sm:$0xf]  ;;  %v4780_v29 = vsel %vm11736_vm2, %v11667_v27, %v4776_v14  ;;  %v4760_v41 = vmul.f32 %v11724_v13, %v4759_v30  ;;  %v6491_v27 = vld [vmem:[%s12142_s5 + $0x970] sm:$0xf]  ;;  %v7269_v14 = vld [vmem:[%s12142_s5 + $0xff8] sm:$0xf0] }
 0x2b3   :  { %4241 = vmatmul.bf16.vlgmr.msra.gmra.mxu2 %v8771_v5  ;;  %4267 = vmatmul.bf16.vlgmr.msrb.gmra.mxu0 %v8771_v5  ;;  %v6621_v28 = vld [vmem:[%s12142_s5 + $0xaf0] sm:$0xf0]  ;;  %v4785_v17 = vsel %vm4782_vm3, %v4784_v22, %v4780_v29  ;;  %v4074_v44 = vadd.f32 %v4073_v59, %v4061_v31  ;;  %v6492_v4 = vor.u32 %v7671_v52, %v6491_v27  ;;  %v7141_v29 = vld [vmem:[%s12142_s5 + $0xef8] sm:$0xf0]  ;;  %v7800_v52 = vld [vmem:[%s12142_s5 + $0xdf4] sm:$0xf0] }
 0x2b4   :  { %4285 = vmatpush.bf16.msrb.mxu2 %v6236_v36  ;;  %4311 = vmatpush.bf16.msra.mxu0 %v6240_v37  ;;  %v4768_v36 = vand.u32 2147483648, %v11656_v10  ;;  %v4075_v37 = vpop.f32.mrf.mxu1  ;;  %5014 = vst [vmem:[%s12146_s7 + $0x88] sm:$0xff] %v4785_v17  ;;  %v7431_v10 = vld [vmem:[%s12142_s5 + $0x274] sm:$0xf]  ;;  %v5339_v17 = vld [vmem:[%s12142_s5 + $0x70] sm:$0xf] }
 0x2b5   :  { %v5600_v12 = vor.u32 %v7431_v10, %v5597_v62  ;;  %v7367_v37 = vld [vmem:[%s12142_s5 + $0x74] sm:$0xf]  ;;  %v6117_v10 = vld [vmem:[%s12142_s5 + $0x6f8] sm:$0xf0]  ;;  %v6883_v62 = vld [vmem:[%s12142_s5 + $0xc78] sm:$0xf] }
 0x2b6   :  { %4300 = vmatpush.bf16.msrb.mxu3 %v7004_v45  ;;  %4326 = vmatpush.bf16.msra.mxu1 %v7008_v47  ;;  %v6620_v45 = vor.u32 %v7703_v20, %v6619_v33  ;;  %v6624_v47 = vor.u32 %v7687_v48, %v6621_v28  ;;  %v4769_v59 = vor.u32 1.1754944e-38, %v4768_v36  ;;  %v4034_v60 = vpop.f32.mrf.mxu2  ;;  %v7399_v20 = vld [vmem:[%s12142_s5 + $0x174] sm:$0xf]  ;;  %v7832_v48 = vld [vmem:[%s12142_s5 + $0xef4] sm:$0xf0] }
 0x2b7   :  { %v4035_v63 = vadd.f32 %v4034_v60, %v951_v40  ;;  %v7816_v28 = vld [vmem:[%s12142_s5 + $0xe7c] sm:$0xf]  ;;  %v5472_v32 = vor.u32 %v7399_v20, %v5469_v21  ;;  %v7383_v36 = vld [vmem:[%s12142_s5 + $0xec] sm:$0xf0]  ;;  %v7608_v40 = vld [vmem:[%s12142_s5 + $0x7f4] sm:$0xf0] }
 0x2b8   :  { %4286 = vmatpush.bf16.msrb.mxu2 %v6108_v55  ;;  %4312 = vmatpush.bf16.msra.mxu0 %v6112_v51  ;;  %v4761_v55 = vadd.f32 %v11724_v13, %v4760_v41  ;;  %v7292_v51 = vmul.f32 -1.442695, %v4074_v44  ;;  %v4062_v8 = vpop.f32.mrf.mxu0  ;;  %v7592_v41 = vld [vmem:[%s12142_s5 + $0x77c] sm:$0xf]  ;;  %v7144_v27 = vor.u32 %v7816_v28, %v7141_v29 }
 0x2b9   :  { %v4048_v2 = vadd.f32 %v11740_v23, %v4035_v63  ;;  %v7139_v23 = vld [vmem:[%s12142_s5 + $0xe78] sm:$0xf]  ;;  %v7560_v60 = vld [vmem:[%s12142_s5 + $0x67c] sm:$0xf] }
 0x2ba   :  { %4301 = vmatpush.bf16.msrb.mxu3 %v6876_v1  ;;  %4327 = vmatpush.bf16.msra.mxu1 %v6880_v6  ;;  %v4765_v43 = vsel %vm4764_vm6, %v11724_v13, %v4761_v55  ;;  %7937 = vpow2.f32 %v7292_v51  ;;  %v6363_v1 = vld [vmem:[%s12142_s5 + $0x870] sm:$0xf]  ;;  %v6496_v6 = vor.u32 %v7655_v53, %v6493_v54  ;;  %v7848_v13 = vld [vmem:[%s12142_s5 + $0xf7c] sm:$0xf]  ;;  %v7140_v44 = vor.u32 %v7832_v48, %v7139_v23  ;;  %v7512_v23 = vld [vmem:[%s12142_s5 + $0x4f4] sm:$0xf0] }
 0x2bb   :  { %v4770_v42 = vsel %vm4767_vm7, %v4769_v59, %v4765_v43  ;;  %v7291_v33 = vmul.f32 -1.442695, %v4048_v2  ;;  %v6364_v22 = vor.u32 %v7639_v3, %v6363_v1  ;;  %v7784_v53 = vld [vmem:[%s12142_s5 + $0xd7c] sm:$0xf]  ;;  %v6244_v55 = vor.u32 %v7608_v40, %v6243_v39  ;;  %v7768_v3 = vld [vmem:[%s12142_s5 + $0xcf4] sm:$0xf0] }
 0x2bc   :  { %4287 = vmatpush.bf16.msrb.mxu2 %v5980_v7  ;;  %4313 = vmatpush.bf16.msra.mxu0 %v5984_v11  ;;  %v4049_v7 = vpop.f32.mrf.mxu3  ;;  %5013 = vst [vmem:[%s12146_s7 + $0x80] sm:$0xff] %v4770_v42  ;;  %v5596_v11 = vor.u32 %v7447_v58, %v5595_v18  ;;  %v6248_v51 = vor.u32 %v7592_v41, %v6245_v16  ;;  %v6115_v18 = vld [vmem:[%s12142_s5 + $0x678] sm:$0xf]  ;;  %v7752_v42 = vld [vmem:[%s12142_s5 + $0xc7c] sm:$0xf] }
 0x2bd   :  { %7939 = vpow2.f32 %v7291_v33  ;;  %v7576_v58 = vld [vmem:[%s12142_s5 + $0x6f4] sm:$0xf0]  ;;  %v6120_v8 = vor.u32 %v7560_v60, %v6117_v10  ;;  %v7496_v48 = vld [vmem:[%s12142_s5 + $0x47c] sm:$0xf] }
 0x2be   :  { %4302 = vmatpush.bf16.msrb.mxu3 %v6748_v19  ;;  %4328 = vmatpush.bf16.msra.mxu1 %v6752_v57  ;;  %v7415_v19 = vld [vmem:[%s12142_s5 + $0x1ec] sm:$0xf0]  ;;  %v6368_v57 = vor.u32 %v7623_v0, %v6365_v49  ;;  %v4036_v35 = vpop.f32.mrf.mxu2  ;;  %v6116_v7 = vor.u32 %v7576_v58, %v6115_v18  ;;  %v5987_v0 = vld [vmem:[%s12142_s5 + $0x578] sm:$0xf]  ;;  %v5861_v28 = vld [vmem:[%s12142_s5 + $0x4f8] sm:$0xf0] }
 0x2bf   :  { %v5468_v31 = vor.u32 %v7415_v19, %v5467_v15  ;;  %v7544_v49 = vld [vmem:[%s12142_s5 + $0x5f4] sm:$0xf0]  ;;  %v7720_v15 = vld [vmem:[%s12142_s5 + $0xb7c] sm:$0xf]  ;;  %v5864_v16 = vor.u32 %v7496_v48, %v5861_v28  ;;  %v953_v58 = vperm.slane %v11445_v34, 4 }
 0x2c0   :  { %4288 = vmatpush.bf16.msrb.mxu2 %v5852_v25  ;;  %4314 = vmatpush.bf16.msra.mxu0 %v5856_v26  ;;  %v7938_v24 = vpop.eup %7937  ;;  %v7268_v25 = vor.u32 %v7864_v61, %v7267_v9  ;;  %v7272_v26 = vor.u32 %v7848_v13, %v7269_v14  ;;  %v7528_v9 = vld [vmem:[%s12142_s5 + $0x57c] sm:$0xf]  ;;  %v7736_v61 = vld [vmem:[%s12142_s5 + $0xbf4] sm:$0xf0]  ;;  %v6884_v14 = vor.u32 %v7768_v3, %v6883_v62 }
 0x2c1   :  { %v11852_v30 = vadd.f32 1.0, %v7938_v24  ;;  %v6757_v19 = vld [vmem:[%s12142_s5 + $0xbf8] sm:$0xf0]  ;;  %v5988_v21 = vor.u32 %v7544_v49, %v5987_v0  ;;  %v7672_v3 = vld [vmem:[%s12142_s5 + $0x9f4] sm:$0xf0] }
 0x2c2   :  { %4303 = vmatpush.bf16.msrb.mxu3 %v6620_v45  ;;  %4329 = vmatpush.bf16.msra.mxu1 %v6624_v47  ;;  %v5340_v45 = vor.u32 %v7383_v36, %v5339_v17  ;;  %v5344_v47 = vor.u32 %v7367_v37, %v5341_v38  ;;  %v6627_v17 = vld [vmem:[%s12142_s5 + $0xa78] sm:$0xf]  ;;  %v5733_v18 = vld [vmem:[%s12142_s5 + $0x3f8] sm:$0xf0] }
 0x2c3   :  { %7941 = vrcp.f32 %v11852_v30  ;;  %v7940_v54 = vpop.eup %7939  ;;  %v4813_v33 = vand.u32 2147483648, %v11852_v30  ;;  %vm4807_vm9 = vweird.f32 %v11852_v30  ;;  %v7704_v36 = vld [vmem:[%s12142_s5 + $0xaf4] sm:$0xf0]  ;;  %v7400_v28 = vld [vmem:[%s12142_s5 + $0x17c] sm:$0xf] }
 0x2c4   :  { %4289 = vmatpush.bf16.msrb.mxu2 %v5724_v50  ;;  %4315 = vmatpush.bf16.msra.mxu0 %v5728_v56  ;;  %v7011_v50 = vld [vmem:[%s12142_s5 + $0xd78] sm:$0xf]  ;;  %v7013_v56 = vld [vmem:[%s12142_s5 + $0xdf8] sm:$0xf0]  ;;  %v11899_v59 = vadd.f32 1.0, %v7940_v54 }
 0x2c5   :  { %v7012_v63 = vor.u32 %v7800_v52, %v7011_v50  ;;  %v7016_v1 = vor.u32 %v7784_v53, %v7013_v56  ;;  %v4814_v38 = vor.u32 1.1754944e-38, %v4813_v33  ;;  %v5731_v52 = vld [vmem:[%s12142_s5 + $0x378] sm:$0xf]  ;;  %v7464_v56 = vld [vmem:[%s12142_s5 + $0x37c] sm:$0xf] }
 0x2c6   :  { %4304 = vmatpush.bf16.msrb.mxu3 %v6492_v4  ;;  %4330 = vmatpush.bf16.msra.mxu1 %v6496_v6  ;;  %7943 = vrcp.f32 %v11899_v59  ;;  %v6885_v4 = vld [vmem:[%s12142_s5 + $0xcf8] sm:$0xf0]  ;;  %v7480_v53 = vld [vmem:[%s12142_s5 + $0x3f4] sm:$0xf0]  ;;  %v4796_v10 = vand.u32 2147483647, %v11899_v59  ;;  %vm4792_vm13 = vweird.f32 %v11899_v59 }
 0x2c7   :  { %v6888_v20 = vor.u32 %v7752_v42, %v6885_v4  ;;  %v7656_v42 = vld [vmem:[%s12142_s5 + $0x97c] sm:$0xf]  ;;  %v5603_v0 = vld [vmem:[%s12142_s5 + $0x278] sm:$0xf] }
 0x2c8   :  { %4290 = vmatpush.bf16.msrb.mxu2 %v5596_v11  ;;  %4316 = vmatpush.bf16.msra.mxu0 %v5600_v12  ;;  %v5989_v11 = vld [vmem:[%s12142_s5 + $0x5f8] sm:$0xf0]  ;;  %v6755_v12 = vld [vmem:[%s12142_s5 + $0xb78] sm:$0xf]  ;;  %vm4797_vm15 = vcmp.eq.f32.partialorder %v4796_v10, 8.507059e+37 }
 0x2c9   :  { %v11910_v43 = vpop.eup %7941  ;;  %v6756_v35 = vor.u32 %v7736_v61, %v6755_v12  ;;  %v6501_v4 = vld [vmem:[%s12142_s5 + $0x9f8] sm:$0xf0]  ;;  %v7448_v49 = vld [vmem:[%s12142_s5 + $0x2f4] sm:$0xf0] }
 0x2ca   :  { %4305 = vmatpush.bf16.msrb.mxu3 %v6364_v22  ;;  %4331 = vmatpush.bf16.msra.mxu1 %v6368_v57  ;;  %v4803_v6 = vmul.f32 %v11910_v43, %v11852_v30  ;;  %v4125_v2 = vpop.f32.mrf.mxu1  ;;  %v954_v22 = vperm.slane %v11445_v34, 5  ;;  %v5859_v57 = vld [vmem:[%s12142_s5 + $0x478] sm:$0xf]  ;;  %vm4808_vm8 = vweird.f32 %v11910_v43  ;;  %v5732_v34 = vor.u32 %v7480_v53, %v5731_v52 }
 0x2cb   :  { %vm11979_vm10 = vmor %vm4807_vm9, %vm4808_vm8  ;;  %v5860_v41 = vor.u32 %v7512_v23, %v5859_v57  ;;  %v5604_v23 = vor.u32 %v7448_v49, %v5603_v0  ;;  %v7416_v48 = vld [vmem:[%s12142_s5 + $0x1f4] sm:$0xf0] }
 0x2cc   :  { %4291 = vmatpush.bf16.msrb.mxu2 %v5468_v31  ;;  %4317 = vmatpush.bf16.msra.mxu0 %v5472_v32  ;;  %v4804_v13 = vsub.f32 1.0, %v4803_v6  ;;  %v11967_v29 = vpop.eup %7943 }
 0x2cd   :  { %4306 = vmatmul.bf16.vlgmr.msrb.gmra.mxu3 %v8731_v46  ;;  %4332 = vmatmul.bf16.vlgmr.msra.gmra.mxu1 %v8731_v46  ;;  %v4788_v32 = vmul.f32 %v11967_v29, %v11899_v59  ;;  %vm4793_vm12 = vweird.f32 %v11967_v29 }
 0x2ce   :  { %4350 = vmatpush.bf16.msra.mxu3 %v7268_v25  ;;  %4376 = vmatpush.bf16.msrb.mxu1 %v7272_v26  ;;  %v4805_v24 = vmul.f32 %v11910_v43, %v4804_v13  ;;  %v4811_v25 = vand.u32 2147483647, %v11852_v30  ;;  %v5992_v26 = vor.u32 %v7528_v9, %v5989_v11  ;;  %v6760_v30 = vor.u32 %v7720_v15, %v6757_v19  ;;  %vm4794_vm14 = vmor %vm4792_vm13, %vm4793_vm12  ;;  %v5605_v11 = vld [vmem:[%s12142_s5 + $0x2f8] sm:$0xf0] }
 0x2cf   :  { %v6504_v15 = vor.u32 %v7656_v42, %v6501_v4 }
 0x2d0   :  { %4292 = vmatpush.bf16.msrb.mxu2 %v5340_v45  ;;  %4318 = vmatpush.bf16.msra.mxu0 %v5344_v47  ;;  %v4806_v31 = vadd.f32 %v11910_v43, %v4805_v24  ;;  %v11983_v39 = vpop.f32.mrf.mxu3  ;;  %v4112_v40 = vpop.f32.mrf.mxu0  ;;  %vm4812_vm11 = vcmp.eq.f32.partialorder %v4811_v25, 8.507059e+37  ;;  %v4789_v47 = vsub.f32 1.0, %v4788_v32  ;;  %v6373_v25 = vld [vmem:[%s12142_s5 + $0x8f8] sm:$0xf0] }
 0x2d1   :  { %v4113_v50 = vadd.f32 %v4112_v40, %v954_v22  ;;  %v7624_v22 = vld [vmem:[%s12142_s5 + $0x87c] sm:$0xf] }
 0x2d2   :  { %4351 = vmatpush.bf16.msra.mxu3 %v7140_v44  ;;  %4377 = vmatpush.bf16.msrb.mxu1 %v7144_v27  ;;  %v7688_v44 = vld [vmem:[%s12142_s5 + $0xa7c] sm:$0xf]  ;;  %v4810_v45 = vsel %vm11979_vm10, %v11910_v43, %v4806_v31  ;;  %v4790_v60 = vmul.f32 %v11967_v29, %v4789_v47  ;;  %v6499_v43 = vld [vmem:[%s12142_s5 + $0x978] sm:$0xf] }
 0x2d3   :  { %4293 = vmatmul.bf16.vlgmr.msrb.gmra.mxu2 %v8771_v5  ;;  %4319 = vmatmul.bf16.vlgmr.msra.gmra.mxu0 %v8771_v5  ;;  %v6629_v27 = vld [vmem:[%s12142_s5 + $0xaf8] sm:$0xf0]  ;;  %v4815_v54 = vsel %vm4812_vm11, %v4814_v38, %v4810_v45  ;;  %v4126_v62 = vadd.f32 %v4125_v2, %v4113_v50  ;;  %v5347_v38 = vld [vmem:[%s12142_s5 + $0x78] sm:$0xf] }
 0x2d4   :  { %4337 = vmatpush.bf16.msra.mxu2 %v6244_v55  ;;  %4363 = vmatpush.bf16.msrb.mxu0 %v6248_v51  ;;  %v4798_v55 = vand.u32 2147483648, %v11899_v59  ;;  %v4127_v51 = vpop.f32.mrf.mxu1  ;;  %5016 = vst [vmem:[%s12146_s7 + $0x98] sm:$0xff] %v4815_v54  ;;  %v4791_v6 = vadd.f32 %v11967_v29, %v4790_v60  ;;  %v7432_v59 = vld [vmem:[%s12142_s5 + $0x27c] sm:$0xf] }
 0x2d5   :  { %v5608_v24 = vor.u32 %v7432_v59, %v5605_v11 }
 0x2d6   :  { %4352 = vmatpush.bf16.msra.mxu3 %v7012_v63  ;;  %4378 = vmatpush.bf16.msrb.mxu1 %v7016_v1  ;;  %v6628_v63 = vor.u32 %v7704_v36, %v6627_v17  ;;  %v6632_v1 = vor.u32 %v7688_v44, %v6629_v27  ;;  %v4799_v9 = vor.u32 1.1754944e-38, %v4798_v55  ;;  %v4086_v2 = vpop.f32.mrf.mxu2  ;;  %v4795_v12 = vsel %vm4794_vm14, %v11967_v29, %v4791_v6  ;;  %v5477_v29 = vld [vmem:[%s12142_s5 + $0x1f8] sm:$0xf0] }
 0x2d7   :  { %v4087_v61 = vadd.f32 %v4086_v2, %v953_v58  ;;  %v5480_v37 = vor.u32 %v7400_v28, %v5477_v29 }
 0x2d8   :  { %4338 = vmatpush.bf16.msra.mxu2 %v6116_v7  ;;  %4364 = vmatpush.bf16.msrb.mxu0 %v6120_v8  ;;  %v7294_v7 = vmul.f32 -1.442695, %v4126_v62  ;;  %v5736_v8 = vor.u32 %v7464_v56, %v5733_v18  ;;  %v4800_v13 = vsel %vm4797_vm15, %v4799_v9, %v4795_v12  ;;  %v4101_v19 = vpop.f32.mrf.mxu3  ;;  %v4114_v33 = vpop.f32.mrf.mxu0 }
 0x2d9   :  { %5015 = vst [vmem:[%s12146_s7 + $0x90] sm:$0xff] %v4800_v13  ;;  %v4100_v57 = vadd.f32 %v11983_v39, %v4087_v61 }
 0x2da   :  { %4353 = vmatpush.bf16.msra.mxu3 %v6884_v14  ;;  %4379 = vmatpush.bf16.msrb.mxu1 %v6888_v20  ;;  %7945 = vpow2.f32 %v7294_v7  ;;  %v6500_v14 = vor.u32 %v7672_v3, %v6499_v43  ;;  %v6371_v20 = vld [vmem:[%s12142_s5 + $0x878] sm:$0xf] }
 0x2db   :  { %v7293_v31 = vmul.f32 -1.442695, %v4100_v57 }
 0x2dc   :  { %4339 = vmatpush.bf16.msra.mxu2 %v5988_v21  ;;  %4365 = vmatpush.bf16.msrb.mxu0 %v5992_v26  ;;  %v7640_v21 = vld [vmem:[%s12142_s5 + $0x8f4] sm:$0xf0] }
 0x2dd   :  { %v5475_v26 = vld [vmem:[%s12142_s5 + $0x178] sm:$0xf]  ;;  %v6372_v32 = vor.u32 %v7640_v21, %v6371_v20  ;;  %7947 = vpow2.f32 %v7293_v31 }
 0x2de   :  { %4354 = vmatpush.bf16.msra.mxu3 %v6756_v35  ;;  %4380 = vmatpush.bf16.msrb.mxu1 %v6760_v30  ;;  %v6376_v35 = vor.u32 %v7624_v22, %v6373_v25  ;;  %v5476_v36 = vor.u32 %v7416_v48, %v5475_v26  ;;  %v7384_v30 = vld [vmem:[%s12142_s5 + $0xf4] sm:$0xf0]  ;;  %v4088_v40 = vpop.f32.mrf.mxu2 }
 0x2df   :  { %v5348_v44 = vor.u32 %v7384_v30, %v5347_v38  ;;  %v12099_v26 = vld [vmem:[%s12145_s6 + $0x18] sm:$0xff] }
 0x2e0   :  { %4340 = vmatpush.bf16.msra.mxu2 %v5860_v41  ;;  %4366 = vmatpush.bf16.msrb.mxu0 %v5864_v16  ;;  %v7946_v17 = vpop.eup %7945  ;;  %v7368_v41 = vld [vmem:[%s12142_s5 + $0x7c] sm:$0xf] }
 0x2e1   :  { %v4506_v39 = vadd.f32 1.0, %v7946_v17  ;;  %v5349_v16 = vld [vmem:[%s12142_s5 + $0xf8] sm:$0xf0] }
 0x2e2   :  { %4355 = vmatpush.bf16.msra.mxu3 %v6628_v63  ;;  %4381 = vmatpush.bf16.msrb.mxu1 %v6632_v1  ;;  %v5352_v27 = vor.u32 %v7368_v41, %v5349_v16 }
 0x2e3   :  { %7949 = vrcp.f32 %v4506_v39  ;;  %v7948_v45 = vpop.eup %7947  ;;  %v4843_v55 = vand.u32 2147483648, %v4506_v39  ;;  %v4841_v56 = vand.u32 2147483647, %v4506_v39  ;;  %vm4837_vm1 = vweird.f32 %v4506_v39 }
 0x2e4   :  { %4341 = vmatpush.bf16.msra.mxu2 %v5732_v34  ;;  %4367 = vmatpush.bf16.msrb.mxu0 %v5736_v8  ;;  %v4505_v47 = vadd.f32 1.0, %v7948_v45  ;;  %v957_v45 = vperm.slane %v12099_v26, 0 }
 0x2e5   :  { %v4844_v62 = vor.u32 1.1754944e-38, %v4843_v55  ;;  %vm4842_vm3 = vcmp.eq.f32.partialorder %v4841_v56, 8.507059e+37 }
 0x2e6   :  { %4356 = vmatpush.bf16.msra.mxu3 %v6500_v14  ;;  %4382 = vmatpush.bf16.msrb.mxu1 %v6504_v15  ;;  %7951 = vrcp.f32 %v4505_v47  ;;  %v4828_v42 = vand.u32 2147483648, %v4505_v47  ;;  %v4826_v8 = vand.u32 2147483647, %v4505_v47  ;;  %vm4822_vm5 = vweird.f32 %v4505_v47 }
 0x2e8   :  { %4342 = vmatpush.bf16.msra.mxu2 %v5604_v23  ;;  %4368 = vmatpush.bf16.msrb.mxu0 %v5608_v24  ;;  %v4829_v2 = vor.u32 1.1754944e-38, %v4828_v42  ;;  %vm4827_vm7 = vcmp.eq.f32.partialorder %v4826_v8, 8.507059e+37 }
 0x2e9   :  { %v7950_v50 = vpop.eup %7949 }
 0x2ea   :  { %4357 = vmatpush.bf16.msra.mxu3 %v6372_v32  ;;  %4383 = vmatpush.bf16.msrb.mxu1 %v6376_v35  ;;  %v4833_v52 = vmul.f32 %v7950_v50, %v4506_v39  ;;  %v4177_v53 = vpop.f32.mrf.mxu1  ;;  %vm4838_vm0 = vweird.f32 %v7950_v50  ;;  %v958_v32 = vperm.slane %v12099_v26, 1 }
 0x2eb   :  { %vm4839_vm2 = vmor %vm4837_vm1, %vm4838_vm0 }
 0x2ec   :  { %4343 = vmatpush.bf16.msra.mxu2 %v5476_v36  ;;  %4369 = vmatpush.bf16.msrb.mxu0 %v5480_v37  ;;  %v4834_v54 = vsub.f32 1.0, %v4833_v52  ;;  %v7952_v58 = vpop.eup %7951 }
 0x2ed   :  { %4358 = vmatmul.bf16.vlgmr.msra.gmra.mxu3 %v8731_v46  ;;  %4384 = vmatmul.bf16.vlgmr.msrb.gmra.mxu1 %v8731_v46  ;;  %v7994_v46 = vld [vmem:[%s12145_s6 + $0x10] sm:$0xff]  ;;  %v4818_v10 = vmul.f32 %v7952_v58, %v4505_v47  ;;  %vm4823_vm4 = vweird.f32 %v7952_v58 }
 0x2ee   :  { %v4835_v51 = vmul.f32 %v7950_v50, %v4834_v54  ;;  %v956_v18 = vperm.slane %v7994_v46, 7  ;;  %v955_v6 = vperm.slane %v7994_v46, 6  ;;  %vm4824_vm6 = vmor %vm4822_vm5, %vm4823_vm4 }
 0x2ef   :  { %v4819_v1 = vsub.f32 1.0, %v4818_v10 }
 0x2f0   :  { %4344 = vmatpush.bf16.msra.mxu2 %v5348_v44  ;;  %4370 = vmatpush.bf16.msrb.mxu0 %v5352_v27  ;;  %v4836_v60 = vadd.f32 %v7950_v50, %v4835_v51  ;;  %v4151_v43 = vpop.f32.mrf.mxu3  ;;  %v4164_v63 = vpop.f32.mrf.mxu0 }
 0x2f1   :  { %v4165_v34 = vadd.f32 %v4164_v63, %v956_v18  ;;  %v4820_v7 = vmul.f32 %v7952_v58, %v4819_v1 }
 0x2f2   :  { %v4179_v4 = vpop.f32.mrf.mxu1 }
 0x2f3   :  { %4345 = vmatmul.bf16.vlgmr.msra.gmra.mxu2 %v8771_v5  ;;  %4371 = vmatmul.bf16.vlgmr.msrb.gmra.mxu0 %v8771_v5  ;;  %v4840_v5 = vsel %vm4839_vm2, %v7950_v50, %v4836_v60  ;;  %v4178_v0 = vadd.f32 %v4177_v53, %v4165_v34  ;;  %v4821_v49 = vadd.f32 %v7952_v58, %v4820_v7 }
 0x2f4   :  { %v4845_v3 = vsel %vm4842_vm3, %v4844_v62, %v4840_v5 }
 0x2f5   :  { %5018 = vst [vmem:[%s12146_s7 + $0xa8] sm:$0xff] %v4845_v3  ;;  %v7296_v9 = vmul.f32 -1.442695, %v4178_v0  ;;  %v4825_v11 = vsel %vm4824_vm6, %v7952_v58, %v4821_v49  ;;  %v960_v49 = vperm.slane %v12099_v26, 3 }
 0x2f6   :  { %v4138_v59 = vpop.f32.mrf.mxu2  ;;  %v4830_v61 = vsel %vm4827_vm7, %v4829_v2, %v4825_v11 }
 0x2f7   :  { %7953 = vpow2.f32 %v7296_v9  ;;  %v4139_v12 = vadd.f32 %v4138_v59, %v955_v6  ;;  %5017 = vst [vmem:[%s12146_s7 + $0xa0] sm:$0xff] %v4830_v61 }
 0x2f8   :  { %v4153_v13 = vpop.f32.mrf.mxu3  ;;  %v4166_v14 = vpop.f32.mrf.mxu0 }
 0x2f9   :  { %v4152_v15 = vadd.f32 %v4151_v43, %v4139_v12 }
 0x2fb   :  { %v7295_v19 = vmul.f32 -1.442695, %v4152_v15 }
 0x2fd   :  { %v7954_v33 = vpop.eup %7953  ;;  %7955 = vpow2.f32 %v7295_v19 }
 0x2fe   :  { %v4508_v20 = vadd.f32 1.0, %v7954_v33  ;;  %v4140_v21 = vpop.f32.mrf.mxu2 }
 0x2ff   :  { %v959_v21 = vperm.slane %v12099_v26, 2 }
 0x300   :  { %7957 = vrcp.f32 %v4508_v20  ;;  %v4873_v28 = vand.u32 2147483648, %v4508_v20  ;;  %v4871_v31 = vand.u32 2147483647, %v4508_v20  ;;  %vm4867_vm9 = vweird.f32 %v4508_v20 }
 0x302   :  { %v4874_v37 = vor.u32 1.1754944e-38, %v4873_v28  ;;  %vm4872_vm11 = vcmp.eq.f32.partialorder %v4871_v31, 8.507059e+37 }
 0x303   :  { %v7956_v22 = vpop.eup %7955 }
 0x304   :  { %v4507_v57 = vadd.f32 1.0, %v7956_v22 }
 0x306   :  { %v7958_v23 = vpop.eup %7957  ;;  %7959 = vrcp.f32 %v4507_v57  ;;  %v4858_v44 = vand.u32 2147483648, %v4507_v57  ;;  %v4856_v50 = vand.u32 2147483647, %v4507_v57  ;;  %vm4852_vm13 = vweird.f32 %v4507_v57 }
 0x307   :  { %v4863_v24 = vmul.f32 %v7958_v23, %v4508_v20  ;;  %vm4868_vm8 = vweird.f32 %v7958_v23 }
 0x308   :  { %vm4869_vm10 = vmor %vm4867_vm9, %vm4868_vm8  ;;  %v4859_v55 = vor.u32 1.1754944e-38, %v4858_v44  ;;  %vm4857_vm15 = vcmp.eq.f32.partialorder %v4856_v50, 8.507059e+37 }
 0x309   :  { %v4864_v48 = vsub.f32 1.0, %v4863_v24 }
 0x30a   :  { %v4229_v25 = vpop.f32.mrf.mxu1 }
 0x30b   :  { %v4865_v29 = vmul.f32 %v7958_v23, %v4864_v48 }
 0x30c   :  { %v7960_v35 = vpop.eup %7959 }
 0x30d   :  { %v4866_v17 = vadd.f32 %v7958_v23, %v4865_v29  ;;  %v4848_v36 = vmul.f32 %v7960_v35, %v4507_v57  ;;  %vm4853_vm12 = vweird.f32 %v7960_v35 }
 0x30e   :  { %vm4854_vm14 = vmor %vm4852_vm13, %vm4853_vm12 }
 0x30f   :  { %v4870_v39 = vsel %vm4869_vm10, %v7958_v23, %v4866_v17  ;;  %v4849_v40 = vsub.f32 1.0, %v4848_v36 }
 0x310   :  { %v4203_v38 = vpop.f32.mrf.mxu3  ;;  %v4216_v30 = vpop.f32.mrf.mxu0  ;;  %v4875_v16 = vsel %vm4872_vm11, %v4874_v37, %v4870_v39 }
 0x311   :  { %v4217_v41 = vadd.f32 %v4216_v30, %v958_v32  ;;  %5020 = vst [vmem:[%s12146_s7 + $0xb8] sm:$0xff] %v4875_v16  ;;  %v4850_v47 = vmul.f32 %v7960_v35, %v4849_v40 }
 0x312   :  { %v4231_v27 = vpop.f32.mrf.mxu1 }
 0x313   :  { %v4230_v52 = vadd.f32 %v4229_v25, %v4217_v41  ;;  %v4851_v53 = vadd.f32 %v7960_v35, %v4850_v47 }
 0x315   :  { %v7298_v54 = vmul.f32 -1.442695, %v4230_v52  ;;  %v4855_v56 = vsel %vm4854_vm14, %v7960_v35, %v4851_v53  ;;  %v962_v53 = vperm.slane %v12099_v26, 5 }
 0x316   :  { %v4190_v51 = vpop.f32.mrf.mxu2  ;;  %v4860_v18 = vsel %vm4857_vm15, %v4859_v55, %v4855_v56 }
 0x317   :  { %7961 = vpow2.f32 %v7298_v54  ;;  %v4191_v46 = vadd.f32 %v4190_v51, %v957_v45  ;;  %5019 = vst [vmem:[%s12146_s7 + $0xb0] sm:$0xff] %v4860_v18 }
 0x318   :  { %v4205_v58 = vpop.f32.mrf.mxu3  ;;  %v4218_v60 = vpop.f32.mrf.mxu0 }
 0x319   :  { %v4204_v10 = vadd.f32 %v4203_v38, %v4191_v46 }
 0x31b   :  { %v7297_v62 = vmul.f32 -1.442695, %v4204_v10 }
 0x31d   :  { %v7962_v43 = vpop.eup %7961  ;;  %7963 = vpow2.f32 %v7297_v62 }
 0x31e   :  { %v4510_v63 = vadd.f32 1.0, %v7962_v43  ;;  %v4192_v5 = vpop.f32.mrf.mxu2 }
 0x31f   :  { %v961_v5 = vperm.slane %v12099_v26, 4 }
 0x320   :  { %7965 = vrcp.f32 %v4510_v63  ;;  %v4903_v7 = vand.u32 2147483648, %v4510_v63  ;;  %v4901_v0 = vand.u32 2147483647, %v4510_v63  ;;  %vm4897_vm1 = vweird.f32 %v4510_v63 }
 0x322   :  { %v4904_v11 = vor.u32 1.1754944e-38, %v4903_v7  ;;  %vm4902_vm3 = vcmp.eq.f32.partialorder %v4901_v0, 8.507059e+37 }
 0x323   :  { %v7964_v1 = vpop.eup %7963 }
 0x324   :  { %v4509_v34 = vadd.f32 1.0, %v7964_v1 }
 0x326   :  { %v7966_v3 = vpop.eup %7965  ;;  %7967 = vrcp.f32 %v4509_v34  ;;  %v4888_v33 = vand.u32 2147483648, %v4509_v34  ;;  %v4886_v57 = vand.u32 2147483647, %v4509_v34  ;;  %vm4882_vm5 = vweird.f32 %v4509_v34 }
 0x327   :  { %v4893_v42 = vmul.f32 %v7966_v3, %v4510_v63  ;;  %vm4898_vm0 = vweird.f32 %v7966_v3 }
 0x328   :  { %vm4899_vm2 = vmor %vm4897_vm1, %vm4898_vm0  ;;  %v4889_v48 = vor.u32 1.1754944e-38, %v4888_v33  ;;  %vm4887_vm7 = vcmp.eq.f32.partialorder %v4886_v57, 8.507059e+37  ;;  %v964_v57 = vperm.slane %v12099_v26, 7 }
 0x329   :  { %v4894_v6 = vsub.f32 1.0, %v4893_v42 }
 0x32a   :  { %v4281_v4 = vpop.f32.mrf.mxu1 }
 0x32b   :  { %v4895_v8 = vmul.f32 %v7966_v3, %v4894_v6 }
 0x32c   :  { %v7968_v9 = vpop.eup %7967 }
 0x32d   :  { %v4896_v2 = vadd.f32 %v7966_v3, %v4895_v8  ;;  %v4878_v59 = vmul.f32 %v7968_v9, %v4509_v34  ;;  %vm4883_vm4 = vweird.f32 %v7968_v9 }
 0x32e   :  { %vm4884_vm6 = vmor %vm4882_vm5, %vm4883_vm4 }
 0x32f   :  { %v4900_v13 = vsel %vm4899_vm2, %v7966_v3, %v4896_v2  ;;  %v4879_v14 = vsub.f32 1.0, %v4878_v59 }
 0x330   :  { %v4255_v12 = vpop.f32.mrf.mxu3  ;;  %v4268_v61 = vpop.f32.mrf.mxu0  ;;  %v4905_v19 = vsel %vm4902_vm3, %v4904_v11, %v4900_v13 }
 0x331   :  { %v4269_v15 = vadd.f32 %v4268_v61, %v960_v49  ;;  %5022 = vst [vmem:[%s12146_s7 + $0xc8] sm:$0xff] %v4905_v19  ;;  %v4880_v22 = vmul.f32 %v7968_v9, %v4879_v14 }
 0x332   :  { %v4283_v20 = vpop.f32.mrf.mxu1 }
 0x333   :  { %v4282_v23 = vadd.f32 %v4281_v4, %v4269_v15  ;;  %v4881_v24 = vadd.f32 %v7968_v9, %v4880_v22 }
 0x335   :  { %v7300_v25 = vmul.f32 -1.442695, %v4282_v23  ;;  %v4885_v29 = vsel %vm4884_vm6, %v7968_v9, %v4881_v24 }
 0x336   :  { %v4242_v28 = vpop.f32.mrf.mxu2  ;;  %v4890_v32 = vsel %vm4887_vm7, %v4889_v48, %v4885_v29 }
 0x337   :  { %7969 = vpow2.f32 %v7300_v25  ;;  %v4243_v31 = vadd.f32 %v4242_v28, %v959_v21  ;;  %5021 = vst [vmem:[%s12146_s7 + $0xc0] sm:$0xff] %v4890_v32 }
 0x338   :  { %v4257_v35 = vpop.f32.mrf.mxu3  ;;  %v4270_v17 = vpop.f32.mrf.mxu0 }
 0x339   :  { %v4256_v36 = vadd.f32 %v4255_v12, %v4243_v31 }
 0x33b   :  { %v7299_v37 = vmul.f32 -1.442695, %v4256_v36 }
 0x33d   :  { %v7970_v38 = vpop.eup %7969  ;;  %7971 = vpow2.f32 %v7299_v37 }
 0x33e   :  { %v4512_v30 = vadd.f32 1.0, %v7970_v38  ;;  %v4244_v39 = vpop.f32.mrf.mxu2 }
 0x340   :  { %7973 = vrcp.f32 %v4512_v30  ;;  %v4933_v47 = vand.u32 2147483648, %v4512_v30  ;;  %v4931_v52 = vand.u32 2147483647, %v4512_v30  ;;  %vm4927_vm9 = vweird.f32 %v4512_v30 }
 0x342   :  { %v4934_v56 = vor.u32 1.1754944e-38, %v4933_v47  ;;  %vm4932_vm11 = vcmp.eq.f32.partialorder %v4931_v52, 8.507059e+37 }
 0x343   :  { %v7972_v40 = vpop.eup %7971 }
 0x344   :  { %v4511_v41 = vadd.f32 1.0, %v7972_v40  ;;  %v963_v40 = vperm.slane %v12099_v26, 6 }
 0x346   :  { %v7974_v16 = vpop.eup %7973  ;;  %7975 = vrcp.f32 %v4511_v41  ;;  %v4918_v43 = vand.u32 2147483648, %v4511_v41  ;;  %v4916_v34 = vand.u32 2147483647, %v4511_v41  ;;  %vm4912_vm13 = vweird.f32 %v4511_v41 }
 0x347   :  { %v4923_v44 = vmul.f32 %v7974_v16, %v4512_v30  ;;  %vm4928_vm8 = vweird.f32 %v7974_v16 }
 0x348   :  { %vm4929_vm10 = vmor %vm4927_vm9, %vm4928_vm8  ;;  %v4919_v6 = vor.u32 1.1754944e-38, %v4918_v43  ;;  %vm4917_vm15 = vcmp.eq.f32.partialorder %v4916_v34, 8.507059e+37 }
 0x349   :  { %v4924_v45 = vsub.f32 1.0, %v4923_v44 }
 0x34a   :  { %v4333_v27 = vpop.f32.mrf.mxu1 }
 0x34b   :  { %v4925_v50 = vmul.f32 %v7974_v16, %v4924_v45 }
 0x34c   :  { %v7976_v54 = vpop.eup %7975 }
 0x34d   :  { %v4926_v55 = vadd.f32 %v7974_v16, %v4925_v50  ;;  %v4908_v51 = vmul.f32 %v7976_v54, %v4511_v41  ;;  %vm4913_vm12 = vweird.f32 %v7976_v54 }
 0x34e   :  { %vm4914_vm14 = vmor %vm4912_vm13, %vm4913_vm12 }
 0x34f   :  { %v4930_v58 = vsel %vm4929_vm10, %v7974_v16, %v4926_v55  ;;  %v4909_v60 = vsub.f32 1.0, %v4908_v51 }
 0x350   :  { %v4307_v46 = vpop.f32.mrf.mxu3  ;;  %v4320_v18 = vpop.f32.mrf.mxu0  ;;  %v4935_v62 = vsel %vm4932_vm11, %v4934_v56, %v4930_v58 }
 0x351   :  { %v4321_v10 = vadd.f32 %v4320_v18, %v962_v53  ;;  %5024 = vst [vmem:[%s12146_s7 + $0xd8] sm:$0xff] %v4935_v62  ;;  %v4910_v1 = vmul.f32 %v7976_v54, %v4909_v60 }
 0x352   :  { %v4335_v63 = vpop.f32.mrf.mxu1 }
 0x353   :  { %v4334_v3 = vadd.f32 %v4333_v27, %v4321_v10  ;;  %v4911_v42 = vadd.f32 %v7976_v54, %v4910_v1 }
 0x355   :  { %v7302_v4 = vmul.f32 -1.442695, %v4334_v3  ;;  %v4915_v8 = vsel %vm4914_vm14, %v7976_v54, %v4911_v42 }
 0x356   :  { %v4294_v7 = vpop.f32.mrf.mxu2  ;;  %v4920_v49 = vsel %vm4917_vm15, %v4919_v6, %v4915_v8 }
 0x357   :  { %7977 = vpow2.f32 %v7302_v4  ;;  %v4295_v0 = vadd.f32 %v4294_v7, %v961_v5  ;;  %5023 = vst [vmem:[%s12146_s7 + $0xd0] sm:$0xff] %v4920_v49 }
 0x358   :  { %v4309_v9 = vpop.f32.mrf.mxu3  ;;  %v4322_v2 = vpop.f32.mrf.mxu0 }
 0x359   :  { %v4308_v59 = vadd.f32 %v4307_v46, %v4295_v0 }
 0x35b   :  { %v7301_v11 = vmul.f32 -1.442695, %v4308_v59 }
 0x35d   :  { %v7978_v12 = vpop.eup %7977  ;;  %7979 = vpow2.f32 %v7301_v11 }
 0x35e   :  { %v4514_v61 = vadd.f32 1.0, %v7978_v12  ;;  %v4296_v13 = vpop.f32.mrf.mxu2 }
 0x360   :  { %7981 = vrcp.f32 %v4514_v61  ;;  %v4963_v22 = vand.u32 2147483648, %v4514_v61  ;;  %v4961_v24 = vand.u32 2147483647, %v4514_v61  ;;  %vm4957_vm1 = vweird.f32 %v4514_v61 }
 0x362   :  { %v4964_v31 = vor.u32 1.1754944e-38, %v4963_v22  ;;  %vm4962_vm3 = vcmp.eq.f32.partialorder %v4961_v24, 8.507059e+37 }
 0x363   :  { %v7980_v14 = vpop.eup %7979 }
 0x364   :  { %v4513_v15 = vadd.f32 1.0, %v7980_v14 }
 0x366   :  { %v7982_v19 = vpop.eup %7981  ;;  %7983 = vrcp.f32 %v4513_v15  ;;  %v4948_v38 = vand.u32 2147483648, %v4513_v15  ;;  %v4946_v16 = vand.u32 2147483647, %v4513_v15  ;;  %vm4942_vm5 = vweird.f32 %v4513_v15 }
 0x367   :  { %v4953_v33 = vmul.f32 %v7982_v19, %v4514_v61  ;;  %vm4958_vm0 = vweird.f32 %v7982_v19 }
 0x368   :  { %vm4959_vm2 = vmor %vm4957_vm1, %vm4958_vm0  ;;  %v4949_v47 = vor.u32 1.1754944e-38, %v4948_v38  ;;  %vm4947_vm7 = vcmp.eq.f32.partialorder %v4946_v16, 8.507059e+37 }
 0x369   :  { %v4954_v21 = vsub.f32 1.0, %v4953_v33 }
 0x36a   :  { %v4385_v20 = vpop.f32.mrf.mxu1 }
 0x36b   :  { %v4955_v23 = vmul.f32 %v7982_v19, %v4954_v21 }
 0x36c   :  { %v7984_v25 = vpop.eup %7983 }
 0x36d   :  { %v4956_v48 = vadd.f32 %v7982_v19, %v4955_v23  ;;  %v4938_v28 = vmul.f32 %v7984_v25, %v4513_v15  ;;  %vm4943_vm4 = vweird.f32 %v7984_v25 }
 0x36e   :  { %vm4944_vm6 = vmor %vm4942_vm5, %vm4943_vm4 }
 0x36f   :  { %v4960_v17 = vsel %vm4959_vm2, %v7982_v19, %v4956_v48  ;;  %v4939_v36 = vsub.f32 1.0, %v4938_v28 }
 0x370   :  { %v4372_v29 = vpop.f32.mrf.mxu0  ;;  %v4359_v32 = vpop.f32.mrf.mxu3  ;;  %v4965_v37 = vsel %vm4962_vm3, %v4964_v31, %v4960_v17 }
 0x371   :  { %v4373_v35 = vadd.f32 %v4372_v29, %v964_v57  ;;  %5026 = vst [vmem:[%s12146_s7 + $0xe8] sm:$0xff] %v4965_v37  ;;  %v4940_v41 = vmul.f32 %v7984_v25, %v4939_v36 }
 0x372   :  { %v4387_v39 = vpop.f32.mrf.mxu1 }
 0x373   :  { %v4386_v30 = vadd.f32 %v4385_v20, %v4373_v35  ;;  %v4941_v27 = vadd.f32 %v7984_v25, %v4940_v41 }
 0x375   :  { %v7304_v44 = vmul.f32 -1.442695, %v4386_v30  ;;  %v4945_v52 = vsel %vm4944_vm6, %v7984_v25, %v4941_v27 }
 0x376   :  { %v4346_v45 = vpop.f32.mrf.mxu2  ;;  %v4950_v54 = vsel %vm4947_vm7, %v4949_v47, %v4945_v52 }
 0x377   :  { %7985 = vpow2.f32 %v7304_v44  ;;  %v4347_v50 = vadd.f32 %v4346_v45, %v963_v40  ;;  %5025 = vst [vmem:[%s12146_s7 + $0xe0] sm:$0xff] %v4950_v54 }
 0x378   :  { %v4374_v53 = vpop.f32.mrf.mxu0  ;;  %v4361_v55 = vpop.f32.mrf.mxu3 }
 0x379   :  { %v4360_v26 = vadd.f32 %v4359_v32, %v4347_v50 }
 0x37b   :  { %v7303_v51 = vmul.f32 -1.442695, %v4360_v26 }
 0x37d   :  { %v7986_v56 = vpop.eup %7985  ;;  %7987 = vpow2.f32 %v7303_v51 }
 0x37e   :  { %v4516_v46 = vadd.f32 1.0, %v7986_v56  ;;  %v4348_v18 = vpop.f32.mrf.mxu2 }
 0x380   :  { %7989 = vrcp.f32 %v4516_v46  ;;  %v4993_v63 = vand.u32 2147483648, %v4516_v46  ;;  %v4991_v1 = vand.u32 2147483647, %v4516_v46  ;;  %vm4987_vm9 = vweird.f32 %v4516_v46 }
 0x382   :  { %v4994_v4 = vor.u32 1.1754944e-38, %v4993_v63  ;;  %vm4992_vm11 = vcmp.eq.f32.partialorder %v4991_v1, 8.507059e+37 }
 0x383   :  { %v7988_v58 = vpop.eup %7987 }
 0x384   :  { %v4515_v60 = vadd.f32 1.0, %v7988_v58 }
 0x386   :  { %v7990_v10 = vpop.eup %7989  ;;  %7991 = vrcp.f32 %v4515_v60  ;;  %v4978_v0 = vand.u32 2147483648, %v4515_v60  ;;  %v4976_v9 = vand.u32 2147483647, %v4515_v60  ;;  %vm4972_vm13 = vweird.f32 %v4515_v60 }
 0x387   :  { %v4983_v62 = vmul.f32 %v7990_v10, %v4516_v46  ;;  %vm4988_vm8 = vweird.f32 %v7990_v10 }
 0x388   :  { %vm4989_vm10 = vmor %vm4987_vm9, %vm4988_vm8  ;;  %v4979_v59 = vor.u32 1.1754944e-38, %v4978_v0  ;;  %vm4977_vm15 = vcmp.eq.f32.partialorder %v4976_v9, 8.507059e+37 }
 0x389   :  { %v4984_v43 = vsub.f32 1.0, %v4983_v62 }
 0x38b   :  { %v4985_v5 = vmul.f32 %v7990_v10, %v4984_v43 }
 0x38c   :  { %v7992_v34 = vpop.eup %7991 }
 0x38d   :  { %v4986_v3 = vadd.f32 %v7990_v10, %v4985_v5  ;;  %v4968_v42 = vmul.f32 %v7992_v34, %v4515_v60  ;;  %vm4973_vm12 = vweird.f32 %v7992_v34 }
 0x38e   :  { %vm4974_vm14 = vmor %vm4972_vm13, %vm4973_vm12 }
 0x38f   :  { %v4990_v6 = vsel %vm4989_vm10, %v7990_v10, %v4986_v3  ;;  %v4969_v7 = vsub.f32 1.0, %v4968_v42 }
 0x390   :  { %v4995_v8 = vsel %vm4992_vm11, %v4994_v4, %v4990_v6 }
 0x391   :  { %5028 = vst [vmem:[%s12146_s7 + $0xf8] sm:$0xff] %v4995_v8  ;;  %v4970_v49 = vmul.f32 %v7992_v34, %v4969_v7 }
 0x393   :  { %v4971_v2 = vadd.f32 %v7992_v34, %v4970_v49 }
 0x395   :  { %v4975_v11 = vsel %vm4974_vm14, %v7992_v34, %v4971_v2 }
 0x396   :  { %v4980_v12 = vsel %vm4977_vm15, %v4979_v59, %v4975_v11 }
 0x397   :  { %5027 = vst [vmem:[%s12146_s7 + $0xf0] sm:$0xff] %v4980_v12 }

</bundles_post_ra>
